<compile_context>
chip_gen: v6e
topology: v6e:2x2x1
jax: 0.10.0
libtpu: 0.0.40
codegen_flags: <defaults>
</compile_context>

<pallas_src>
import jax
import jax.numpy as jnp
from jax.experimental import pallas as pl
from jax.experimental.pallas import tpu as pltpu


# ----------------------------------------------------------------------------
# In-kernel helpers (traced once; tiny static trip-counts, fully unrolled)
# ----------------------------------------------------------------------------
def _proj_group(x_ref, wt_ref, b_ref, y_ref):
    """y[l] = x[l] @ wt[l] + b[l] for every layer l in this shape-group."""
    for l in range(x_ref.shape[0]):                       # static unrolled loop
        acc = jnp.dot(x_ref[l], wt_ref[l], preferred_element_type=jnp.float32)
        y_ref[l] = acc + b_ref[l]                          # f32 bias add / store


def _write_prompts(ctx_ref, pre_ref, suf_ref, out_ref):
    """out = [prefix | ctx (broadcast over classes) | suffix] via 3 direct stores."""
    n_cls = pre_ref.shape[0]
    n_ctx, d = ctx_ref.shape
    out_ref[:, 0:1, :] = pre_ref[...]
    out_ref[:, 1:1 + n_ctx, :] = jnp.broadcast_to(ctx_ref[...][None], (n_cls, n_ctx, d))
    out_ref[:, 1 + n_ctx:, :] = suf_ref[...]


def _make_kernel(has_group_b):
    if has_group_b:
        def kernel(xA_ref, wA_ref, bA_ref, xB_ref, wB_ref, bB_ref,
                   ctx_ref, pre_ref, suf_ref,
                   yA_ref, yB_ref, prompts_ref):
            _proj_group(xA_ref, wA_ref, bA_ref, yA_ref)    # ctx_dim -> vis_dim
            _proj_group(xB_ref, wB_ref, bB_ref, yB_ref)    # vis_dim -> ctx_dim
            _write_prompts(ctx_ref, pre_ref, suf_ref, prompts_ref)
    else:
        def kernel(xA_ref, wA_ref, bA_ref,
                   ctx_ref, pre_ref, suf_ref,
                   yA_ref, prompts_ref):
            _proj_group(xA_ref, wA_ref, bA_ref, yA_ref)
            _write_prompts(ctx_ref, pre_ref, suf_ref, prompts_ref)
    return kernel


# ----------------------------------------------------------------------------
# Module (parameter container + forward)
# ----------------------------------------------------------------------------
class MultiModalPromptLearnerPallas:
    def __init__(self, key, *, n_cls, n_ctx, seq_len, ctx_dim=512, vis_dim=768,
                 prompt_depth=4, dtype=jnp.float32):
        assert prompt_depth >= 1
        self.n_cls = n_cls
        self.n_ctx = n_ctx
        self.ctx_dim = ctx_dim
        self.vis_dim = vis_dim
        self.seq_len = seq_len
        self.compound_prompts_depth = prompt_depth
        n_suffix = seq_len - 1 - n_ctx
        assert n_suffix > 0

        keys = iter(jax.random.split(key, 64))

        def normal(shape, std=0.02):
            return (std * jax.random.normal(next(keys), shape)).astype(dtype)

        # learnable shared context vectors (n_ctx, ctx_dim)
        self.ctx = normal((n_ctx, ctx_dim))

        # proj_lang_to_vis : Linear(ctx_dim, 768); proj_vis_to_lang : Linear(768, ctx_dim)
        proj_l2v_w = normal((vis_dim, ctx_dim))
        proj_l2v_b = normal((vis_dim,))
        self.proj_v2l_w = normal((ctx_dim, vis_dim))   # unused in forward (parity only)
        self.proj_v2l_b = normal((ctx_dim,))

        d = prompt_depth - 1
        # text params for even layer indices, visual params for odd layer indices
        self.compound_prompts_text_parameters = [
            normal((n_ctx, ctx_dim)) for i in range(d) if i % 2 == 0
        ]
        self.visual_deep_prompts_parameters = [
            normal((n_ctx, vis_dim)) for i in range(d) if i % 2 != 0
        ]
        # projection layers: even -> Linear(ctx_dim, 768), odd -> Linear(768, ctx_dim)
        layer_wb = []
        for i in range(d):
            if i % 2 == 0:
                layer_wb.append((normal((vis_dim, ctx_dim)), normal((vis_dim,))))
            else:
                layer_wb.append((normal((ctx_dim, vis_dim)), normal((ctx_dim,))))

        # ---- group by true shape (NO zero-padding), pre-transpose + bf16 once ----
        a_w, a_b, a_x = [], [], []     # group A: ctx_dim -> vis_dim
        b_w, b_b, b_x = [], [], []     # group B: vis_dim -> ctx_dim
        self._ref_layers = []          # (wt_bf16 (in,out), bias (1,out) f32) in layer order
        for i, (w, b) in enumerate(layer_wb):
            wt = w.T.astype(jnp.bfloat16)                 # (in, out) bf16, transposed once
            bb = b.astype(jnp.float32)[None]              # (1, out) f32
            self._ref_layers.append((wt, bb))
            if i % 2 == 0:
                a_w.append(wt); a_b.append(bb)
                a_x.append(self.compound_prompts_text_parameters[i // 2])
            else:
                b_w.append(wt); b_b.append(bb)
                b_x.append(self.visual_deep_prompts_parameters[(i - 1) // 2])
        # final layer of group A: proj_lang_to_vis applied to ctx
        wt = proj_l2v_w.T.astype(jnp.bfloat16)
        bb = proj_l2v_b.astype(jnp.float32)[None]
        self._ref_layers.append((wt, bb))
        a_w.append(wt); a_b.append(bb); a_x.append(self.ctx)

        self._nA = len(a_w)
        self._nB = len(b_w)
        self.wA = jnp.stack(a_w)                               # (nA, ctx_dim, vis_dim) bf16
        self.bA = jnp.stack(a_b)                               # (nA, 1, vis_dim)       f32
        self.xA = jnp.stack(a_x).astype(jnp.bfloat16)          # (nA, n_ctx, ctx_dim)   bf16
        if self._nB:
            self.wB = jnp.stack(b_w)                           # (nB, vis_dim, ctx_dim) bf16
            self.bB = jnp.stack(b_b)                           # (nB, 1, ctx_dim)       f32
            self.xB = jnp.stack(b_x).astype(jnp.bfloat16)      # (nB, n_ctx, vis_dim)   bf16

        # synthetic stand-ins for the frozen CLIP token-embedding buffers
        self.token_prefix = normal((n_cls, 1, ctx_dim), std=1.0)
        self.token_suffix = normal((n_cls, n_suffix, ctx_dim), std=1.0)

        # ---- ONE fused pallas_call, no grid: whole-array VMEM blocks (~3.5 MB) ----
        out_shapes = [jax.ShapeDtypeStruct((self._nA, n_ctx, vis_dim), jnp.float32)]
        if self._nB:
            out_shapes.append(jax.ShapeDtypeStruct((self._nB, n_ctx, ctx_dim), jnp.float32))
        out_shapes.append(jax.ShapeDtypeStruct((n_cls, seq_len, ctx_dim), jnp.float32))
        self._fused_call = pl.pallas_call(
            _make_kernel(self._nB > 0),
            out_shape=tuple(out_shapes),
            # explicit scoped-VMEM headroom (v5e default is only 16 MiB); today's
            # buffers are ~3.5 MB so this is pure headroom for larger prompt_depth.
            compiler_params=pltpu.CompilerParams(vmem_limit_bytes=32 * 1024 * 1024),
        )

    def forward(self):
        if self._nB:
            yA, yB, prompts = self._fused_call(
                self.xA, self.wA, self.bA,
                self.xB, self.wB, self.bB,
                self.ctx, self.token_prefix, self.token_suffix)
        else:
            yA, prompts = self._fused_call(
                self.xA, self.wA, self.bA,
                self.ctx, self.token_prefix, self.token_suffix)
            yB = None

        d = self.compound_prompts_depth - 1
        visual_deep_prompts = []
        compound_prompts_text = []
        for index in range(d):
            if index % 2 == 0:
                visual_deep_prompts.append(yA[index // 2])
                compound_prompts_text.append(self.compound_prompts_text_parameters[index // 2])
            else:
                compound_prompts_text.append(yB[(index - 1) // 2])
                visual_deep_prompts.append(self.visual_deep_prompts_parameters[(index - 1) // 2])
        projected_ctx = yA[-1]
        return prompts, projected_ctx, compound_prompts_text, visual_deep_prompts

    # pure-JAX reference (same bf16 weights/activations, f32 accumulation)
    def forward_ref(self):
        def lin(x, wt_bf16, b):
            return jnp.dot(x.astype(jnp.bfloat16), wt_bf16,
                           preferred_element_type=jnp.float32) + b

        ctx_e = jnp.broadcast_to(self.ctx[None], (self.n_cls,) + self.ctx.shape)
        prompts = jnp.concatenate([self.token_prefix, ctx_e, self.token_suffix], axis=1)
        d = self.compound_prompts_depth - 1
        vdp, cpt = [], []
        for i in range(d):
            wt, b = self._ref_layers[i]
            if i % 2 == 0:
                p = self.compound_prompts_text_parameters[i // 2]
                vdp.append(lin(p, wt, b)); cpt.append(p)
            else:
                p = self.visual_deep_prompts_parameters[(i - 1) // 2]
                cpt.append(lin(p, wt, b)); vdp.append(p)
        wt, b = self._ref_layers[d]
        projected_ctx = lin(self.ctx, wt, b)
        return prompts, projected_ctx, cpt, vdp


# ----------------------------------------------------------------------------
if __name__ == "__main__":
    key = jax.random.PRNGKey(0)
    # small config: 3 classes, 4 ctx tokens, 16-token sequence, CLIP dims 512/768
    learner = MultiModalPromptLearnerPallas(
        key, n_cls=3, n_ctx=4, seq_len=16, ctx_dim=512, vis_dim=768, prompt_depth=4)

    prompts, projected_ctx, cpt, vdp = learner.forward()
    jax.block_until_ready((prompts, projected_ctx, cpt, vdp))

    # verify against pure-JAX reference
    r_prompts, r_projected, r_cpt, r_vdp = learner.forward_ref()
    assert prompts.shape == (3, 16, 512) and projected_ctx.shape == (4, 768)
    assert len(cpt) == 3 and len(vdp) == 3
    assert jnp.allclose(prompts, r_prompts, atol=1e-6)
    assert jnp.allclose(projected_ctx, r_projected, atol=1e-4)
    for a, b in zip(cpt, r_cpt):
        assert jnp.allclose(a, b, atol=1e-4)
    for a, b in zip(vdp, r_vdp):
        assert jnp.allclose(a, b, atol=1e-4)

    print("KERNEL_OK")
</pallas_src>

<mosaic_0001>
module attributes {stable_mosaic.version = 11 : i64} {
  func.func @kernel(%arg0: memref<3x4x512xbf16, #tpu.memory_space<vmem>>, %arg1: memref<3x512x768xbf16, #tpu.memory_space<vmem>>, %arg2: memref<3x1x768xf32, #tpu.memory_space<vmem>>, %arg3: memref<1x4x768xbf16, #tpu.memory_space<vmem>>, %arg4: memref<1x768x512xbf16, #tpu.memory_space<vmem>>, %arg5: memref<1x1x512xf32, #tpu.memory_space<vmem>>, %arg6: memref<4x512xf32, #tpu.memory_space<vmem>>, %arg7: memref<3x1x512xf32, #tpu.memory_space<vmem>>, %arg8: memref<3x11x512xf32, #tpu.memory_space<vmem>>, %arg9: memref<3x4x768xf32, #tpu.memory_space<vmem>>, %arg10: memref<1x4x512xf32, #tpu.memory_space<vmem>>, %arg11: memref<3x16x512xf32, #tpu.memory_space<vmem>>) attributes {dimension_semantics = [], scalar_prefetch = 0 : i64, scratch_operands = 0 : i64, tpu.core_type = #tpu.core_type<tc>} {
    %c0 = arith.constant 0 : index
    %c0_0 = arith.constant 0 : index
    %c0_1 = arith.constant 0 : index
    %0 = vector.load %arg0[%c0, %c0_0, %c0_1] : memref<3x4x512xbf16, #tpu.memory_space<vmem>>, vector<1x4x512xbf16>
    %1 = vector.shape_cast %0 : vector<1x4x512xbf16> to vector<4x512xbf16>
    %c0_2 = arith.constant 0 : index
    %c0_3 = arith.constant 0 : index
    %c0_4 = arith.constant 0 : index
    %2 = vector.load %arg1[%c0_2, %c0_3, %c0_4] : memref<3x512x768xbf16, #tpu.memory_space<vmem>>, vector<1x512x768xbf16>
    %3 = vector.shape_cast %2 : vector<1x512x768xbf16> to vector<512x768xbf16>
    %cst = arith.constant dense<0.000000e+00> : vector<4x768xf32>
    %4 = tpu.matmul %1, %3, %cst {dimension_numbers = #tpu.dot_dimension_numbers<[1], [0], [0], [1], [0, 0, 1, 1], [], []>} : vector<4x512xbf16>, vector<512x768xbf16>, vector<4x768xf32> -> vector<4x768xf32>
    %c0_5 = arith.constant 0 : index
    %c0_6 = arith.constant 0 : index
    %c0_7 = arith.constant 0 : index
    %5 = vector.load %arg2[%c0_5, %c0_6, %c0_7] : memref<3x1x768xf32, #tpu.memory_space<vmem>>, vector<1x1x768xf32>
    %6 = vector.shape_cast %5 : vector<1x1x768xf32> to vector<1x768xf32>
    %7 = vector.broadcast %6 : vector<1x768xf32> to vector<4x768xf32>
    %8 = arith.addf %4, %7 : vector<4x768xf32>
    %c0_8 = arith.constant 0 : index
    %c0_9 = arith.constant 0 : index
    %c0_10 = arith.constant 0 : index
    %9 = vector.load %arg9[%c0_8, %c0_9, %c0_10] : memref<3x4x768xf32, #tpu.memory_space<vmem>>, vector<1x4x768xf32>
    %10 = vector.shape_cast %9 : vector<1x4x768xf32> to vector<4x768xf32>
    %11 = vector.shape_cast %8 : vector<4x768xf32> to vector<1x4x768xf32>
    tpu.vector_store %arg9[%c0_8, %c0_9, %c0_10], %11 {strides = array<i32>} : memref<3x4x768xf32, #tpu.memory_space<vmem>>, vector<1x4x768xf32>,
    %c1 = arith.constant 1 : index
    %c0_11 = arith.constant 0 : index
    %c0_12 = arith.constant 0 : index
    %12 = vector.load %arg0[%c1, %c0_11, %c0_12] : memref<3x4x512xbf16, #tpu.memory_space<vmem>>, vector<1x4x512xbf16>
    %13 = vector.shape_cast %12 : vector<1x4x512xbf16> to vector<4x512xbf16>
    %c1_13 = arith.constant 1 : index
    %c0_14 = arith.constant 0 : index
    %c0_15 = arith.constant 0 : index
    %14 = vector.load %arg1[%c1_13, %c0_14, %c0_15] : memref<3x512x768xbf16, #tpu.memory_space<vmem>>, vector<1x512x768xbf16>
    %15 = vector.shape_cast %14 : vector<1x512x768xbf16> to vector<512x768xbf16>
    %cst_16 = arith.constant dense<0.000000e+00> : vector<4x768xf32>
    %16 = tpu.matmul %13, %15, %cst_16 {dimension_numbers = #tpu.dot_dimension_numbers<[1], [0], [0], [1], [0, 0, 1, 1], [], []>} : vector<4x512xbf16>, vector<512x768xbf16>, vector<4x768xf32> -> vector<4x768xf32>
    %c1_17 = arith.constant 1 : index
    %c0_18 = arith.constant 0 : index
    %c0_19 = arith.constant 0 : index
    %17 = vector.load %arg2[%c1_17, %c0_18, %c0_19] : memref<3x1x768xf32, #tpu.memory_space<vmem>>, vector<1x1x768xf32>
    %18 = vector.shape_cast %17 : vector<1x1x768xf32> to vector<1x768xf32>
    %19 = vector.broadcast %18 : vector<1x768xf32> to vector<4x768xf32>
    %20 = arith.addf %16, %19 : vector<4x768xf32>
    %c1_20 = arith.constant 1 : index
    %c0_21 = arith.constant 0 : index
    %c0_22 = arith.constant 0 : index
    %21 = vector.load %arg9[%c1_20, %c0_21, %c0_22] : memref<3x4x768xf32, #tpu.memory_space<vmem>>, vector<1x4x768xf32>
    %22 = vector.shape_cast %21 : vector<1x4x768xf32> to vector<4x768xf32>
    %23 = vector.shape_cast %20 : vector<4x768xf32> to vector<1x4x768xf32>
    tpu.vector_store %arg9[%c1_20, %c0_21, %c0_22], %23 {strides = array<i32>} : memref<3x4x768xf32, #tpu.memory_space<vmem>>, vector<1x4x768xf32>,
    %c2 = arith.constant 2 : index
    %c0_23 = arith.constant 0 : index
    %c0_24 = arith.constant 0 : index
    %24 = vector.load %arg0[%c2, %c0_23, %c0_24] : memref<3x4x512xbf16, #tpu.memory_space<vmem>>, vector<1x4x512xbf16>
    %25 = vector.shape_cast %24 : vector<1x4x512xbf16> to vector<4x512xbf16>
    %c2_25 = arith.constant 2 : index
    %c0_26 = arith.constant 0 : index
    %c0_27 = arith.constant 0 : index
    %26 = vector.load %arg1[%c2_25, %c0_26, %c0_27] : memref<3x512x768xbf16, #tpu.memory_space<vmem>>, vector<1x512x768xbf16>
    %27 = vector.shape_cast %26 : vector<1x512x768xbf16> to vector<512x768xbf16>
    %cst_28 = arith.constant dense<0.000000e+00> : vector<4x768xf32>
    %28 = tpu.matmul %25, %27, %cst_28 {dimension_numbers = #tpu.dot_dimension_numbers<[1], [0], [0], [1], [0, 0, 1, 1], [], []>} : vector<4x512xbf16>, vector<512x768xbf16>, vector<4x768xf32> -> vector<4x768xf32>
    %c2_29 = arith.constant 2 : index
    %c0_30 = arith.constant 0 : index
    %c0_31 = arith.constant 0 : index
    %29 = vector.load %arg2[%c2_29, %c0_30, %c0_31] : memref<3x1x768xf32, #tpu.memory_space<vmem>>, vector<1x1x768xf32>
    %30 = vector.shape_cast %29 : vector<1x1x768xf32> to vector<1x768xf32>
    %31 = vector.broadcast %30 : vector<1x768xf32> to vector<4x768xf32>
    %32 = arith.addf %28, %31 : vector<4x768xf32>
    %c2_32 = arith.constant 2 : index
    %c0_33 = arith.constant 0 : index
    %c0_34 = arith.constant 0 : index
    %33 = vector.load %arg9[%c2_32, %c0_33, %c0_34] : memref<3x4x768xf32, #tpu.memory_space<vmem>>, vector<1x4x768xf32>
    %34 = vector.shape_cast %33 : vector<1x4x768xf32> to vector<4x768xf32>
    %35 = vector.shape_cast %32 : vector<4x768xf32> to vector<1x4x768xf32>
    tpu.vector_store %arg9[%c2_32, %c0_33, %c0_34], %35 {strides = array<i32>} : memref<3x4x768xf32, #tpu.memory_space<vmem>>, vector<1x4x768xf32>,
    %c0_35 = arith.constant 0 : index
    %c0_36 = arith.constant 0 : index
    %c0_37 = arith.constant 0 : index
    %36 = vector.load %arg3[%c0_35, %c0_36, %c0_37] : memref<1x4x768xbf16, #tpu.memory_space<vmem>>, vector<1x4x768xbf16>
    %37 = vector.shape_cast %36 : vector<1x4x768xbf16> to vector<4x768xbf16>
    %c0_38 = arith.constant 0 : index
    %c0_39 = arith.constant 0 : index
    %c0_40 = arith.constant 0 : index
    %38 = vector.load %arg4[%c0_38, %c0_39, %c0_40] : memref<1x768x512xbf16, #tpu.memory_space<vmem>>, vector<1x768x512xbf16>
    %39 = vector.shape_cast %38 : vector<1x768x512xbf16> to vector<768x512xbf16>
    %cst_41 = arith.constant dense<0.000000e+00> : vector<4x512xf32>
    %40 = tpu.matmul %37, %39, %cst_41 {dimension_numbers = #tpu.dot_dimension_numbers<[1], [0], [0], [1], [0, 0, 1, 1], [], []>} : vector<4x768xbf16>, vector<768x512xbf16>, vector<4x512xf32> -> vector<4x512xf32>
    %c0_42 = arith.constant 0 : index
    %c0_43 = arith.constant 0 : index
    %c0_44 = arith.constant 0 : index
    %41 = vector.load %arg5[%c0_42, %c0_43, %c0_44] : memref<1x1x512xf32, #tpu.memory_space<vmem>>, vector<1x1x512xf32>
    %42 = vector.shape_cast %41 : vector<1x1x512xf32> to vector<1x512xf32>
    %43 = vector.broadcast %42 : vector<1x512xf32> to vector<4x512xf32>
    %44 = arith.addf %40, %43 : vector<4x512xf32>
    %c0_45 = arith.constant 0 : index
    %c0_46 = arith.constant 0 : index
    %c0_47 = arith.constant 0 : index
    %45 = vector.load %arg10[%c0_45, %c0_46, %c0_47] : memref<1x4x512xf32, #tpu.memory_space<vmem>>, vector<1x4x512xf32>
    %46 = vector.shape_cast %45 : vector<1x4x512xf32> to vector<4x512xf32>
    %47 = vector.shape_cast %44 : vector<4x512xf32> to vector<1x4x512xf32>
    tpu.vector_store %arg10[%c0_45, %c0_46, %c0_47], %47 {strides = array<i32>} : memref<1x4x512xf32, #tpu.memory_space<vmem>>, vector<1x4x512xf32>,
    %c0_48 = arith.constant 0 : index
    %c0_49 = arith.constant 0 : index
    %c0_50 = arith.constant 0 : index
    %48 = vector.load %arg7[%c0_48, %c0_49, %c0_50] : memref<3x1x512xf32, #tpu.memory_space<vmem>>, vector<3x1x512xf32>
    %c0_51 = arith.constant 0 : index
    %c0_52 = arith.constant 0 : index
    %c0_53 = arith.constant 0 : index
    %49 = vector.load %arg11[%c0_51, %c0_52, %c0_53] : memref<3x16x512xf32, #tpu.memory_space<vmem>>, vector<3x1x512xf32>
    tpu.vector_store %arg11[%c0_51, %c0_52, %c0_53], %48 {strides = array<i32>} : memref<3x16x512xf32, #tpu.memory_space<vmem>>, vector<3x1x512xf32>,
    %c0_54 = arith.constant 0 : index
    %c0_55 = arith.constant 0 : index
    %50 = vector.load %arg6[%c0_54, %c0_55] : memref<4x512xf32, #tpu.memory_space<vmem>>, vector<4x512xf32>
    %51 = vector.shape_cast %50 : vector<4x512xf32> to vector<1x4x512xf32>
    %52 = vector.shape_cast %51 : vector<1x4x512xf32> to vector<1x4x512xf32>
    %53 = vector.broadcast %52 : vector<1x4x512xf32> to vector<3x4x512xf32>
    %c0_56 = arith.constant 0 : index
    %c1_57 = arith.constant 1 : index
    %c0_58 = arith.constant 0 : index
    %54 = vector.load %arg11[%c0_56, %c1_57, %c0_58] : memref<3x16x512xf32, #tpu.memory_space<vmem>>, vector<3x4x512xf32>
    tpu.vector_store %arg11[%c0_56, %c1_57, %c0_58], %53 {strides = array<i32>} : memref<3x16x512xf32, #tpu.memory_space<vmem>>, vector<3x4x512xf32>,
    %c0_59 = arith.constant 0 : index
    %c0_60 = arith.constant 0 : index
    %c0_61 = arith.constant 0 : index
    %55 = vector.load %arg8[%c0_59, %c0_60, %c0_61] : memref<3x11x512xf32, #tpu.memory_space<vmem>>, vector<3x11x512xf32>
    %c0_62 = arith.constant 0 : index
    %c5 = arith.constant 5 : index
    %c0_63 = arith.constant 0 : index
    %56 = vector.load %arg11[%c0_62, %c5, %c0_63] : memref<3x16x512xf32, #tpu.memory_space<vmem>>, vector<3x11x512xf32>
    tpu.vector_store %arg11[%c0_62, %c5, %c0_63], %55 {strides = array<i32>} : memref<3x16x512xf32, #tpu.memory_space<vmem>>, vector<3x11x512xf32>,
    return
  }
}

</mosaic_0001>

<bundles_post_ra>
// kernel: tpu_custom_call.1
= control target key start
LH: loop header
LB: loop body
LE: loop exit
PB: predicated region body
PF: predicated region fallthrough
CT: control target
= control target key end

     0   :  { %17 = vsyncpa [#allocation3], 0  ;;  %s8825_s0 = inlined_call_operand.hbm [shape: bf16[3,4,512], index: 0, kind: input, shape index: {}]   ;;  %s8826_s1 = inlined_call_operand.hbm [shape: bf16[3,512,768], index: 1, kind: input, shape index: {}]   ;;  %s8827_s2 = inlined_call_operand.hbm [shape: f32[3,1,768], index: 2, kind: input, shape index: {}]   ;;  %s8828_s3 = inlined_call_operand.hbm [shape: bf16[1,4,768], index: 3, kind: input, shape index: {}]   ;;  %s8829_s4 = inlined_call_operand.hbm [shape: bf16[1,768,512], index: 4, kind: input, shape index: {}]   ;;  %s8830_s5 = inlined_call_operand.hbm [shape: f32[1,1,512], index: 5, kind: input, shape index: {}]   ;;  %s8831_s6 = inlined_call_operand.hbm [shape: f32[4,512], index: 6, kind: input, shape index: {}]   ;;  %s8832_s7 = inlined_call_operand.hbm [shape: f32[3,1,512], index: 7, kind: input, shape index: {}]   ;;  %s8833_s8 = inlined_call_operand.vmem [shape: f32[3,11,512], index: 8, kind: input, shape index: {}]   ;;  %s8834_s9 = inlined_call_operand.hbm [shape: f32[3,4,768], index: 9, kind: output, shape index: {0}]   ;;  %s8835_s10 = inlined_call_operand.hbm [shape: f32[1,4,512], index: 10, kind: output, shape index: {1}]   ;;  %s8836_s11 = inlined_call_operand.hbm [shape: f32[3,16,512], index: 11, kind: output, shape index: {2}]  }
   0x1   :  { %18 = vsyncpa [#allocation6], 0 }
   0x2   :  { %19 = vsyncpa [#allocation9], 0 }
   0x3   :  { %20 = vsyncpa [#allocation12], 0 }
   0x4   :  { %21 = vsyncpa [#allocation15], 0 }
   0x5   :  { %22 = vsyncpa [#allocation4], 0 }
   0x6   :  { %23 = vsyncpa [#allocation18], 0  ;;  %s8426_s17 = smov [#allocation5]  }
   0x7   :  { %s41_s18 = sshll.u32 %s8426_s17, 4  ;;  %s42_s18 = int_to_ptr.vmem [resolvable:$true] %s41_s18 }
   0x8   :  { %s8200_s19 = scalar_lea.vmem %s42_s18, 73728  ;;  %p8205_p1 = scmp.lt.s32.totalorder %s42_s18, %s42_s18 }
   0x9   :  { %p8201_p0 = scmp.ne.s32.totalorder %s42_s18, %s8200_s19  ;;  %p8206_p2 = scmp.lt.s32.totalorder %s8200_s19, %s8200_s19 }
   0xb   :  { %p8207_p3 = por %p8206_p2, %p8205_p1 }
   0xd   :  { %p8208_p4 = pnand %p8207_p3, %p8201_p0 }
   0xf   :  { %8211 = shalt.err (!%p8208_p4)
}
  0x10   :  { %s8427_s20 = smov 384   ;;  %s8428_s21 = smov 24  }
  0x11   :  { %47 = dma.hbm_to_vmem [thread:$0]  %s8826_s1, 73728, %s42_s18, [#allocation6], %s8427_s20, %s8427_s20, %s8428_s21  }
  0x12   :  { %s8429_s24 = smov [#allocation8]   ;;  %s8430_s26 = smov [#allocation11]  }
  0x13   :  { %s66_s25 = sshll.u32 %s8429_s24, 4  ;;  %s88_s27 = sshll.u32 %s8430_s26, 4  ;;  %s67_s25 = int_to_ptr.vmem [resolvable:$true] %s66_s25  ;;  %s89_s27 = int_to_ptr.vmem [resolvable:$true] %s88_s27 }
  0x14   :  { %s8220_s28 = scalar_lea.vmem %s67_s25, 192  ;;  %p8225_p6 = scmp.lt.s32.totalorder %s67_s25, %s67_s25 }
  0x15   :  { %p8221_p5 = scmp.ne.s32.totalorder %s67_s25, %s8220_s28  ;;  %p8226_p7 = scmp.lt.s32.totalorder %s8220_s28, %s8220_s28 }
  0x17   :  { %p8227_p8 = por %p8226_p7, %p8225_p6 }
  0x19   :  { %p8228_p9 = pnand %p8227_p8, %p8221_p5 }
  0x1b   :  { %8231 = shalt.err (!%p8228_p9)
}
  0x1c   :  { %69 = dma.hbm_to_vmem [thread:$0]  %s8828_s3, 192, %s67_s25, [#allocation9]  }
  0x1d   :  { %s8240_s12 = scalar_lea.vmem %s89_s27, 64  ;;  %p8245_p11 = scmp.lt.s32.totalorder %s89_s27, %s89_s27 }
  0x1e   :  { %p8241_p10 = scmp.ne.s32.totalorder %s89_s27, %s8240_s12  ;;  %p8246_p12 = scmp.lt.s32.totalorder %s8240_s12, %s8240_s12 }
  0x20   :  { %p8247_p13 = por %p8246_p12, %p8245_p11 }
  0x22   :  { %p8248_p0 = pnand %p8247_p13, %p8241_p10 }
  0x24   :  { %8251 = shalt.err (!%p8248_p0)
}
  0x25   :  { %91 = dma.hbm_to_vmem [thread:$0]  %s8830_s5, 64, %s89_s27, [#allocation12]  }
  0x26   :  { %s8431_s14 = smov [#allocation2]  }
  0x27   :  { %s29_s15 = sshll.u32 %s8431_s14, 4  ;;  %s30_s15 = int_to_ptr.vmem [resolvable:$true] %s29_s15 }
  0x28   :  { %s8260_s16 = scalar_lea.vmem %s30_s15, 384  ;;  %p8265_p2 = scmp.lt.s32.totalorder %s30_s15, %s30_s15 }
  0x29   :  { %p8261_p1 = scmp.ne.s32.totalorder %s30_s15, %s8260_s16  ;;  %p8266_p3 = scmp.lt.s32.totalorder %s8260_s16, %s8260_s16 }
  0x2b   :  { %p8267_p4 = por %p8266_p3, %p8265_p2 }
  0x2d   :  { %p8268_p5 = pnand %p8267_p4, %p8261_p1 }
  0x2f   :  { %8271 = shalt.err (!%p8268_p5)
}
  0x30   :  { %s8432_s3 = smov 128   ;;  %s8433_s17 = smov 8  }
  0x31   :  { %35 = dma.hbm_to_vmem [thread:$0]  %s8825_s0, 384, %s30_s15, [#allocation3], %s8432_s3, %s8432_s3, %s8433_s17  }
  0x32   :  { %s8434_s22 = smov [#allocation7]  }
  0x33   :  { %s53_s23 = sshll.u32 %s8434_s22, 4  ;;  %s54_s23 = int_to_ptr.vmem [resolvable:$true] %s53_s23 }
  0x34   :  { %s8280_s5 = scalar_lea.vmem %s54_s23, 288  ;;  %p8285_p7 = scmp.lt.s32.totalorder %s54_s23, %s54_s23 }
  0x35   :  { %p8281_p6 = scmp.ne.s32.totalorder %s54_s23, %s8280_s5  ;;  %p8286_p8 = scmp.lt.s32.totalorder %s8280_s5, %s8280_s5 }
  0x37   :  { %p8287_p9 = por %p8286_p8, %p8285_p7 }
  0x39   :  { %p8288_p10 = pnand %p8287_p9, %p8281_p6 }
  0x3b   :  { %8291 = shalt.err (!%p8288_p10)
}
  0x3c   :  { %s8435_s24 = smov 96   ;;  %s8436_s25 = smov 6  }
  0x3d   :  { %59 = dma.hbm_to_vmem [thread:$0]  %s8827_s2, 288, %s54_s23, [#allocation6], %s8435_s24, %s8435_s24, %s8436_s25  }
  0x3e   :  { %s8437_s28 = smov [#allocation10]  }
  0x3f   :  { %s75_s29 = sshll.u32 %s8437_s28, 4  ;;  %s76_s29 = int_to_ptr.vmem [resolvable:$true] %s75_s29 }
  0x40   :  { %s8300_s0 = scalar_lea.vmem %s76_s29, 24576  ;;  %p8305_p12 = scmp.lt.s32.totalorder %s76_s29, %s76_s29 }
  0x41   :  { %p8301_p11 = scmp.ne.s32.totalorder %s76_s29, %s8300_s0  ;;  %p8306_p13 = scmp.lt.s32.totalorder %s8300_s0, %s8300_s0 }
  0x43   :  { %p8307_p0 = por %p8306_p13, %p8305_p12 }
  0x45   :  { %p8308_p1 = pnand %p8307_p0, %p8301_p11 }
  0x47   :  { %8311 = shalt.err (!%p8308_p1)
}
  0x48   :  { %s8438_s30 = smov 256   ;;  %s8439_s12 = smov 16  }
  0x49   :  { %81 = dma.hbm_to_vmem [thread:$0]  %s8829_s4, 24576, %s76_s29, [#allocation9], %s8438_s30, %s8438_s30, %s8439_s12  }
  0x4a   :  { %s8440_s14 = smov [#allocation13]   ;;  %s8441_s16 = smov [#allocation14]  }
  0x4b   :  { %s98_s15 = sshll.u32 %s8440_s14, 4  ;;  %s107_s2 = sshll.u32 %s8441_s16, 4  ;;  %s99_s15 = int_to_ptr.vmem [resolvable:$true] %s98_s15  ;;  %s108_s2 = int_to_ptr.vmem [resolvable:$true] %s107_s2 }
  0x4c   :  { %s8320_s3 = scalar_lea.vmem %s99_s15, 256  ;;  %p8325_p3 = scmp.lt.s32.totalorder %s99_s15, %s99_s15 }
  0x4d   :  { %p8321_p2 = scmp.ne.s32.totalorder %s99_s15, %s8320_s3  ;;  %p8326_p4 = scmp.lt.s32.totalorder %s8320_s3, %s8320_s3 }
  0x4f   :  { %p8327_p5 = por %p8326_p4, %p8325_p3 }
  0x51   :  { %p8328_p6 = pnand %p8327_p5, %p8321_p2 }
  0x53   :  { %8331 = shalt.err (!%p8328_p6)
}
  0x54   :  { %101 = dma.hbm_to_vmem [thread:$0]  %s8831_s6, 256, %s99_s15, [#allocation12]  }
  0x55   :  { %s8340_s19 = scalar_lea.vmem %s108_s2, 192  ;;  %p8345_p8 = scmp.lt.s32.totalorder %s108_s2, %s108_s2 }
  0x56   :  { %p8341_p7 = scmp.ne.s32.totalorder %s108_s2, %s8340_s19  ;;  %p8346_p9 = scmp.lt.s32.totalorder %s8340_s19, %s8340_s19 }
  0x58   :  { %p8347_p10 = por %p8346_p9, %p8345_p8 }
  0x5a   :  { %p8348_p11 = pnand %p8347_p10, %p8341_p7 }
  0x5c   :  { %8351 = shalt.err (!%p8348_p11)
}
  0x5d   :  { %s8442_s4 = smov 64   ;;  %s8443_s22 = smov 4  }
  0x5e   :  { %113 = dma.hbm_to_vmem [thread:$0]  %s8832_s7, 192, %s108_s2, [#allocation15], %s8442_s4, %s8442_s4, %s8443_s22  }
  0x5f   :  { %8412 = dma.done.wait [#allocation3], 384  }
  0x60   :  { %8413 = vsyncadd [#allocation3], 4294966912 }
  0x61   :  { %8414 = dma.done.wait [#allocation6], 74016  }
  0x62   :  { %8415 = vsyncadd [#allocation6], 4294893280 }
  0x63   :  { %8416 = dma.done.wait [#allocation9], 24768  }
  0x64   :  { %8417 = vsyncadd [#allocation9], 4294942528 }
  0x65   :  { %8418 = dma.done.wait [#allocation12], 320  }
  0x66   :  { %8419 = vsyncadd [#allocation12], 4294966976 }
  0x67   :  { %8420 = dma.done.wait [#allocation15], 192  }
  0x68   :  { %8421 = vsyncadd [#allocation15], 4294967104  ;;  %v7034_v0 = vld [vmem:[#allocation5 + $0x154] ss:$24 sps:$4 sm:$0xff]   ;;  %v7038_v2 = vld [vmem:[#allocation5 + $0x150] ss:$24 sps:$4 sm:$0xff]   ;;  %v335_v36 = vlaneseq }
  0x69   :  { %v7036_v1 = vld [vmem:[#allocation5 + $0x454] ss:$24 sps:$4 sm:$0xff]   ;;  %1347 = vmatprep.subr.bf16.mxu0 %v7034_v0  ;;  %v7039_v3 = vld [vmem:[#allocation5 + $0x450] ss:$24 sps:$4 sm:$0xff]   ;;  %v7040_v4 = vld [vmem:[#allocation5 + $0x124] ss:$24 sps:$4 sm:$0xff]  }
  0x6a   :  { %1388 = vmatprep.subr.bf16.mxu1 %v7036_v1  ;;  %1348 = vmatpush1.bf16.msra.mxu0 %v7038_v2  ;;  %v7042_v5 = vld [vmem:[#allocation5 + $0x424] ss:$24 sps:$4 sm:$0xff]   ;;  %v7044_v6 = vld [vmem:[#allocation5 + $0x120] ss:$24 sps:$4 sm:$0xff]   ;;  %v7046_v8 = vld [vmem:[#allocation5 + $0xf4] ss:$24 sps:$4 sm:$0xff]  }
  0x6b   :  { %1389 = vmatpush1.bf16.msra.mxu1 %v7039_v3  ;;  %1349 = vmatprep.subr.bf16.mxu0 %v7040_v4  ;;  %v7045_v7 = vld [vmem:[#allocation5 + $0x420] ss:$24 sps:$4 sm:$0xff]   ;;  %v7048_v9 = vld [vmem:[#allocation5 + $0x3f4] ss:$24 sps:$4 sm:$0xff]   ;;  %v7050_v10 = vld [vmem:[#allocation5 + $0xf0] ss:$24 sps:$4 sm:$0xff]  }
  0x6c   :  { %1390 = vmatprep.subr.bf16.mxu1 %v7042_v5  ;;  %v7051_v11 = vld [vmem:[#allocation5 + $0x3f0] ss:$24 sps:$4 sm:$0xff]   ;;  %v7052_v12 = vld [vmem:[#allocation5 + $0xc4] ss:$24 sps:$4 sm:$0xff]   ;;  %v7056_v14 = vld [vmem:[#allocation5 + $0xc0] ss:$24 sps:$4 sm:$0xff]  }
  0x6d   :  { %v7054_v13 = vld [vmem:[#allocation5 + $0x3c4] ss:$24 sps:$4 sm:$0xff]   ;;  %v7057_v15 = vld [vmem:[#allocation5 + $0x3c0] ss:$24 sps:$4 sm:$0xff]   ;;  %v7058_v16 = vld [vmem:[#allocation5 + $0x94] ss:$24 sps:$4 sm:$0xff]  }
  0x6e   :  { %1350 = vmatpush1.bf16.msra.mxu0 %v7044_v6  ;;  %v7060_v17 = vld [vmem:[#allocation5 + $0x394] ss:$24 sps:$4 sm:$0xff]   ;;  %v7062_v18 = vld [vmem:[#allocation5 + $0x90] ss:$24 sps:$4 sm:$0xff]   ;;  %v7064_v20 = vld [vmem:[#allocation5 + $0x64] ss:$24 sps:$4 sm:$0xff]  }
  0x6f   :  { %1391 = vmatpush1.bf16.msra.mxu1 %v7045_v7  ;;  %1351 = vmatprep.subr.bf16.mxu0 %v7046_v8  ;;  %v7063_v19 = vld [vmem:[#allocation5 + $0x390] ss:$24 sps:$4 sm:$0xff]   ;;  %v7066_v21 = vld [vmem:[#allocation5 + $0x364] ss:$24 sps:$4 sm:$0xff]   ;;  %v7068_v22 = vld [vmem:[#allocation5 + $0x60] ss:$24 sps:$4 sm:$0xff]  }
  0x70   :  { %1392 = vmatprep.subr.bf16.mxu1 %v7048_v9  ;;  %v7069_v23 = vld [vmem:[#allocation5 + $0x360] ss:$24 sps:$4 sm:$0xff]   ;;  %v7070_v24 = vld [vmem:[#allocation5 + $0x34] ss:$24 sps:$4 sm:$0xff]   ;;  %v7074_v26 = vld [vmem:[#allocation5 + $0x30] ss:$24 sps:$4 sm:$0xff]  }
  0x71   :  { %v7072_v25 = vld [vmem:[#allocation5 + $0x334] ss:$24 sps:$4 sm:$0xff]   ;;  %v7075_v27 = vld [vmem:[#allocation5 + $0x330] ss:$24 sps:$4 sm:$0xff]   ;;  %v7076_v28 = vld [vmem:[#allocation5 + $0x4] ss:$24 sps:$4 sm:$0xff]  }
  0x72   :  { %1352 = vmatpush1.bf16.msra.mxu0 %v7050_v10  ;;  %v7078_v29 = vld [vmem:[#allocation5 + $0x304] ss:$24 sps:$4 sm:$0xff]   ;;  %v7080_v30 = vld [vmem:[#allocation5] ss:$24 sps:$4 sm:$0xff]   ;;  %v7082_v32 = vld [vmem:[#allocation5 + $0x2d4] ss:$24 sps:$4 sm:$0xff]  }
  0x73   :  { %1393 = vmatpush1.bf16.msra.mxu1 %v7051_v11  ;;  %1353 = vmatprep.subr.bf16.mxu0 %v7052_v12  ;;  %v7081_v31 = vld [vmem:[#allocation5 + $0x300] ss:$24 sps:$4 sm:$0xff]   ;;  %v7084_v33 = vld [vmem:[#allocation5 + $0x5d4] ss:$24 sps:$4 sm:$0xff]   ;;  %v7086_v34 = vld [vmem:[#allocation5 + $0x2d0] ss:$24 sps:$4 sm:$0xff]  }
  0x74   :  { %1394 = vmatprep.subr.bf16.mxu1 %v7054_v13  ;;  %v7087_v35 = vld [vmem:[#allocation5 + $0x5d0] ss:$24 sps:$4 sm:$0xff]   ;;  %v8444_v37 = vmov 1983009808   ;;  %v7088_v39 = vld [vmem:[#allocation5 + $0x2a4] ss:$24 sps:$4 sm:$0xff]  }
  0x75   :  { %v368_v38 = vunpack.c.l.s4 %v8444_v37  ;;  %v7090_v40 = vld [vmem:[#allocation5 + $0x5a4] ss:$24 sps:$4 sm:$0xff]   ;;  %v7092_v41 = vld [vmem:[#allocation5 + $0x2a0] ss:$24 sps:$4 sm:$0xff]   ;;  %v8537_v42 = vshrl.u32 %v335_v36, 7  ;;  %vm6022_vm0 = vcmp.lt.s32.totalorder %v335_v36, 512 }
  0x76   :  { %1354 = vmatpush1.bf16.msra.mxu0 %v7056_v14  ;;  %v7093_v44 = vld [vmem:[#allocation5 + $0x5a0] ss:$24 sps:$4 sm:$0xff]   ;;  %v7094_v45 = vld [vmem:[#allocation5 + $0x274] ss:$24 sps:$4 sm:$0xff]   ;;  %v7098_v47 = vld [vmem:[#allocation5 + $0x270] ss:$24 sps:$4 sm:$0xff]  }
  0x77   :  { %1395 = vmatpush1.bf16.msra.mxu1 %v7057_v15  ;;  %1355 = vmatprep.subr.bf16.mxu0 %v7058_v16  ;;  %v369_v43 = vunpack.c.0.s8 %v368_v38  ;;  %v7096_v46 = vld [vmem:[#allocation5 + $0x574] ss:$24 sps:$4 sm:$0xff]   ;;  %v7099_v48 = vld [vmem:[#allocation5 + $0x570] ss:$24 sps:$4 sm:$0xff]   ;;  %v7100_v50 = vld [vmem:[#allocation5 + $0x244] ss:$24 sps:$4 sm:$0xff]  }
  0x78   :  { %1396 = vmatprep.subr.bf16.mxu1 %v7060_v17  ;;  %v7102_v51 = vld [vmem:[#allocation5 + $0x544] ss:$24 sps:$4 sm:$0xff]   ;;  %v7104_v52 = vld [vmem:[#allocation5 + $0x240] ss:$24 sps:$4 sm:$0xff]   ;;  %v140_v54 = vld [vmem:[#allocation2] sm:$0xff]  ;;  %s8445_s13 = smov [#allocation16]  }
  0x79   :  { %v8540_v49 = vsub.s32 %v369_v43, %v8537_v42  ;;  %v7105_v53 = vld [vmem:[#allocation5 + $0x540] ss:$24 sps:$4 sm:$0xff]   ;;  %v6017_v56 = vld [vmem:[#allocation14] sm:$0xf]  ;;  %v366_v59 = vcombine.high %v140_v54, %v140_v54  ;;  %v7112_v3 = vld [vmem:[#allocation5 + $0x1e4] ss:$24 sps:$4 sm:$0xff]  }
  0x7a   :  { %1356 = vmatpush1.bf16.msra.mxu0 %v7062_v18  ;;  %v6018_v57 = vld [vmem:[#allocation14 + $0x4] sm:$0xf]  ;;  %v6019_v58 = vld [vmem:[#allocation14 + $0x8] sm:$0xf]  ;;  %v7110_v0 = vld [vmem:[#allocation5 + $0x210] ss:$24 sps:$4 sm:$0xff]  }
  0x7b   :  { %1397 = vmatpush1.bf16.msra.mxu1 %v7063_v19  ;;  %1357 = vmatprep.subr.bf16.mxu0 %v7064_v20  ;;  %v8543_v55 = vrot.slane %v140_v54, %v8540_v49  ;;  %v7106_v60 = vld [vmem:[#allocation5 + $0x214] ss:$24 sps:$4 sm:$0xff]   ;;  %6024 = vst.msk [vmem:[#allocation19] ss:$8 sm:$0xf] %vm6022_vm0, %v6017_v56  ;;  %v8550_v63 = vrot.slane %v366_v59, %v8540_v49  ;;  %s6196_s14 = sshll.u32 %s8445_s13, 4  ;;  %s6197_s14 = int_to_ptr.vmem [resolvable:$true] %s6196_s14 }
  0x7c   :  { %1398 = vmatprep.subr.bf16.mxu1 %v7066_v21  ;;  %6027 = vst.msk [vmem:[#allocation19 + $0x40] ss:$8 sm:$0xf] %vm6022_vm0, %v6018_v57  ;;  %6030 = vst.msk [vmem:[#allocation19 + $0x80] ss:$8 sm:$0xf] %vm6022_vm0, %v6019_v58  ;;  %p8357_p13 = scmp.lt.s32.totalorder %s6197_s14, %s6197_s14 }
  0x7d   :  { %v7108_v61 = vld [vmem:[#allocation5 + $0x514] ss:$24 sps:$4 sm:$0xff]   ;;  %v8547_v62 = vcombine.high %v8543_v55, %v8543_v55  ;;  %v7111_v1 = vld [vmem:[#allocation5 + $0x510] ss:$24 sps:$4 sm:$0xff]   ;;  %v8555_v2 = vcombine.high %v8550_v63, %v8550_v63  ;;  %v7114_v4 = vld [vmem:[#allocation5 + $0x4e4] ss:$24 sps:$4 sm:$0xff]  }
  0x7e   :  { %1358 = vmatpush1.bf16.msra.mxu0 %v7068_v22  ;;  %v7116_v5 = vld [vmem:[#allocation5 + $0x1e0] ss:$24 sps:$4 sm:$0xff]   ;;  %v7118_v7 = vld [vmem:[#allocation5 + $0x1b4] ss:$24 sps:$4 sm:$0xff]   ;;  %v7122_v9 = vld [vmem:[#allocation5 + $0x1b0] ss:$24 sps:$4 sm:$0xff]  }
  0x7f   :  { %1399 = vmatpush1.bf16.msra.mxu1 %v7069_v23  ;;  %1359 = vmatprep.subr.bf16.mxu0 %v7070_v24  ;;  %v7117_v6 = vld [vmem:[#allocation5 + $0x4e0] ss:$24 sps:$4 sm:$0xff]   ;;  %v7120_v8 = vld [vmem:[#allocation5 + $0x4b4] ss:$24 sps:$4 sm:$0xff]   ;;  %v7123_v10 = vld [vmem:[#allocation5 + $0x4b0] ss:$24 sps:$4 sm:$0xff]  }
  0x80   :  { %1400 = vmatprep.subr.bf16.mxu1 %v7072_v25  ;;  %1379 = vmatprep.mubr.bf16.mxu0 %v8547_v62  ;;  %v7124_v11 = vld [vmem:[#allocation5 + $0x184] ss:$24 sps:$4 sm:$0xff]   ;;  %v7128_v13 = vld [vmem:[#allocation5 + $0x180] ss:$24 sps:$4 sm:$0xff]   ;;  %vm6106_vm1 = vcmask 1044480   ;;  %s8352_s22 = scalar_lea.vmem %s6197_s14, 1152 }
  0x81   :  { %1420 = vmatprep.mubr.bf16.mxu1 %v8555_v2  ;;  %v7126_v12 = vld [vmem:[#allocation5 + $0x484] ss:$24 sps:$4 sm:$0xff]   ;;  %v7129_v14 = vld [vmem:[#allocation5 + $0x480] ss:$24 sps:$4 sm:$0xff]   ;;  %p8353_p12 = scmp.ne.s32.totalorder %s6197_s14, %s8352_s22  ;;  %p8358_p0 = scmp.lt.s32.totalorder %s8352_s22, %s8352_s22 }
  0x82   :  { %1360 = vmatpush1.bf16.msra.mxu0 %v7074_v26  ;;  %v7132_v15 = vld [vmem:[#allocation5 + $0x15c] ss:$24 sps:$4 sm:$0xff]   ;;  %v7130_v17 = vld [vmem:[#allocation5 + $0x158] ss:$24 sps:$4 sm:$0xff]   ;;  %v7138_v19 = vld [vmem:[#allocation5 + $0x12c] ss:$24 sps:$4 sm:$0xff]  }
  0x83   :  { %1401 = vmatpush1.bf16.msra.mxu1 %v7075_v27  ;;  %1361 = vmatprep.subr.bf16.mxu0 %v7076_v28  ;;  %v7135_v16 = vld [vmem:[#allocation5 + $0x45c] ss:$24 sps:$4 sm:$0xff]   ;;  %v7133_v18 = vld [vmem:[#allocation5 + $0x458] ss:$24 sps:$4 sm:$0xff]   ;;  %v7141_v20 = vld [vmem:[#allocation5 + $0x42c] ss:$24 sps:$4 sm:$0xff]   ;;  %p8359_p1 = por %p8358_p0, %p8357_p13 }
  0x84   :  { %1402 = vmatprep.subr.bf16.mxu1 %v7078_v29  ;;  %v7136_v21 = vld [vmem:[#allocation5 + $0x128] ss:$24 sps:$4 sm:$0xff]   ;;  %v7144_v23 = vld [vmem:[#allocation5 + $0xfc] ss:$24 sps:$4 sm:$0xff]   ;;  %v7142_v25 = vld [vmem:[#allocation5 + $0xf8] ss:$24 sps:$4 sm:$0xff]  }
  0x85   :  { %v7139_v22 = vld [vmem:[#allocation5 + $0x428] ss:$24 sps:$4 sm:$0xff]   ;;  %v7147_v24 = vld [vmem:[#allocation5 + $0x3fc] ss:$24 sps:$4 sm:$0xff]   ;;  %v7145_v26 = vld [vmem:[#allocation5 + $0x3f8] ss:$24 sps:$4 sm:$0xff]   ;;  %p8360_p2 = pnand %p8359_p1, %p8353_p12 }
  0x86   :  { %1362 = vmatpush1.bf16.msra.mxu0 %v7080_v30  ;;  %v7150_v27 = vld [vmem:[#allocation5 + $0xcc] ss:$24 sps:$4 sm:$0xff]   ;;  %v7148_v29 = vld [vmem:[#allocation5 + $0xc8] ss:$24 sps:$4 sm:$0xff]   ;;  %v7169_v43 = vld [vmem:[#allocation5 + $0x338] ss:$24 sps:$4 sm:$0xff]  }
  0x87   :  { %1403 = vmatpush1.bf16.msra.mxu1 %v7081_v31  ;;  %1363 = vmatprep.subr.bf16.mxu0 %v7082_v32  ;;  %v7153_v28 = vld [vmem:[#allocation5 + $0x3cc] ss:$24 sps:$4 sm:$0xff]   ;;  %v7151_v30 = vld [vmem:[#allocation5 + $0x3c8] ss:$24 sps:$4 sm:$0xff]   ;;  %v7156_v31 = vld [vmem:[#allocation5 + $0x9c] ss:$24 sps:$4 sm:$0xff]  }
  0x88   :  { %1404 = vmatprep.subr.bf16.mxu1 %v7084_v33  ;;  %v7159_v32 = vld [vmem:[#allocation5 + $0x39c] ss:$24 sps:$4 sm:$0xff]   ;;  %v7154_v33 = vld [vmem:[#allocation5 + $0x98] ss:$24 sps:$4 sm:$0xff]   ;;  %v7165_v36 = vld [vmem:[#allocation5 + $0x36c] ss:$24 sps:$4 sm:$0xff]  }
  0x89   :  { %v7160_v37 = vld [vmem:[#allocation5 + $0x68] ss:$24 sps:$4 sm:$0xff]   ;;  %v7189_v54 = vld [vmem:[#allocation5 + $0x5ac] ss:$24 sps:$4 sm:$0xff]   ;;  %v7192_v58 = vld [vmem:[#allocation5 + $0x27c] ss:$24 sps:$4 sm:$0xff]  }
  0x8a   :  { %1364 = vmatpush2.bf16.msra.mxu0 %v7086_v34  ;;  %v7157_v34 = vld [vmem:[#allocation5 + $0x398] ss:$24 sps:$4 sm:$0xff]   ;;  %v7163_v38 = vld [vmem:[#allocation5 + $0x368] ss:$24 sps:$4 sm:$0xff]   ;;  %v7195_v59 = vld [vmem:[#allocation5 + $0x57c] ss:$24 sps:$4 sm:$0xff]  }
  0x8b   :  { %1405 = vmatpush2.bf16.msra.mxu1 %v7087_v35  ;;  %1365 = vmatprep.subr.bf16.mxu0 %v7088_v39  ;;  %v7162_v35 = vld [vmem:[#allocation5 + $0x6c] ss:$24 sps:$4 sm:$0xff]   ;;  %v7168_v39 = vld [vmem:[#allocation5 + $0x3c] ss:$24 sps:$4 sm:$0xff]   ;;  %v7184_v56 = vld [vmem:[#allocation5 + $0x2a8] ss:$24 sps:$4 sm:$0xff]  }
  0x8c   :  { %1406 = vmatprep.subr.bf16.mxu1 %v7090_v40  ;;  %v7171_v40 = vld [vmem:[#allocation5 + $0x33c] ss:$24 sps:$4 sm:$0xff]   ;;  %v7187_v57 = vld [vmem:[#allocation5 + $0x5a8] ss:$24 sps:$4 sm:$0xff]  }
  0x8e   :  { %1366 = vmatpush2.bf16.msra.mxu0 %v7092_v41  ;;  %v7166_v41 = vld [vmem:[#allocation5 + $0x38] ss:$24 sps:$4 sm:$0xff]  }
  0x8f   :  { %1407 = vmatpush2.bf16.msra.mxu1 %v7093_v44  ;;  %1367 = vmatprep.subr.bf16.mxu0 %v7094_v45  ;;  %v7174_v44 = vld [vmem:[#allocation5 + $0xc] ss:$24 sps:$4 sm:$0xff]  }
  0x90   :  { %1408 = vmatprep.subr.bf16.mxu1 %v7096_v46  ;;  %v7177_v45 = vld [vmem:[#allocation5 + $0x30c] ss:$24 sps:$4 sm:$0xff]   ;;  %v7172_v46 = vld [vmem:[#allocation5 + $0x8] ss:$24 sps:$4 sm:$0xff]  }
  0x92   :  { %1368 = vmatpush2.bf16.msra.mxu0 %v7098_v47  ;;  %v7175_v47 = vld [vmem:[#allocation5 + $0x308] ss:$24 sps:$4 sm:$0xff]  }
  0x93   :  { %1409 = vmatpush2.bf16.msra.mxu1 %v7099_v48  ;;  %1369 = vmatprep.subr.bf16.mxu0 %v7100_v50  ;;  %v7180_v48 = vld [vmem:[#allocation5 + $0x2dc] ss:$24 sps:$4 sm:$0xff]  }
  0x94   :  { %1410 = vmatprep.subr.bf16.mxu1 %v7102_v51  ;;  %v7183_v50 = vld [vmem:[#allocation5 + $0x5dc] ss:$24 sps:$4 sm:$0xff]   ;;  %v7178_v51 = vld [vmem:[#allocation5 + $0x2d8] ss:$24 sps:$4 sm:$0xff]  }
  0x96   :  { %1370 = vmatpush2.bf16.msra.mxu0 %v7104_v52  ;;  %v7181_v52 = vld [vmem:[#allocation5 + $0x5d8] ss:$24 sps:$4 sm:$0xff]  }
  0x97   :  { %1411 = vmatpush2.bf16.msra.mxu1 %v7105_v53  ;;  %1371 = vmatprep.subr.bf16.mxu0 %v7106_v60  ;;  %v7186_v53 = vld [vmem:[#allocation5 + $0x2ac] ss:$24 sps:$4 sm:$0xff]   ;;  %v7190_v60 = vld [vmem:[#allocation5 + $0x278] ss:$24 sps:$4 sm:$0xff]  }
  0x98   :  { %1412 = vmatprep.subr.bf16.mxu1 %v7108_v61  ;;  %v7193_v61 = vld [vmem:[#allocation5 + $0x578] ss:$24 sps:$4 sm:$0xff]  }
  0x9a   :  { %1372 = vmatpush2.bf16.msra.mxu0 %v7110_v0  ;;  %v7198_v0 = vld [vmem:[#allocation5 + $0x24c] ss:$24 sps:$4 sm:$0xff]  }
  0x9b   :  { %1413 = vmatpush2.bf16.msra.mxu1 %v7111_v1  ;;  %1373 = vmatprep.subr.bf16.mxu0 %v7112_v3  ;;  %v7201_v1 = vld [vmem:[#allocation5 + $0x54c] ss:$24 sps:$4 sm:$0xff]   ;;  %v7196_v3 = vld [vmem:[#allocation5 + $0x248] ss:$24 sps:$4 sm:$0xff]  }
  0x9c   :  { %1414 = vmatprep.subr.bf16.mxu1 %v7114_v4  ;;  %v7199_v4 = vld [vmem:[#allocation5 + $0x548] ss:$24 sps:$4 sm:$0xff]  }
  0x9e   :  { %1374 = vmatpush2.bf16.msra.mxu0 %v7116_v5  ;;  %v7204_v5 = vld [vmem:[#allocation5 + $0x21c] ss:$24 sps:$4 sm:$0xff]  }
  0x9f   :  { %1415 = vmatpush2.bf16.msra.mxu1 %v7117_v6  ;;  %1375 = vmatprep.subr.bf16.mxu0 %v7118_v7  ;;  %v7207_v6 = vld [vmem:[#allocation5 + $0x51c] ss:$24 sps:$4 sm:$0xff]   ;;  %v7202_v7 = vld [vmem:[#allocation5 + $0x218] ss:$24 sps:$4 sm:$0xff]  }
  0xa0   :  { %1416 = vmatprep.subr.bf16.mxu1 %v7120_v8  ;;  %v7205_v8 = vld [vmem:[#allocation5 + $0x518] ss:$24 sps:$4 sm:$0xff]  }
  0xa2   :  { %1376 = vmatpush2.bf16.msra.mxu0 %v7122_v9  ;;  %v7210_v9 = vld [vmem:[#allocation5 + $0x1ec] ss:$24 sps:$4 sm:$0xff]  }
  0xa3   :  { %1417 = vmatpush2.bf16.msra.mxu1 %v7123_v10  ;;  %1377 = vmatprep.subr.bf16.mxu0 %v7124_v11  ;;  %v7213_v10 = vld [vmem:[#allocation5 + $0x4ec] ss:$24 sps:$4 sm:$0xff]   ;;  %v7208_v11 = vld [vmem:[#allocation5 + $0x1e8] ss:$24 sps:$4 sm:$0xff]  }
  0xa4   :  { %1418 = vmatprep.subr.bf16.mxu1 %v7126_v12  ;;  %v7211_v12 = vld [vmem:[#allocation5 + $0x4e8] ss:$24 sps:$4 sm:$0xff]  }
  0xa6   :  { %1378 = vmatpush2.bf16.msra.mxu0 %v7128_v13  ;;  %v7216_v13 = vld [vmem:[#allocation5 + $0x1bc] ss:$24 sps:$4 sm:$0xff]  }
  0xa7   :  { %1419 = vmatpush2.bf16.msra.mxu1 %v7129_v14  ;;  %1429 = vmatprep.subr.bf16.mxu0 %v7132_v15  ;;  %v7219_v14 = vld [vmem:[#allocation5 + $0x4bc] ss:$24 sps:$4 sm:$0xff]   ;;  %v7214_v15 = vld [vmem:[#allocation5 + $0x1b8] ss:$24 sps:$4 sm:$0xff]  }
  0xa8   :  { %1470 = vmatprep.subr.bf16.mxu1 %v7135_v16  ;;  %v7217_v16 = vld [vmem:[#allocation5 + $0x4b8] ss:$24 sps:$4 sm:$0xff]  }
  0xa9   :  { %1380 = vmatmul.mubr.bf16.vlgmr.msra.gmra.mxu0 %v8543_v55 }
  0xaa   :  { %1421 = vmatmul.mubr.bf16.vlgmr.msra.gmra.mxu1 %v8550_v63  ;;  %1430 = vmatpush1.bf16.msra.mxu0 %v7130_v17  ;;  %v7222_v17 = vld [vmem:[#allocation5 + $0x18c] ss:$24 sps:$4 sm:$0xff]  }
  0xab   :  { %1471 = vmatpush1.bf16.msra.mxu1 %v7133_v18  ;;  %1431 = vmatprep.subr.bf16.mxu0 %v7138_v19  ;;  %v7225_v18 = vld [vmem:[#allocation5 + $0x48c] ss:$24 sps:$4 sm:$0xff]   ;;  %v7220_v19 = vld [vmem:[#allocation5 + $0x188] ss:$24 sps:$4 sm:$0xff]  }
  0xac   :  { %1472 = vmatprep.subr.bf16.mxu1 %v7141_v20  ;;  %1461 = vmatprep.mubr.bf16.mxu0 %v8547_v62  ;;  %v7223_v20 = vld [vmem:[#allocation5 + $0x488] ss:$24 sps:$4 sm:$0xff]  }
  0xad   :  { %1502 = vmatprep.mubr.bf16.mxu1 %v8555_v2 }
  0xae   :  { %1432 = vmatpush1.bf16.msra.mxu0 %v7136_v21  ;;  %v7228_v21 = vld [vmem:[#allocation5 + $0x164] ss:$24 sps:$4 sm:$0xff]  }
  0xaf   :  { %1473 = vmatpush1.bf16.msra.mxu1 %v7139_v22  ;;  %1433 = vmatprep.subr.bf16.mxu0 %v7144_v23  ;;  %v7231_v22 = vld [vmem:[#allocation5 + $0x464] ss:$24 sps:$4 sm:$0xff]   ;;  %v7226_v23 = vld [vmem:[#allocation5 + $0x160] ss:$24 sps:$4 sm:$0xff]  }
  0xb0   :  { %1474 = vmatprep.subr.bf16.mxu1 %v7147_v24  ;;  %v7229_v24 = vld [vmem:[#allocation5 + $0x460] ss:$24 sps:$4 sm:$0xff]  }
  0xb2   :  { %1434 = vmatpush1.bf16.msra.mxu0 %v7142_v25  ;;  %v7234_v25 = vld [vmem:[#allocation5 + $0x134] ss:$24 sps:$4 sm:$0xff]  }
  0xb3   :  { %1475 = vmatpush1.bf16.msra.mxu1 %v7145_v26  ;;  %1435 = vmatprep.subr.bf16.mxu0 %v7150_v27  ;;  %v7237_v26 = vld [vmem:[#allocation5 + $0x434] ss:$24 sps:$4 sm:$0xff]   ;;  %v7232_v27 = vld [vmem:[#allocation5 + $0x130] ss:$24 sps:$4 sm:$0xff]  }
  0xb4   :  { %1476 = vmatprep.subr.bf16.mxu1 %v7153_v28  ;;  %v7235_v28 = vld [vmem:[#allocation5 + $0x430] ss:$24 sps:$4 sm:$0xff]  }
  0xb6   :  { %1436 = vmatpush1.bf16.msra.mxu0 %v7148_v29  ;;  %v7240_v29 = vld [vmem:[#allocation5 + $0x104] ss:$24 sps:$4 sm:$0xff]  }
  0xb7   :  { %1477 = vmatpush1.bf16.msra.mxu1 %v7151_v30  ;;  %1437 = vmatprep.subr.bf16.mxu0 %v7156_v31  ;;  %v7243_v30 = vld [vmem:[#allocation5 + $0x404] ss:$24 sps:$4 sm:$0xff]   ;;  %v7238_v31 = vld [vmem:[#allocation5 + $0x100] ss:$24 sps:$4 sm:$0xff]  }
  0xb8   :  { %1478 = vmatprep.subr.bf16.mxu1 %v7159_v32  ;;  %v7241_v32 = vld [vmem:[#allocation5 + $0x400] ss:$24 sps:$4 sm:$0xff]  }
  0xba   :  { %1438 = vmatpush1.bf16.msra.mxu0 %v7154_v33  ;;  %v7246_v33 = vld [vmem:[#allocation5 + $0xd4] ss:$24 sps:$4 sm:$0xff]  }
  0xbb   :  { %1479 = vmatpush1.bf16.msra.mxu1 %v7157_v34  ;;  %1439 = vmatprep.subr.bf16.mxu0 %v7162_v35  ;;  %v7249_v34 = vld [vmem:[#allocation5 + $0x3d4] ss:$24 sps:$4 sm:$0xff]   ;;  %v7244_v35 = vld [vmem:[#allocation5 + $0xd0] ss:$24 sps:$4 sm:$0xff]  }
  0xbc   :  { %1480 = vmatprep.subr.bf16.mxu1 %v7165_v36  ;;  %v7247_v36 = vld [vmem:[#allocation5 + $0x3d0] ss:$24 sps:$4 sm:$0xff]  }
  0xbe   :  { %1440 = vmatpush1.bf16.msra.mxu0 %v7160_v37  ;;  %v7252_v37 = vld [vmem:[#allocation5 + $0xa4] ss:$24 sps:$4 sm:$0xff]  }
  0xbf   :  { %1481 = vmatpush1.bf16.msra.mxu1 %v7163_v38  ;;  %1441 = vmatprep.subr.bf16.mxu0 %v7168_v39  ;;  %v7255_v38 = vld [vmem:[#allocation5 + $0x3a4] ss:$24 sps:$4 sm:$0xff]   ;;  %v7250_v39 = vld [vmem:[#allocation5 + $0xa0] ss:$24 sps:$4 sm:$0xff]  }
  0xc0   :  { %1482 = vmatprep.subr.bf16.mxu1 %v7171_v40  ;;  %v7261_v40 = vld [vmem:[#allocation5 + $0x374] ss:$24 sps:$4 sm:$0xff]  }
  0xc2   :  { %1442 = vmatpush1.bf16.msra.mxu0 %v7166_v41  ;;  %v7256_v41 = vld [vmem:[#allocation5 + $0x70] ss:$24 sps:$4 sm:$0xff]  }
  0xc3   :  { %1483 = vmatpush1.bf16.msra.mxu1 %v7169_v43  ;;  %1443 = vmatprep.subr.bf16.mxu0 %v7174_v44  ;;  %v7259_v43 = vld [vmem:[#allocation5 + $0x370] ss:$24 sps:$4 sm:$0xff]   ;;  %v7264_v44 = vld [vmem:[#allocation5 + $0x44] ss:$24 sps:$4 sm:$0xff]  }
  0xc4   :  { %1484 = vmatprep.subr.bf16.mxu1 %v7177_v45  ;;  %v7267_v45 = vld [vmem:[#allocation5 + $0x344] ss:$24 sps:$4 sm:$0xff]  }
  0xc6   :  { %1444 = vmatpush1.bf16.msra.mxu0 %v7172_v46  ;;  %v7262_v46 = vld [vmem:[#allocation5 + $0x40] ss:$24 sps:$4 sm:$0xff]  }
  0xc7   :  { %1485 = vmatpush1.bf16.msra.mxu1 %v7175_v47  ;;  %1445 = vmatprep.subr.bf16.mxu0 %v7180_v48  ;;  %v7265_v47 = vld [vmem:[#allocation5 + $0x340] ss:$24 sps:$4 sm:$0xff]   ;;  %v7270_v48 = vld [vmem:[#allocation5 + $0x14] ss:$24 sps:$4 sm:$0xff]  }
  0xc8   :  { %1486 = vmatprep.subr.bf16.mxu1 %v7183_v50  ;;  %v7273_v50 = vld [vmem:[#allocation5 + $0x314] ss:$24 sps:$4 sm:$0xff]  }
  0xca   :  { %1446 = vmatpush2.bf16.msra.mxu0 %v7178_v51  ;;  %v7268_v51 = vld [vmem:[#allocation5 + $0x10] ss:$24 sps:$4 sm:$0xff]  }
  0xcb   :  { %1487 = vmatpush2.bf16.msra.mxu1 %v7181_v52  ;;  %1447 = vmatprep.subr.bf16.mxu0 %v7186_v53  ;;  %v7271_v52 = vld [vmem:[#allocation5 + $0x310] ss:$24 sps:$4 sm:$0xff]   ;;  %v7276_v53 = vld [vmem:[#allocation5 + $0x2e4] ss:$24 sps:$4 sm:$0xff]  }
  0xcc   :  { %1488 = vmatprep.subr.bf16.mxu1 %v7189_v54  ;;  %v7279_v54 = vld [vmem:[#allocation5 + $0x5e4] ss:$24 sps:$4 sm:$0xff]  }
  0xce   :  { %1448 = vmatpush2.bf16.msra.mxu0 %v7184_v56  ;;  %v7274_v56 = vld [vmem:[#allocation5 + $0x2e0] ss:$24 sps:$4 sm:$0xff]  }
  0xcf   :  { %1489 = vmatpush2.bf16.msra.mxu1 %v7187_v57  ;;  %1449 = vmatprep.subr.bf16.mxu0 %v7192_v58  ;;  %v7277_v57 = vld [vmem:[#allocation5 + $0x5e0] ss:$24 sps:$4 sm:$0xff]   ;;  %v7282_v58 = vld [vmem:[#allocation5 + $0x2b4] ss:$24 sps:$4 sm:$0xff]  }
  0xd0   :  { %1490 = vmatprep.subr.bf16.mxu1 %v7195_v59  ;;  %v7285_v59 = vld [vmem:[#allocation5 + $0x5b4] ss:$24 sps:$4 sm:$0xff]  }
  0xd2   :  { %1450 = vmatpush2.bf16.msra.mxu0 %v7190_v60  ;;  %v7280_v60 = vld [vmem:[#allocation5 + $0x2b0] ss:$24 sps:$4 sm:$0xff]  }
  0xd3   :  { %1491 = vmatpush2.bf16.msra.mxu1 %v7193_v61  ;;  %1451 = vmatprep.subr.bf16.mxu0 %v7198_v0  ;;  %v7283_v61 = vld [vmem:[#allocation5 + $0x5b0] ss:$24 sps:$4 sm:$0xff]   ;;  %v7288_v0 = vld [vmem:[#allocation5 + $0x284] ss:$24 sps:$4 sm:$0xff]  }
  0xd4   :  { %1492 = vmatprep.subr.bf16.mxu1 %v7201_v1  ;;  %v7291_v1 = vld [vmem:[#allocation5 + $0x584] ss:$24 sps:$4 sm:$0xff]  }
  0xd6   :  { %1452 = vmatpush2.bf16.msra.mxu0 %v7196_v3  ;;  %v7286_v3 = vld [vmem:[#allocation5 + $0x280] ss:$24 sps:$4 sm:$0xff]  }
  0xd7   :  { %1493 = vmatpush2.bf16.msra.mxu1 %v7199_v4  ;;  %1453 = vmatprep.subr.bf16.mxu0 %v7204_v5  ;;  %v7289_v4 = vld [vmem:[#allocation5 + $0x580] ss:$24 sps:$4 sm:$0xff]   ;;  %v7294_v5 = vld [vmem:[#allocation5 + $0x254] ss:$24 sps:$4 sm:$0xff]  }
  0xd8   :  { %1494 = vmatprep.subr.bf16.mxu1 %v7207_v6  ;;  %v7297_v6 = vld [vmem:[#allocation5 + $0x554] ss:$24 sps:$4 sm:$0xff]  }
  0xda   :  { %1454 = vmatpush2.bf16.msra.mxu0 %v7202_v7  ;;  %v7292_v7 = vld [vmem:[#allocation5 + $0x250] ss:$24 sps:$4 sm:$0xff]  }
  0xdb   :  { %1495 = vmatpush2.bf16.msra.mxu1 %v7205_v8  ;;  %1455 = vmatprep.subr.bf16.mxu0 %v7210_v9  ;;  %v7295_v8 = vld [vmem:[#allocation5 + $0x550] ss:$24 sps:$4 sm:$0xff]   ;;  %v7300_v9 = vld [vmem:[#allocation5 + $0x224] ss:$24 sps:$4 sm:$0xff]  }
  0xdc   :  { %1496 = vmatprep.subr.bf16.mxu1 %v7213_v10  ;;  %v7303_v10 = vld [vmem:[#allocation5 + $0x524] ss:$24 sps:$4 sm:$0xff]  }
  0xde   :  { %1456 = vmatpush2.bf16.msra.mxu0 %v7208_v11  ;;  %v7298_v11 = vld [vmem:[#allocation5 + $0x220] ss:$24 sps:$4 sm:$0xff]  }
  0xdf   :  { %1497 = vmatpush2.bf16.msra.mxu1 %v7211_v12  ;;  %1457 = vmatprep.subr.bf16.mxu0 %v7216_v13  ;;  %v7301_v12 = vld [vmem:[#allocation5 + $0x520] ss:$24 sps:$4 sm:$0xff]   ;;  %v7306_v13 = vld [vmem:[#allocation5 + $0x1f4] ss:$24 sps:$4 sm:$0xff]  }
  0xe0   :  { %1498 = vmatprep.subr.bf16.mxu1 %v7219_v14  ;;  %v7309_v14 = vld [vmem:[#allocation5 + $0x4f4] ss:$24 sps:$4 sm:$0xff]  }
  0xe2   :  { %1458 = vmatpush2.bf16.msra.mxu0 %v7214_v15  ;;  %v7304_v15 = vld [vmem:[#allocation5 + $0x1f0] ss:$24 sps:$4 sm:$0xff]  }
  0xe3   :  { %1499 = vmatpush2.bf16.msra.mxu1 %v7217_v16  ;;  %1459 = vmatprep.subr.bf16.mxu0 %v7222_v17  ;;  %v7307_v16 = vld [vmem:[#allocation5 + $0x4f0] ss:$24 sps:$4 sm:$0xff]   ;;  %v7312_v17 = vld [vmem:[#allocation5 + $0x1c4] ss:$24 sps:$4 sm:$0xff]  }
  0xe4   :  { %1500 = vmatprep.subr.bf16.mxu1 %v7225_v18  ;;  %v7315_v18 = vld [vmem:[#allocation5 + $0x4c4] ss:$24 sps:$4 sm:$0xff]  }
  0xe6   :  { %1460 = vmatpush2.bf16.msra.mxu0 %v7220_v19  ;;  %v1609_v19 = vld [vmem:[#allocation2 + $0x8] sm:$0xff] }
  0xe7   :  { %1501 = vmatpush2.bf16.msra.mxu1 %v7223_v20  ;;  %1511 = vmatprep.subr.bf16.mxu0 %v7228_v21  ;;  %v7310_v20 = vld [vmem:[#allocation5 + $0x1c0] ss:$24 sps:$4 sm:$0xff]  }
  0xe8   :  { %1552 = vmatprep.subr.bf16.mxu1 %v7231_v22  ;;  %v7313_v21 = vld [vmem:[#allocation5 + $0x4c0] ss:$24 sps:$4 sm:$0xff]   ;;  %v7318_v22 = vld [vmem:[#allocation5 + $0x194] ss:$24 sps:$4 sm:$0xff]  }
  0xe9   :  { %1462 = vmatmul.mubr.bf16.vlgmr.msra.gmra.mxu0 %v8543_v55 }
  0xea   :  { %1503 = vmatmul.mubr.bf16.vlgmr.msra.gmra.mxu1 %v8550_v63  ;;  %1512 = vmatpush1.bf16.msra.mxu0 %v7226_v23  ;;  %v7321_v23 = vld [vmem:[#allocation5 + $0x494] ss:$24 sps:$4 sm:$0xff]  }
  0xeb   :  { %1553 = vmatpush1.bf16.msra.mxu1 %v7229_v24  ;;  %1513 = vmatprep.subr.bf16.mxu0 %v7234_v25  ;;  %v1837_v24 = vcombine.high %v1609_v19, %v1609_v19  ;;  %v7316_v25 = vld [vmem:[#allocation5 + $0x190] ss:$24 sps:$4 sm:$0xff]  }
  0xec   :  { %1554 = vmatprep.subr.bf16.mxu1 %v7237_v26  ;;  %1543 = vmatprep.mubr.bf16.mxu0 %v8547_v62  ;;  %v7253_v62 = vld [vmem:[#allocation5 + $0x3a0] ss:$24 sps:$4 sm:$0xff]   ;;  %v7319_v26 = vld [vmem:[#allocation5 + $0x490] ss:$24 sps:$4 sm:$0xff]  }
  0xed   :  { %1584 = vmatprep.mubr.bf16.mxu1 %v8555_v2  ;;  %v7258_v2 = vld [vmem:[#allocation5 + $0x74] ss:$24 sps:$4 sm:$0xff]  }
  0xee   :  { %1514 = vmatpush1.bf16.msra.mxu0 %v7232_v27  ;;  %v7324_v27 = vld [vmem:[#allocation5 + $0x754] ss:$24 sps:$4 sm:$0xff]  }
  0xef   :  { %1555 = vmatpush1.bf16.msra.mxu1 %v7235_v28  ;;  %1515 = vmatprep.subr.bf16.mxu0 %v7240_v29  ;;  %v7327_v28 = vld [vmem:[#allocation5 + $0xa54] ss:$24 sps:$4 sm:$0xff]   ;;  %v8567_v29 = vrot.slane %v1609_v19, %v8540_v49  ;;  %v7394_v19 = vld [vmem:[#allocation5 + $0x810] ss:$24 sps:$4 sm:$0xff]  }
  0xf0   :  { %1556 = vmatprep.subr.bf16.mxu1 %v7243_v30  ;;  %v8570_v30 = vrot.slane %v1837_v24, %v8540_v49  ;;  %v7403_v24 = vld [vmem:[#allocation5 + $0xae0] ss:$24 sps:$4 sm:$0xff]  }
  0xf2   :  { %1516 = vmatpush1.bf16.msra.mxu0 %v7238_v31  ;;  %v7322_v31 = vld [vmem:[#allocation5 + $0x750] ss:$24 sps:$4 sm:$0xff]  }
  0xf3   :  { %1557 = vmatpush1.bf16.msra.mxu1 %v7241_v32  ;;  %1517 = vmatprep.subr.bf16.mxu0 %v7246_v33  ;;  %v7325_v32 = vld [vmem:[#allocation5 + $0xa50] ss:$24 sps:$4 sm:$0xff]   ;;  %v7330_v33 = vld [vmem:[#allocation5 + $0x724] ss:$24 sps:$4 sm:$0xff]  }
  0xf4   :  { %1558 = vmatprep.subr.bf16.mxu1 %v7249_v34  ;;  %v7333_v34 = vld [vmem:[#allocation5 + $0xa24] ss:$24 sps:$4 sm:$0xff]  }
  0xf6   :  { %1518 = vmatpush1.bf16.msra.mxu0 %v7244_v35  ;;  %v8574_v35 = vcombine.high %v8567_v29, %v8567_v29 }
  0xf7   :  { %1559 = vmatpush1.bf16.msra.mxu1 %v7247_v36  ;;  %1519 = vmatprep.subr.bf16.mxu0 %v7252_v37  ;;  %v8578_v36 = vcombine.high %v8570_v30, %v8570_v30  ;;  %v7328_v37 = vld [vmem:[#allocation5 + $0x720] ss:$24 sps:$4 sm:$0xff]  }
  0xf8   :  { %1560 = vmatprep.subr.bf16.mxu1 %v7255_v38  ;;  %v7331_v38 = vld [vmem:[#allocation5 + $0xa20] ss:$24 sps:$4 sm:$0xff]  }
  0xfa   :  { %1520 = vmatpush1.bf16.msra.mxu0 %v7250_v39  ;;  %v7336_v39 = vld [vmem:[#allocation5 + $0x6f4] ss:$24 sps:$4 sm:$0xff]  }
  0xfb   :  { %1561 = vmatpush1.bf16.msra.mxu1 %v7253_v62  ;;  %1521 = vmatprep.subr.bf16.mxu0 %v7258_v2  ;;  %v7339_v62 = vld [vmem:[#allocation5 + $0x9f4] ss:$24 sps:$4 sm:$0xff]   ;;  %v7334_v2 = vld [vmem:[#allocation5 + $0x6f0] ss:$24 sps:$4 sm:$0xff]  }
  0xfc   :  { %1562 = vmatprep.subr.bf16.mxu1 %v7261_v40  ;;  %v7337_v40 = vld [vmem:[#allocation5 + $0x9f0] ss:$24 sps:$4 sm:$0xff]  }
  0xfe   :  { %1522 = vmatpush1.bf16.msra.mxu0 %v7256_v41  ;;  %v7340_v41 = vld [vmem:[#allocation5 + $0x6c0] ss:$24 sps:$4 sm:$0xff]  }
  0xff   :  { %1563 = vmatpush1.bf16.msra.mxu1 %v7259_v43  ;;  %1523 = vmatprep.subr.bf16.mxu0 %v7264_v44  ;;  %v7343_v43 = vld [vmem:[#allocation5 + $0x9c0] ss:$24 sps:$4 sm:$0xff]   ;;  %v7348_v44 = vld [vmem:[#allocation5 + $0x694] ss:$24 sps:$4 sm:$0xff]  }
 0x100   :  { %1564 = vmatprep.subr.bf16.mxu1 %v7267_v45  ;;  %v7351_v45 = vld [vmem:[#allocation5 + $0x994] ss:$24 sps:$4 sm:$0xff]  }
 0x102   :  { %1524 = vmatpush1.bf16.msra.mxu0 %v7262_v46  ;;  %v7346_v46 = vld [vmem:[#allocation5 + $0x690] ss:$24 sps:$4 sm:$0xff]  }
 0x103   :  { %1565 = vmatpush1.bf16.msra.mxu1 %v7265_v47  ;;  %1525 = vmatprep.subr.bf16.mxu0 %v7270_v48  ;;  %v7349_v47 = vld [vmem:[#allocation5 + $0x990] ss:$24 sps:$4 sm:$0xff]   ;;  %v7354_v48 = vld [vmem:[#allocation5 + $0x664] ss:$24 sps:$4 sm:$0xff]  }
 0x104   :  { %1566 = vmatprep.subr.bf16.mxu1 %v7273_v50  ;;  %v7357_v50 = vld [vmem:[#allocation5 + $0x964] ss:$24 sps:$4 sm:$0xff]  }
 0x106   :  { %1526 = vmatpush1.bf16.msra.mxu0 %v7268_v51  ;;  %v7352_v51 = vld [vmem:[#allocation5 + $0x660] ss:$24 sps:$4 sm:$0xff]  }
 0x107   :  { %1567 = vmatpush1.bf16.msra.mxu1 %v7271_v52  ;;  %1527 = vmatprep.subr.bf16.mxu0 %v7276_v53  ;;  %v7355_v52 = vld [vmem:[#allocation5 + $0x960] ss:$24 sps:$4 sm:$0xff]   ;;  %v7360_v53 = vld [vmem:[#allocation5 + $0x634] ss:$24 sps:$4 sm:$0xff]  }
 0x108   :  { %1568 = vmatprep.subr.bf16.mxu1 %v7279_v54  ;;  %v7363_v54 = vld [vmem:[#allocation5 + $0x934] ss:$24 sps:$4 sm:$0xff]  }
 0x10a   :  { %1528 = vmatpush2.bf16.msra.mxu0 %v7274_v56  ;;  %v7358_v56 = vld [vmem:[#allocation5 + $0x630] ss:$24 sps:$4 sm:$0xff]  }
 0x10b   :  { %1569 = vmatpush2.bf16.msra.mxu1 %v7277_v57  ;;  %1529 = vmatprep.subr.bf16.mxu0 %v7282_v58  ;;  %v7361_v57 = vld [vmem:[#allocation5 + $0x930] ss:$24 sps:$4 sm:$0xff]   ;;  %v7366_v58 = vld [vmem:[#allocation5 + $0x604] ss:$24 sps:$4 sm:$0xff]  }
 0x10c   :  { %1570 = vmatprep.subr.bf16.mxu1 %v7285_v59  ;;  %v7369_v59 = vld [vmem:[#allocation5 + $0x904] ss:$24 sps:$4 sm:$0xff]  }
 0x10e   :  { %1530 = vmatpush2.bf16.msra.mxu0 %v7280_v60  ;;  %v7364_v60 = vld [vmem:[#allocation5 + $0x600] ss:$24 sps:$4 sm:$0xff]  }
 0x10f   :  { %1571 = vmatpush2.bf16.msra.mxu1 %v7283_v61  ;;  %1531 = vmatprep.subr.bf16.mxu0 %v7288_v0  ;;  %v7367_v61 = vld [vmem:[#allocation5 + $0x900] ss:$24 sps:$4 sm:$0xff]   ;;  %v7372_v0 = vld [vmem:[#allocation5 + $0x8d4] ss:$24 sps:$4 sm:$0xff]  }
 0x110   :  { %1572 = vmatprep.subr.bf16.mxu1 %v7291_v1  ;;  %v7375_v1 = vld [vmem:[#allocation5 + $0xbd4] ss:$24 sps:$4 sm:$0xff]  }
 0x112   :  { %1532 = vmatpush2.bf16.msra.mxu0 %v7286_v3  ;;  %v7370_v3 = vld [vmem:[#allocation5 + $0x8d0] ss:$24 sps:$4 sm:$0xff]  }
 0x113   :  { %1573 = vmatpush2.bf16.msra.mxu1 %v7289_v4  ;;  %1533 = vmatprep.subr.bf16.mxu0 %v7294_v5  ;;  %v7373_v4 = vld [vmem:[#allocation5 + $0xbd0] ss:$24 sps:$4 sm:$0xff]   ;;  %v7378_v5 = vld [vmem:[#allocation5 + $0x8a4] ss:$24 sps:$4 sm:$0xff]  }
 0x114   :  { %1574 = vmatprep.subr.bf16.mxu1 %v7297_v6  ;;  %v7381_v6 = vld [vmem:[#allocation5 + $0xba4] ss:$24 sps:$4 sm:$0xff]  }
 0x116   :  { %1534 = vmatpush2.bf16.msra.mxu0 %v7292_v7  ;;  %v7376_v7 = vld [vmem:[#allocation5 + $0x8a0] ss:$24 sps:$4 sm:$0xff]  }
 0x117   :  { %1575 = vmatpush2.bf16.msra.mxu1 %v7295_v8  ;;  %1535 = vmatprep.subr.bf16.mxu0 %v7300_v9  ;;  %v7379_v8 = vld [vmem:[#allocation5 + $0xba0] ss:$24 sps:$4 sm:$0xff]   ;;  %v7384_v9 = vld [vmem:[#allocation5 + $0x874] ss:$24 sps:$4 sm:$0xff]  }
 0x118   :  { %1576 = vmatprep.subr.bf16.mxu1 %v7303_v10  ;;  %v7387_v10 = vld [vmem:[#allocation5 + $0xb74] ss:$24 sps:$4 sm:$0xff]  }
 0x11a   :  { %1536 = vmatpush2.bf16.msra.mxu0 %v7298_v11  ;;  %v7382_v11 = vld [vmem:[#allocation5 + $0x870] ss:$24 sps:$4 sm:$0xff]  }
 0x11b   :  { %1577 = vmatpush2.bf16.msra.mxu1 %v7301_v12  ;;  %1537 = vmatprep.subr.bf16.mxu0 %v7306_v13  ;;  %v7385_v12 = vld [vmem:[#allocation5 + $0xb70] ss:$24 sps:$4 sm:$0xff]   ;;  %v7390_v13 = vld [vmem:[#allocation5 + $0x844] ss:$24 sps:$4 sm:$0xff]  }
 0x11c   :  { %1578 = vmatprep.subr.bf16.mxu1 %v7309_v14  ;;  %v7393_v14 = vld [vmem:[#allocation5 + $0xb44] ss:$24 sps:$4 sm:$0xff]  }
 0x11e   :  { %1538 = vmatpush2.bf16.msra.mxu0 %v7304_v15  ;;  %v7388_v15 = vld [vmem:[#allocation5 + $0x840] ss:$24 sps:$4 sm:$0xff]  }
 0x11f   :  { %1579 = vmatpush2.bf16.msra.mxu1 %v7307_v16  ;;  %1539 = vmatprep.subr.bf16.mxu0 %v7312_v17  ;;  %v7391_v16 = vld [vmem:[#allocation5 + $0xb40] ss:$24 sps:$4 sm:$0xff]   ;;  %v7396_v17 = vld [vmem:[#allocation5 + $0x814] ss:$24 sps:$4 sm:$0xff]  }
 0x120   :  { %1580 = vmatprep.subr.bf16.mxu1 %v7315_v18  ;;  %v7399_v18 = vld [vmem:[#allocation5 + $0xb14] ss:$24 sps:$4 sm:$0xff]  }
 0x122   :  { %1540 = vmatpush2.bf16.msra.mxu0 %v7310_v20  ;;  %v7397_v20 = vld [vmem:[#allocation5 + $0xb10] ss:$24 sps:$4 sm:$0xff]  }
 0x123   :  { %1581 = vmatpush2.bf16.msra.mxu1 %v7313_v21  ;;  %1541 = vmatprep.subr.bf16.mxu0 %v7318_v22  ;;  %v7402_v21 = vld [vmem:[#allocation5 + $0x7e4] ss:$24 sps:$4 sm:$0xff]  }
 0x124   :  { %1582 = vmatprep.subr.bf16.mxu1 %v7321_v23  ;;  %v7405_v22 = vld [vmem:[#allocation5 + $0xae4] ss:$24 sps:$4 sm:$0xff]   ;;  %v7400_v23 = vld [vmem:[#allocation5 + $0x7e0] ss:$24 sps:$4 sm:$0xff]  }
 0x126   :  { %1542 = vmatpush2.bf16.msra.mxu0 %v7316_v25  ;;  %v7408_v25 = vld [vmem:[#allocation5 + $0x7b4] ss:$24 sps:$4 sm:$0xff]  }
 0x127   :  { %1583 = vmatpush2.bf16.msra.mxu1 %v7319_v26  ;;  %2818 = vmatprep.subr.bf16.mxu0 %v7324_v27  ;;  %v7411_v26 = vld [vmem:[#allocation5 + $0xab4] ss:$24 sps:$4 sm:$0xff]   ;;  %v7406_v27 = vld [vmem:[#allocation5 + $0x7b0] ss:$24 sps:$4 sm:$0xff]  }
 0x128   :  { %2859 = vmatprep.subr.bf16.mxu1 %v7327_v28  ;;  %v7409_v28 = vld [vmem:[#allocation5 + $0xab0] ss:$24 sps:$4 sm:$0xff]  }
 0x129   :  { %1544 = vmatmul.mubr.bf16.vlgmr.msra.gmra.mxu0 %v8543_v55  ;;  %v7342_v55 = vld [vmem:[#allocation5 + $0x6c4] ss:$24 sps:$4 sm:$0xff]  }
 0x12a   :  { %1585 = vmatmul.mubr.bf16.vlgmr.msra.gmra.mxu1 %v8550_v63  ;;  %2819 = vmatpush1.bf16.msra.mxu0 %v7322_v31  ;;  %v7345_v63 = vld [vmem:[#allocation5 + $0x9c4] ss:$24 sps:$4 sm:$0xff]  }
 0x12b   :  { %2860 = vmatpush1.bf16.msra.mxu1 %v7325_v32  ;;  %2820 = vmatprep.subr.bf16.mxu0 %v7330_v33  ;;  %v7414_v31 = vld [vmem:[#allocation5 + $0x784] ss:$24 sps:$4 sm:$0xff]   ;;  %v7412_v33 = vld [vmem:[#allocation5 + $0x780] ss:$24 sps:$4 sm:$0xff]  }
 0x12c   :  { %2861 = vmatprep.subr.bf16.mxu1 %v7333_v34  ;;  %2850 = vmatprep.mubr.bf16.mxu0 %v8574_v35  ;;  %v7417_v32 = vld [vmem:[#allocation5 + $0xa84] ss:$24 sps:$4 sm:$0xff]   ;;  %v7415_v34 = vld [vmem:[#allocation5 + $0xa80] ss:$24 sps:$4 sm:$0xff]  }
 0x12d   :  { %2891 = vmatprep.mubr.bf16.mxu1 %v8578_v36 }
 0x12e   :  { %2821 = vmatpush1.bf16.msra.mxu0 %v7328_v37  ;;  %v8584_v37 = vld [vmem:[#allocation7] sm:$0x3f] }
 0x12f   :  { %2862 = vmatpush1.bf16.msra.mxu1 %v7331_v38  ;;  %2822 = vmatprep.subr.bf16.mxu0 %v7336_v39  ;;  %v8587_v38 = vsub.s32 0, %v8537_v42  ;;  %v7421_v39 = vld [vmem:[#allocation5 + $0x75c] ss:$24 sps:$4 sm:$0xff]  }
 0x130   :  { %2863 = vmatprep.subr.bf16.mxu1 %v7339_v62  ;;  %v7424_v62 = vld [vmem:[#allocation5 + $0xa5c] ss:$24 sps:$4 sm:$0xff]  }
 0x132   :  { %2823 = vmatpush1.bf16.msra.mxu0 %v7334_v2  ;;  %v8590_v2 = vsub.s32 1, %v8537_v42 }
 0x133   :  { %2864 = vmatpush1.bf16.msra.mxu1 %v7337_v40  ;;  %2824 = vmatprep.subr.bf16.mxu0 %v7342_v55  ;;  %v338_v40 = vrot.slane %v8584_v37, %v8587_v38  ;;  %v7419_v55 = vld [vmem:[#allocation5 + $0x758] ss:$24 sps:$4 sm:$0xff]  }
 0x134   :  { %2865 = vmatprep.subr.bf16.mxu1 %v7345_v63  ;;  %v7422_v63 = vld [vmem:[#allocation5 + $0xa58] ss:$24 sps:$4 sm:$0xff]  }
 0x136   :  { %2825 = vmatpush1.bf16.msra.mxu0 %v7340_v41  ;;  %v7427_v41 = vld [vmem:[#allocation5 + $0x72c] ss:$24 sps:$4 sm:$0xff]  }
 0x137   :  { %2866 = vmatpush1.bf16.msra.mxu1 %v7343_v43  ;;  %2826 = vmatprep.subr.bf16.mxu0 %v7348_v44  ;;  %v7430_v43 = vld [vmem:[#allocation5 + $0xa2c] ss:$24 sps:$4 sm:$0xff]   ;;  %v342_v44 = vrot.slane %v8584_v37, %v8590_v2 }
 0x138   :  { %2867 = vmatprep.subr.bf16.mxu1 %v7351_v45 }
 0x13a   :  { %2827 = vmatpush1.bf16.msra.mxu0 %v7346_v46 }
 0x13b   :  { %2868 = vmatpush1.bf16.msra.mxu1 %v7349_v47  ;;  %2828 = vmatprep.subr.bf16.mxu0 %v7354_v48  ;;  %v7425_v47 = vld [vmem:[#allocation5 + $0x728] ss:$24 sps:$4 sm:$0xff]  }
 0x13c   :  { %2869 = vmatprep.subr.bf16.mxu1 %v7357_v50  ;;  %v7428_v50 = vld [vmem:[#allocation5 + $0xa28] ss:$24 sps:$4 sm:$0xff]  }
 0x13e   :  { %2829 = vmatpush1.bf16.msra.mxu0 %v7352_v51  ;;  %v7433_v51 = vld [vmem:[#allocation5 + $0x6fc] ss:$24 sps:$4 sm:$0xff]  }
 0x13f   :  { %2870 = vmatpush1.bf16.msra.mxu1 %v7355_v52  ;;  %2830 = vmatprep.subr.bf16.mxu0 %v7360_v53 }
 0x140   :  { %2871 = vmatprep.subr.bf16.mxu1 %v7363_v54  ;;  %v7436_v54 = vld [vmem:[#allocation5 + $0x9fc] ss:$24 sps:$4 sm:$0xff]  }
 0x142   :  { %2831 = vmatpush1.bf16.msra.mxu0 %v7358_v56 }
 0x143   :  { %2872 = vmatpush1.bf16.msra.mxu1 %v7361_v57  ;;  %2832 = vmatprep.subr.bf16.mxu0 %v7366_v58  ;;  %v7431_v58 = vld [vmem:[#allocation5 + $0x6f8] ss:$24 sps:$4 sm:$0xff]  }
 0x144   :  { %2873 = vmatprep.subr.bf16.mxu1 %v7369_v59 }
 0x146   :  { %2833 = vmatpush1.bf16.msra.mxu0 %v7364_v60 }
 0x147   :  { %2874 = vmatpush1.bf16.msra.mxu1 %v7367_v61  ;;  %2834 = vmatprep.subr.bf16.mxu0 %v7372_v0  ;;  %v7434_v61 = vld [vmem:[#allocation5 + $0x9f8] ss:$24 sps:$4 sm:$0xff]  }
 0x148   :  { %2875 = vmatprep.subr.bf16.mxu1 %v7375_v1 }
 0x14a   :  { %2835 = vmatpush2.bf16.msra.mxu0 %v7370_v3 }
 0x14b   :  { %2876 = vmatpush2.bf16.msra.mxu1 %v7373_v4  ;;  %2836 = vmatprep.subr.bf16.mxu0 %v7378_v5  ;;  %v7439_v4 = vld [vmem:[#allocation5 + $0x6cc] ss:$24 sps:$4 sm:$0xff]  }
 0x14c   :  { %2877 = vmatprep.subr.bf16.mxu1 %v7381_v6  ;;  %v7442_v5 = vld [vmem:[#allocation5 + $0x9cc] ss:$24 sps:$4 sm:$0xff]  }
 0x14e   :  { %2837 = vmatpush2.bf16.msra.mxu0 %v7376_v7  ;;  %v7437_v7 = vld [vmem:[#allocation5 + $0x6c8] ss:$24 sps:$4 sm:$0xff]  }
 0x14f   :  { %2878 = vmatpush2.bf16.msra.mxu1 %v7379_v8  ;;  %2838 = vmatprep.subr.bf16.mxu0 %v7384_v9  ;;  %v7440_v8 = vld [vmem:[#allocation5 + $0x9c8] ss:$24 sps:$4 sm:$0xff]   ;;  %v7445_v9 = vld [vmem:[#allocation5 + $0x69c] ss:$24 sps:$4 sm:$0xff]  }
 0x150   :  { %2879 = vmatprep.subr.bf16.mxu1 %v7387_v10  ;;  %v7448_v10 = vld [vmem:[#allocation5 + $0x99c] ss:$24 sps:$4 sm:$0xff]  }
 0x152   :  { %2839 = vmatpush2.bf16.msra.mxu0 %v7382_v11  ;;  %v7443_v11 = vld [vmem:[#allocation5 + $0x698] ss:$24 sps:$4 sm:$0xff]  }
 0x153   :  { %2880 = vmatpush2.bf16.msra.mxu1 %v7385_v12  ;;  %2840 = vmatprep.subr.bf16.mxu0 %v7390_v13  ;;  %v7446_v12 = vld [vmem:[#allocation5 + $0x998] ss:$24 sps:$4 sm:$0xff]   ;;  %v7451_v13 = vld [vmem:[#allocation5 + $0x66c] ss:$24 sps:$4 sm:$0xff]  }
 0x154   :  { %2881 = vmatprep.subr.bf16.mxu1 %v7393_v14  ;;  %v7454_v14 = vld [vmem:[#allocation5 + $0x96c] ss:$24 sps:$4 sm:$0xff]  }
 0x156   :  { %2841 = vmatpush2.bf16.msra.mxu0 %v7388_v15  ;;  %v7449_v15 = vld [vmem:[#allocation5 + $0x668] ss:$24 sps:$4 sm:$0xff]  }
 0x157   :  { %2882 = vmatpush2.bf16.msra.mxu1 %v7391_v16  ;;  %2842 = vmatprep.subr.bf16.mxu0 %v7396_v17  ;;  %v7452_v16 = vld [vmem:[#allocation5 + $0x968] ss:$24 sps:$4 sm:$0xff]   ;;  %v7457_v17 = vld [vmem:[#allocation5 + $0x63c] ss:$24 sps:$4 sm:$0xff]  }
 0x158   :  { %2883 = vmatprep.subr.bf16.mxu1 %v7399_v18  ;;  %v7460_v18 = vld [vmem:[#allocation5 + $0x93c] ss:$24 sps:$4 sm:$0xff]  }
 0x15a   :  { %2843 = vmatpush2.bf16.msra.mxu0 %v7394_v19  ;;  %v7455_v19 = vld [vmem:[#allocation5 + $0x638] ss:$24 sps:$4 sm:$0xff]  }
 0x15b   :  { %2884 = vmatpush2.bf16.msra.mxu1 %v7397_v20  ;;  %2844 = vmatprep.subr.bf16.mxu0 %v7402_v21  ;;  %v7458_v20 = vld [vmem:[#allocation5 + $0x938] ss:$24 sps:$4 sm:$0xff]   ;;  %v7463_v21 = vld [vmem:[#allocation5 + $0x60c] ss:$24 sps:$4 sm:$0xff]  }
 0x15c   :  { %2885 = vmatprep.subr.bf16.mxu1 %v7405_v22  ;;  %v7466_v22 = vld [vmem:[#allocation5 + $0x90c] ss:$24 sps:$4 sm:$0xff]  }
 0x15e   :  { %2845 = vmatpush2.bf16.msra.mxu0 %v7400_v23  ;;  %v7461_v23 = vld [vmem:[#allocation5 + $0x608] ss:$24 sps:$4 sm:$0xff]  }
 0x15f   :  { %2886 = vmatpush2.bf16.msra.mxu1 %v7403_v24  ;;  %2846 = vmatprep.subr.bf16.mxu0 %v7408_v25  ;;  %v7464_v24 = vld [vmem:[#allocation5 + $0x908] ss:$24 sps:$4 sm:$0xff]   ;;  %v7469_v25 = vld [vmem:[#allocation5 + $0x8dc] ss:$24 sps:$4 sm:$0xff]  }
 0x160   :  { %2887 = vmatprep.subr.bf16.mxu1 %v7411_v26  ;;  %v7472_v26 = vld [vmem:[#allocation5 + $0xbdc] ss:$24 sps:$4 sm:$0xff]  }
 0x162   :  { %2847 = vmatpush2.bf16.msra.mxu0 %v7406_v27  ;;  %v7467_v27 = vld [vmem:[#allocation5 + $0x8d8] ss:$24 sps:$4 sm:$0xff]  }
 0x163   :  { %2888 = vmatpush2.bf16.msra.mxu1 %v7409_v28  ;;  %2848 = vmatprep.subr.bf16.mxu0 %v7414_v31  ;;  %v7470_v28 = vld [vmem:[#allocation5 + $0xbd8] ss:$24 sps:$4 sm:$0xff]   ;;  %v7475_v31 = vld [vmem:[#allocation5 + $0x8ac] ss:$24 sps:$4 sm:$0xff]  }
 0x164   :  { %2889 = vmatprep.subr.bf16.mxu1 %v7417_v32  ;;  %v7478_v32 = vld [vmem:[#allocation5 + $0xbac] ss:$24 sps:$4 sm:$0xff]  }
 0x166   :  { %2849 = vmatpush2.bf16.msra.mxu0 %v7412_v33  ;;  %v7473_v33 = vld [vmem:[#allocation5 + $0x8a8] ss:$24 sps:$4 sm:$0xff]  }
 0x167   :  { %2890 = vmatpush2.bf16.msra.mxu1 %v7415_v34  ;;  %2900 = vmatprep.subr.bf16.mxu0 %v7421_v39  ;;  %v7476_v34 = vld [vmem:[#allocation5 + $0xba8] ss:$24 sps:$4 sm:$0xff]   ;;  %v7481_v39 = vld [vmem:[#allocation5 + $0x87c] ss:$24 sps:$4 sm:$0xff]  }
 0x168   :  { %2941 = vmatprep.subr.bf16.mxu1 %v7424_v62  ;;  %v7484_v62 = vld [vmem:[#allocation5 + $0xb7c] ss:$24 sps:$4 sm:$0xff]  }
 0x169   :  { %v1381_v45 = vpop.f32.mrf.mxu0  ;;  %2851 = vmatmul.mubr.bf16.vlgmr.msra.gmra.mxu0 %v8567_v29 }
 0x16a   :  { %v1422_v46 = vpop.f32.mrf.mxu1  ;;  %2892 = vmatmul.mubr.bf16.vlgmr.msra.gmra.mxu1 %v8570_v30  ;;  %v1382_v48 = vadd.f32 %v1381_v45, %v338_v40  ;;  %2901 = vmatpush1.bf16.msra.mxu0 %v7419_v55  ;;  %v7479_v40 = vld [vmem:[#allocation5 + $0x878] ss:$24 sps:$4 sm:$0xff]   ;;  %v7493_v45 = vld [vmem:[#allocation5 + $0x81c] ss:$24 sps:$4 sm:$0xff]  }
 0x16b   :  { %2942 = vmatpush1.bf16.msra.mxu1 %v7422_v63  ;;  %v1383_v52 = vpop.f32.mrf.mxu0  ;;  %2902 = vmatprep.subr.bf16.mxu0 %v7427_v41  ;;  %v7482_v55 = vld [vmem:[#allocation5 + $0xb78] ss:$24 sps:$4 sm:$0xff]   ;;  %v7487_v63 = vld [vmem:[#allocation5 + $0x84c] ss:$24 sps:$4 sm:$0xff]  }
 0x16c   :  { %v1424_v53 = vpop.f32.mrf.mxu1  ;;  %2943 = vmatprep.subr.bf16.mxu1 %v7430_v43  ;;  %v1423_v56 = vadd.f32 %v1422_v46, %v1382_v48  ;;  %v1384_v57 = vadd.f32 %v1383_v52, %v342_v44  ;;  %2932 = vmatprep.mubr.bf16.mxu0 %v8574_v35  ;;  %v7490_v41 = vld [vmem:[#allocation5 + $0xb4c] ss:$24 sps:$4 sm:$0xff]   ;;  %v7485_v43 = vld [vmem:[#allocation5 + $0x848] ss:$24 sps:$4 sm:$0xff]   ;;  %v7496_v46 = vld [vmem:[#allocation5 + $0xb1c] ss:$24 sps:$4 sm:$0xff]  }
 0x16d   :  { %2973 = vmatprep.mubr.bf16.mxu1 %v8578_v36  ;;  %v1385_v59 = vpop.f32.mrf.mxu0  ;;  %v7488_v44 = vld [vmem:[#allocation5 + $0xb48] ss:$24 sps:$4 sm:$0xff]   ;;  %v7494_v48 = vld [vmem:[#allocation5 + $0xb18] ss:$24 sps:$4 sm:$0xff]  }
 0x16e   :  { %v1426_v60 = vpop.f32.mrf.mxu1  ;;  %v1425_v0 = vadd.f32 %v1424_v53, %v1384_v57  ;;  %2903 = vmatpush1.bf16.msra.mxu0 %v7425_v47  ;;  %v7491_v47 = vld [vmem:[#allocation5 + $0x818] ss:$24 sps:$4 sm:$0xff]   ;;  %v7497_v52 = vld [vmem:[#allocation5 + $0x7e8] ss:$24 sps:$4 sm:$0xff]   ;;  %v7511_v59 = vld [vmem:[#allocation5 + $0x78c] ss:$24 sps:$4 sm:$0xff]  }
 0x16f   :  { %2944 = vmatpush1.bf16.msra.mxu1 %v7428_v50  ;;  %v1386_v1 = vpop.f32.mrf.mxu0  ;;  %2904 = vmatprep.subr.bf16.mxu0 %v7433_v51  ;;  %v7499_v50 = vld [vmem:[#allocation5 + $0x7ec] ss:$24 sps:$4 sm:$0xff]   ;;  %v7500_v53 = vld [vmem:[#allocation5 + $0xae8] ss:$24 sps:$4 sm:$0xff]   ;;  %v7503_v57 = vld [vmem:[#allocation5 + $0x7b8] ss:$24 sps:$4 sm:$0xff]  }
 0x170   :  { %v1427_v3 = vpop.f32.mrf.mxu1  ;;  %2945 = vmatprep.subr.bf16.mxu1 %v7436_v54  ;;  %v1599_v6 = vcombine.low %v1423_v56, %v1425_v0  ;;  %v7502_v51 = vld [vmem:[#allocation5 + $0xaec] ss:$24 sps:$4 sm:$0xff]   ;;  %v7505_v54 = vld [vmem:[#allocation5 + $0x7bc] ss:$24 sps:$4 sm:$0xff]   ;;  %v7512_v0 = vld [vmem:[#allocation5 + $0xa88] ss:$24 sps:$4 sm:$0xff]  }
 0x171   :  { %v7508_v56 = vld [vmem:[#allocation5 + $0xabc] ss:$24 sps:$4 sm:$0xff]   ;;  %v7514_v60 = vld [vmem:[#allocation5 + $0xa8c] ss:$24 sps:$4 sm:$0xff]   ;;  %v8601_v1 = vsub.s32 2, %v8537_v42 }
 0x172   :  { %1605 = vst [vmem:[#allocation16] sm:$0xff] %v1599_v6  ;;  %2905 = vmatpush1.bf16.msra.mxu0 %v7431_v58  ;;  %v7506_v58 = vld [vmem:[#allocation5 + $0xab8] ss:$24 sps:$4 sm:$0xff]   ;;  %v7517_v3 = vld [vmem:[#allocation5 + $0x764] ss:$24 sps:$4 sm:$0xff]   ;;  %v8604_v6 = vsub.s32 3, %v8537_v42 }
 0x173   :  { %2946 = vmatpush1.bf16.msra.mxu1 %v7434_v61  ;;  %2906 = vmatprep.subr.bf16.mxu0 %v7439_v4  ;;  %v7509_v61 = vld [vmem:[#allocation5 + $0x788] ss:$24 sps:$4 sm:$0xff]   ;;  %v7520_v4 = vld [vmem:[#allocation5 + $0xa64] ss:$24 sps:$4 sm:$0xff]  }
 0x174   :  { %2947 = vmatprep.subr.bf16.mxu1 %v7442_v5  ;;  %v7515_v5 = vld [vmem:[#allocation5 + $0x760] ss:$24 sps:$4 sm:$0xff]  }
 0x176   :  { %2907 = vmatpush1.bf16.msra.mxu0 %v7437_v7  ;;  %v346_v7 = vrot.slane %v8584_v37, %v8601_v1 }
 0x177   :  { %2948 = vmatpush1.bf16.msra.mxu1 %v7440_v8  ;;  %2908 = vmatprep.subr.bf16.mxu0 %v7445_v9  ;;  %v7518_v8 = vld [vmem:[#allocation5 + $0xa60] ss:$24 sps:$4 sm:$0xff]   ;;  %v7523_v9 = vld [vmem:[#allocation5 + $0x734] ss:$24 sps:$4 sm:$0xff]  }
 0x178   :  { %2949 = vmatprep.subr.bf16.mxu1 %v7448_v10  ;;  %v7526_v10 = vld [vmem:[#allocation5 + $0xa34] ss:$24 sps:$4 sm:$0xff]  }
 0x17a   :  { %2909 = vmatpush1.bf16.msra.mxu0 %v7443_v11  ;;  %v350_v11 = vrot.slane %v8584_v37, %v8604_v6  ;;  %v7527_v37 = vld [vmem:[#allocation5 + $0x700] ss:$24 sps:$4 sm:$0xff]  }
 0x17b   :  { %2950 = vmatpush1.bf16.msra.mxu1 %v7446_v12  ;;  %2910 = vmatprep.subr.bf16.mxu0 %v7451_v13  ;;  %v7521_v12 = vld [vmem:[#allocation5 + $0x730] ss:$24 sps:$4 sm:$0xff]  }
 0x17c   :  { %2951 = vmatprep.subr.bf16.mxu1 %v7454_v14  ;;  %v7524_v13 = vld [vmem:[#allocation5 + $0xa30] ss:$24 sps:$4 sm:$0xff]  }
 0x17e   :  { %2911 = vmatpush1.bf16.msra.mxu0 %v7449_v15 }
 0x17f   :  { %2952 = vmatpush1.bf16.msra.mxu1 %v7452_v16  ;;  %2912 = vmatprep.subr.bf16.mxu0 %v7457_v17 }
 0x180   :  { %2953 = vmatprep.subr.bf16.mxu1 %v7460_v18 }
 0x182   :  { %2913 = vmatpush1.bf16.msra.mxu0 %v7455_v19  ;;  %v7529_v19 = vld [vmem:[#allocation5 + $0x704] ss:$24 sps:$4 sm:$0xff]  }
 0x183   :  { %2954 = vmatpush1.bf16.msra.mxu1 %v7458_v20  ;;  %2914 = vmatprep.subr.bf16.mxu0 %v7463_v21  ;;  %v7532_v20 = vld [vmem:[#allocation5 + $0xa04] ss:$24 sps:$4 sm:$0xff]  }
 0x184   :  { %2955 = vmatprep.subr.bf16.mxu1 %v7466_v22 }
 0x186   :  { %2915 = vmatpush1.bf16.msra.mxu0 %v7461_v23  ;;  %v7530_v23 = vld [vmem:[#allocation5 + $0xa00] ss:$24 sps:$4 sm:$0xff]  }
 0x187   :  { %2956 = vmatpush1.bf16.msra.mxu1 %v7464_v24  ;;  %2916 = vmatprep.subr.bf16.mxu0 %v7469_v25 }
 0x188   :  { %2957 = vmatprep.subr.bf16.mxu1 %v7472_v26 }
 0x18a   :  { %2917 = vmatpush2.bf16.msra.mxu0 %v7467_v27 }
 0x18b   :  { %2958 = vmatpush2.bf16.msra.mxu1 %v7470_v28  ;;  %2918 = vmatprep.subr.bf16.mxu0 %v7475_v31  ;;  %v7535_v31 = vld [vmem:[#allocation5 + $0x6d4] ss:$24 sps:$4 sm:$0xff]  }
 0x18c   :  { %2959 = vmatprep.subr.bf16.mxu1 %v7478_v32  ;;  %v7538_v32 = vld [vmem:[#allocation5 + $0x9d4] ss:$24 sps:$4 sm:$0xff]  }
 0x18e   :  { %2919 = vmatpush2.bf16.msra.mxu0 %v7473_v33 }
 0x18f   :  { %2960 = vmatpush2.bf16.msra.mxu1 %v7476_v34  ;;  %2920 = vmatprep.subr.bf16.mxu0 %v7481_v39  ;;  %v7533_v34 = vld [vmem:[#allocation5 + $0x6d0] ss:$24 sps:$4 sm:$0xff]  }
 0x190   :  { %2961 = vmatprep.subr.bf16.mxu1 %v7484_v62  ;;  %v7536_v39 = vld [vmem:[#allocation5 + $0x9d0] ss:$24 sps:$4 sm:$0xff]   ;;  %v7539_v62 = vld [vmem:[#allocation5 + $0x6a0] ss:$24 sps:$4 sm:$0xff]  }
 0x192   :  { %2921 = vmatpush2.bf16.msra.mxu0 %v7479_v40  ;;  %v7542_v40 = vld [vmem:[#allocation5 + $0x9a0] ss:$24 sps:$4 sm:$0xff]  }
 0x193   :  { %2962 = vmatpush2.bf16.msra.mxu1 %v7482_v55  ;;  %2922 = vmatprep.subr.bf16.mxu0 %v7487_v63  ;;  %v7547_v55 = vld [vmem:[#allocation5 + $0x674] ss:$24 sps:$4 sm:$0xff]  }
 0x194   :  { %2963 = vmatprep.subr.bf16.mxu1 %v7490_v41  ;;  %v7550_v63 = vld [vmem:[#allocation5 + $0x974] ss:$24 sps:$4 sm:$0xff]   ;;  %v7545_v41 = vld [vmem:[#allocation5 + $0x670] ss:$24 sps:$4 sm:$0xff]  }
 0x196   :  { %2923 = vmatpush2.bf16.msra.mxu0 %v7485_v43  ;;  %v7548_v43 = vld [vmem:[#allocation5 + $0x970] ss:$24 sps:$4 sm:$0xff]  }
 0x197   :  { %2964 = vmatpush2.bf16.msra.mxu1 %v7488_v44  ;;  %2924 = vmatprep.subr.bf16.mxu0 %v7493_v45  ;;  %v7553_v44 = vld [vmem:[#allocation5 + $0x644] ss:$24 sps:$4 sm:$0xff]  }
 0x198   :  { %2965 = vmatprep.subr.bf16.mxu1 %v7496_v46  ;;  %v7556_v45 = vld [vmem:[#allocation5 + $0x944] ss:$24 sps:$4 sm:$0xff]   ;;  %v7551_v46 = vld [vmem:[#allocation5 + $0x640] ss:$24 sps:$4 sm:$0xff]  }
 0x19a   :  { %2925 = vmatpush2.bf16.msra.mxu0 %v7491_v47  ;;  %v7554_v47 = vld [vmem:[#allocation5 + $0x940] ss:$24 sps:$4 sm:$0xff]  }
 0x19b   :  { %2966 = vmatpush2.bf16.msra.mxu1 %v7494_v48  ;;  %2926 = vmatprep.subr.bf16.mxu0 %v7499_v50  ;;  %v7559_v48 = vld [vmem:[#allocation5 + $0x614] ss:$24 sps:$4 sm:$0xff]  }
 0x19c   :  { %2967 = vmatprep.subr.bf16.mxu1 %v7502_v51  ;;  %v7562_v50 = vld [vmem:[#allocation5 + $0x914] ss:$24 sps:$4 sm:$0xff]   ;;  %v7557_v51 = vld [vmem:[#allocation5 + $0x610] ss:$24 sps:$4 sm:$0xff]  }
 0x19e   :  { %2927 = vmatpush2.bf16.msra.mxu0 %v7497_v52  ;;  %v7560_v52 = vld [vmem:[#allocation5 + $0x910] ss:$24 sps:$4 sm:$0xff]  }
 0x19f   :  { %2968 = vmatpush2.bf16.msra.mxu1 %v7500_v53  ;;  %2928 = vmatprep.subr.bf16.mxu0 %v7505_v54  ;;  %v7565_v53 = vld [vmem:[#allocation5 + $0x8e4] ss:$24 sps:$4 sm:$0xff]  }
 0x1a0   :  { %2969 = vmatprep.subr.bf16.mxu1 %v7508_v56  ;;  %v7568_v54 = vld [vmem:[#allocation5 + $0xbe4] ss:$24 sps:$4 sm:$0xff]   ;;  %v7563_v56 = vld [vmem:[#allocation5 + $0x8e0] ss:$24 sps:$4 sm:$0xff]  }
 0x1a2   :  { %2929 = vmatpush2.bf16.msra.mxu0 %v7503_v57  ;;  %v7566_v57 = vld [vmem:[#allocation5 + $0xbe0] ss:$24 sps:$4 sm:$0xff]  }
 0x1a3   :  { %2970 = vmatpush2.bf16.msra.mxu1 %v7506_v58  ;;  %2930 = vmatprep.subr.bf16.mxu0 %v7511_v59  ;;  %v7571_v58 = vld [vmem:[#allocation5 + $0x8b4] ss:$24 sps:$4 sm:$0xff]  }
 0x1a4   :  { %2971 = vmatprep.subr.bf16.mxu1 %v7514_v60  ;;  %v7574_v59 = vld [vmem:[#allocation5 + $0xbb4] ss:$24 sps:$4 sm:$0xff]   ;;  %v7569_v60 = vld [vmem:[#allocation5 + $0x8b0] ss:$24 sps:$4 sm:$0xff]  }
 0x1a6   :  { %2931 = vmatpush2.bf16.msra.mxu0 %v7509_v61  ;;  %v7572_v61 = vld [vmem:[#allocation5 + $0xbb0] ss:$24 sps:$4 sm:$0xff]  }
 0x1a7   :  { %2972 = vmatpush2.bf16.msra.mxu1 %v7512_v0  ;;  %2982 = vmatprep.subr.bf16.mxu0 %v7517_v3  ;;  %v7577_v0 = vld [vmem:[#allocation5 + $0x884] ss:$24 sps:$4 sm:$0xff]  }
 0x1a8   :  { %3023 = vmatprep.subr.bf16.mxu1 %v7520_v4  ;;  %v7580_v3 = vld [vmem:[#allocation5 + $0xb84] ss:$24 sps:$4 sm:$0xff]   ;;  %v7575_v4 = vld [vmem:[#allocation5 + $0x880] ss:$24 sps:$4 sm:$0xff]  }
 0x1a9   :  { %v1463_v14 = vpop.f32.mrf.mxu0  ;;  %2933 = vmatmul.mubr.bf16.vlgmr.msra.gmra.mxu0 %v8567_v29 }
 0x1aa   :  { %v1504_v15 = vpop.f32.mrf.mxu1  ;;  %2974 = vmatmul.mubr.bf16.vlgmr.msra.gmra.mxu1 %v8570_v30  ;;  %v1464_v16 = vadd.f32 %v1463_v14, %v346_v7  ;;  %2983 = vmatpush1.bf16.msra.mxu0 %v7515_v5  ;;  %v7578_v5 = vld [vmem:[#allocation5 + $0xb80] ss:$24 sps:$4 sm:$0xff]   ;;  %v7583_v7 = vld [vmem:[#allocation5 + $0x854] ss:$24 sps:$4 sm:$0xff]  }
 0x1ab   :  { %3024 = vmatpush1.bf16.msra.mxu1 %v7518_v8  ;;  %v1465_v17 = vpop.f32.mrf.mxu0  ;;  %2984 = vmatprep.subr.bf16.mxu0 %v7523_v9  ;;  %v7586_v8 = vld [vmem:[#allocation5 + $0xb54] ss:$24 sps:$4 sm:$0xff]   ;;  %v7581_v9 = vld [vmem:[#allocation5 + $0x850] ss:$24 sps:$4 sm:$0xff]   ;;  %v7590_v14 = vld [vmem:[#allocation5 + $0xb20] ss:$24 sps:$4 sm:$0xff]  }
 0x1ac   :  { %v1506_v18 = vpop.f32.mrf.mxu1  ;;  %3025 = vmatprep.subr.bf16.mxu1 %v7526_v10  ;;  %v1505_v21 = vadd.f32 %v1504_v15, %v1464_v16  ;;  %v1466_v22 = vadd.f32 %v1465_v17, %v350_v11  ;;  %3014 = vmatprep.mubr.bf16.mxu0 %v8574_v35  ;;  %v7541_v35 = vld [vmem:[#allocation5 + $0x6a4] ss:$24 sps:$4 sm:$0xff]   ;;  %v7584_v10 = vld [vmem:[#allocation5 + $0xb50] ss:$24 sps:$4 sm:$0xff]   ;;  %v7595_v15 = vld [vmem:[#allocation5 + $0x7f4] ss:$24 sps:$4 sm:$0xff]  }
 0x1ad   :  { %3055 = vmatprep.mubr.bf16.mxu1 %v8578_v36  ;;  %v1467_v24 = vpop.f32.mrf.mxu0  ;;  %v7544_v36 = vld [vmem:[#allocation5 + $0x9a4] ss:$24 sps:$4 sm:$0xff]   ;;  %v7598_v16 = vld [vmem:[#allocation5 + $0xaf4] ss:$24 sps:$4 sm:$0xff]   ;;  %v7593_v17 = vld [vmem:[#allocation5 + $0x7f0] ss:$24 sps:$4 sm:$0xff]  }
 0x1ae   :  { %v1508_v25 = vpop.f32.mrf.mxu1  ;;  %v1507_v26 = vadd.f32 %v1506_v18, %v1466_v22  ;;  %2985 = vmatpush1.bf16.msra.mxu0 %v7521_v12  ;;  %v7589_v11 = vld [vmem:[#allocation5 + $0x824] ss:$24 sps:$4 sm:$0xff]   ;;  %v7596_v18 = vld [vmem:[#allocation5 + $0xaf0] ss:$24 sps:$4 sm:$0xff]   ;;  %v7599_v22 = vld [vmem:[#allocation5 + $0x7c0] ss:$24 sps:$4 sm:$0xff]  }
 0x1af   :  { %3026 = vmatpush1.bf16.msra.mxu1 %v7524_v13  ;;  %v1468_v27 = vpop.f32.mrf.mxu0  ;;  %2986 = vmatprep.subr.bf16.mxu0 %v7529_v19  ;;  %v7592_v12 = vld [vmem:[#allocation5 + $0xb24] ss:$24 sps:$4 sm:$0xff]   ;;  %v7587_v13 = vld [vmem:[#allocation5 + $0x820] ss:$24 sps:$4 sm:$0xff]   ;;  %v7610_v24 = vld [vmem:[#allocation5 + $0xa94] ss:$24 sps:$4 sm:$0xff]  }
 0x1b0   :  { %v1509_v28 = vpop.f32.mrf.mxu1  ;;  %3027 = vmatprep.subr.bf16.mxu1 %v7532_v20  ;;  %v1600_v33 = vcombine.low %v1505_v21, %v1507_v26  ;;  %v7601_v19 = vld [vmem:[#allocation5 + $0x7c4] ss:$24 sps:$4 sm:$0xff]   ;;  %v7605_v26 = vld [vmem:[#allocation5 + $0x790] ss:$24 sps:$4 sm:$0xff]  }
 0x1b1   :  { %v7604_v20 = vld [vmem:[#allocation5 + $0xac4] ss:$24 sps:$4 sm:$0xff]   ;;  %v7608_v27 = vld [vmem:[#allocation5 + $0xa90] ss:$24 sps:$4 sm:$0xff]   ;;  %v8615_v28 = vsub.s32 4, %v8537_v42 }
 0x1b2   :  { %1606 = vst [vmem:[#allocation16 + $0x8] sm:$0xff] %v1600_v33  ;;  %2987 = vmatpush1.bf16.msra.mxu0 %v7527_v37  ;;  %v3081_v21 = vld [vmem:[#allocation2 + $0x10] sm:$0xff]  ;;  %v7611_v33 = vld [vmem:[#allocation5 + $0xd50] ss:$24 sps:$4 sm:$0xff]  }
 0x1b3   :  { %3028 = vmatpush1.bf16.msra.mxu1 %v7530_v23  ;;  %2988 = vmatprep.subr.bf16.mxu0 %v7535_v31  ;;  %v7602_v37 = vld [vmem:[#allocation5 + $0xac0] ss:$24 sps:$4 sm:$0xff]   ;;  %v7607_v23 = vld [vmem:[#allocation5 + $0x794] ss:$24 sps:$4 sm:$0xff]   ;;  %v3309_v25 = vcombine.high %v3081_v21, %v3081_v21 }
 0x1b4   :  { %3029 = vmatprep.subr.bf16.mxu1 %v7538_v32  ;;  %v7613_v31 = vld [vmem:[#allocation5 + $0xd54] ss:$24 sps:$4 sm:$0xff]  }
 0x1b5   :  { %v7616_v32 = vld [vmem:[#allocation5 + $0x1054] ss:$24 sps:$4 sm:$0xff]  }
 0x1b6   :  { %2989 = vmatpush1.bf16.msra.mxu0 %v7533_v34  ;;  %v7614_v34 = vld [vmem:[#allocation5 + $0x1050] ss:$24 sps:$4 sm:$0xff]  }
 0x1b7   :  { %3030 = vmatpush1.bf16.msra.mxu1 %v7536_v39  ;;  %2990 = vmatprep.subr.bf16.mxu0 %v7541_v35  ;;  %v8618_v39 = vsub.s32 5, %v8537_v42  ;;  %v8621_v35 = vrot.slane %v3081_v21, %v8540_v49  ;;  %v7620_v42 = vld [vmem:[#allocation5 + $0x1020] ss:$24 sps:$4 sm:$0xff]   ;;  %v7658_v21 = vld [vmem:[#allocation5 + $0xf04] ss:$24 sps:$4 sm:$0xff]  }
 0x1b8   :  { %3031 = vmatprep.subr.bf16.mxu1 %v7544_v36  ;;  %v8624_v36 = vrot.slane %v3309_v25, %v8540_v49  ;;  %v7659_v25 = vld [vmem:[#allocation5 + $0xed0] ss:$24 sps:$4 sm:$0xff]  }
 0x1ba   :  { %2991 = vmatpush1.bf16.msra.mxu0 %v7539_v62  ;;  %v8191_v62 = vld [vmem:[#allocation7] sm:$0x3f] }
 0x1bb   :  { %3032 = vmatpush1.bf16.msra.mxu1 %v7542_v40  ;;  %2992 = vmatprep.subr.bf16.mxu0 %v7547_v55  ;;  %v354_v40 = vrot.slane %v8191_v62, %v8615_v28  ;;  %v7619_v55 = vld [vmem:[#allocation5 + $0xd24] ss:$24 sps:$4 sm:$0xff]  }
 0x1bc   :  { %3033 = vmatprep.subr.bf16.mxu1 %v7550_v63  ;;  %v7622_v63 = vld [vmem:[#allocation5 + $0x1024] ss:$24 sps:$4 sm:$0xff]  }
 0x1be   :  { %2993 = vmatpush1.bf16.msra.mxu0 %v7545_v41  ;;  %v358_v41 = vrot.slane %v8191_v62, %v8618_v39  ;;  %v7676_v62 = vld [vmem:[#allocation5 + $0x1174] ss:$24 sps:$4 sm:$0xff]  }
 0x1bf   :  { %3034 = vmatpush1.bf16.msra.mxu1 %v7548_v43  ;;  %2994 = vmatprep.subr.bf16.mxu0 %v7553_v44  ;;  %v7617_v43 = vld [vmem:[#allocation5 + $0xd20] ss:$24 sps:$4 sm:$0xff]   ;;  %v8630_v44 = vcombine.high %v8621_v35, %v8621_v35 }
 0x1c0   :  { %3035 = vmatprep.subr.bf16.mxu1 %v7556_v45  ;;  %v8634_v45 = vcombine.high %v8624_v36, %v8624_v36 }
 0x1c2   :  { %2995 = vmatpush1.bf16.msra.mxu0 %v7551_v46 }
 0x1c3   :  { %3036 = vmatpush1.bf16.msra.mxu1 %v7554_v47  ;;  %2996 = vmatprep.subr.bf16.mxu0 %v7559_v48 }
 0x1c4   :  { %3037 = vmatprep.subr.bf16.mxu1 %v7562_v50 }
 0x1c6   :  { %2997 = vmatpush1.bf16.msra.mxu0 %v7557_v51 }
 0x1c7   :  { %3038 = vmatpush1.bf16.msra.mxu1 %v7560_v52  ;;  %2998 = vmatprep.subr.bf16.mxu0 %v7565_v53  ;;  %v7625_v52 = vld [vmem:[#allocation5 + $0xcf4] ss:$24 sps:$4 sm:$0xff]  }
 0x1c8   :  { %3039 = vmatprep.subr.bf16.mxu1 %v7568_v54  ;;  %v7628_v53 = vld [vmem:[#allocation5 + $0xff4] ss:$24 sps:$4 sm:$0xff]  }
 0x1ca   :  { %2999 = vmatpush2.bf16.msra.mxu0 %v7563_v56 }
 0x1cb   :  { %3040 = vmatpush2.bf16.msra.mxu1 %v7566_v57  ;;  %3000 = vmatprep.subr.bf16.mxu0 %v7571_v58  ;;  %v7623_v57 = vld [vmem:[#allocation5 + $0xcf0] ss:$24 sps:$4 sm:$0xff]  }
 0x1cc   :  { %3041 = vmatprep.subr.bf16.mxu1 %v7574_v59  ;;  %v7626_v58 = vld [vmem:[#allocation5 + $0xff0] ss:$24 sps:$4 sm:$0xff]  }
 0x1ce   :  { %3001 = vmatpush2.bf16.msra.mxu0 %v7569_v60 }
 0x1cf   :  { %3042 = vmatpush2.bf16.msra.mxu1 %v7572_v61  ;;  %3002 = vmatprep.subr.bf16.mxu0 %v7577_v0  ;;  %v7631_v0 = vld [vmem:[#allocation5 + $0xcc4] ss:$24 sps:$4 sm:$0xff]  }
 0x1d0   :  { %3043 = vmatprep.subr.bf16.mxu1 %v7580_v3  ;;  %v7634_v3 = vld [vmem:[#allocation5 + $0xfc4] ss:$24 sps:$4 sm:$0xff]  }
 0x1d2   :  { %3003 = vmatpush2.bf16.msra.mxu0 %v7575_v4 }
 0x1d3   :  { %3044 = vmatpush2.bf16.msra.mxu1 %v7578_v5  ;;  %3004 = vmatprep.subr.bf16.mxu0 %v7583_v7  ;;  %v7629_v5 = vld [vmem:[#allocation5 + $0xcc0] ss:$24 sps:$4 sm:$0xff]  }
 0x1d4   :  { %3045 = vmatprep.subr.bf16.mxu1 %v7586_v8  ;;  %v7632_v7 = vld [vmem:[#allocation5 + $0xfc0] ss:$24 sps:$4 sm:$0xff]   ;;  %v7637_v8 = vld [vmem:[#allocation5 + $0xc94] ss:$24 sps:$4 sm:$0xff]  }
 0x1d6   :  { %3005 = vmatpush2.bf16.msra.mxu0 %v7581_v9  ;;  %v7640_v9 = vld [vmem:[#allocation5 + $0xf94] ss:$24 sps:$4 sm:$0xff]  }
 0x1d7   :  { %3046 = vmatpush2.bf16.msra.mxu1 %v7584_v10  ;;  %3006 = vmatprep.subr.bf16.mxu0 %v7589_v11  ;;  %v7635_v10 = vld [vmem:[#allocation5 + $0xc90] ss:$24 sps:$4 sm:$0xff]  }
 0x1d8   :  { %3047 = vmatprep.subr.bf16.mxu1 %v7592_v12  ;;  %v7638_v11 = vld [vmem:[#allocation5 + $0xf90] ss:$24 sps:$4 sm:$0xff]   ;;  %v7643_v12 = vld [vmem:[#allocation5 + $0xc64] ss:$24 sps:$4 sm:$0xff]  }
 0x1da   :  { %3007 = vmatpush2.bf16.msra.mxu0 %v7587_v13  ;;  %v7646_v13 = vld [vmem:[#allocation5 + $0xf64] ss:$24 sps:$4 sm:$0xff]  }
 0x1db   :  { %3048 = vmatpush2.bf16.msra.mxu1 %v7590_v14  ;;  %3008 = vmatprep.subr.bf16.mxu0 %v7595_v15  ;;  %v7641_v14 = vld [vmem:[#allocation5 + $0xc60] ss:$24 sps:$4 sm:$0xff]  }
 0x1dc   :  { %3049 = vmatprep.subr.bf16.mxu1 %v7598_v16  ;;  %v7644_v15 = vld [vmem:[#allocation5 + $0xf60] ss:$24 sps:$4 sm:$0xff]   ;;  %v7649_v16 = vld [vmem:[#allocation5 + $0xc34] ss:$24 sps:$4 sm:$0xff]  }
 0x1de   :  { %3009 = vmatpush2.bf16.msra.mxu0 %v7593_v17  ;;  %v7652_v17 = vld [vmem:[#allocation5 + $0xf34] ss:$24 sps:$4 sm:$0xff]  }
 0x1df   :  { %3050 = vmatpush2.bf16.msra.mxu1 %v7596_v18  ;;  %3010 = vmatprep.subr.bf16.mxu0 %v7601_v19  ;;  %v7647_v18 = vld [vmem:[#allocation5 + $0xc30] ss:$24 sps:$4 sm:$0xff]  }
 0x1e0   :  { %3051 = vmatprep.subr.bf16.mxu1 %v7604_v20  ;;  %v7650_v19 = vld [vmem:[#allocation5 + $0xf30] ss:$24 sps:$4 sm:$0xff]   ;;  %v7655_v20 = vld [vmem:[#allocation5 + $0xc04] ss:$24 sps:$4 sm:$0xff]  }
 0x1e2   :  { %3011 = vmatpush2.bf16.msra.mxu0 %v7599_v22  ;;  %v7653_v22 = vld [vmem:[#allocation5 + $0xc00] ss:$24 sps:$4 sm:$0xff]  }
 0x1e3   :  { %3052 = vmatpush2.bf16.msra.mxu1 %v7602_v37  ;;  %3012 = vmatprep.subr.bf16.mxu0 %v7607_v23  ;;  %v7656_v37 = vld [vmem:[#allocation5 + $0xf00] ss:$24 sps:$4 sm:$0xff]   ;;  %v7661_v23 = vld [vmem:[#allocation5 + $0xed4] ss:$24 sps:$4 sm:$0xff]  }
 0x1e4   :  { %3053 = vmatprep.subr.bf16.mxu1 %v7610_v24  ;;  %v7664_v24 = vld [vmem:[#allocation5 + $0x11d4] ss:$24 sps:$4 sm:$0xff]  }
 0x1e6   :  { %3013 = vmatpush2.bf16.msra.mxu0 %v7605_v26  ;;  %v7662_v26 = vld [vmem:[#allocation5 + $0x11d0] ss:$24 sps:$4 sm:$0xff]  }
 0x1e7   :  { %3054 = vmatpush2.bf16.msra.mxu1 %v7608_v27  ;;  %4290 = vmatprep.subr.bf16.mxu0 %v7613_v31  ;;  %v7667_v27 = vld [vmem:[#allocation5 + $0xea4] ss:$24 sps:$4 sm:$0xff]  }
 0x1e8   :  { %4331 = vmatprep.subr.bf16.mxu1 %v7616_v32  ;;  %v7670_v31 = vld [vmem:[#allocation5 + $0x11a4] ss:$24 sps:$4 sm:$0xff]   ;;  %v7665_v32 = vld [vmem:[#allocation5 + $0xea0] ss:$24 sps:$4 sm:$0xff]  }
 0x1e9   :  { %v1545_v46 = vpop.f32.mrf.mxu0  ;;  %3015 = vmatmul.mubr.bf16.vlgmr.msra.gmra.mxu0 %v8567_v29 }
 0x1ea   :  { %v1586_v47 = vpop.f32.mrf.mxu1  ;;  %3056 = vmatmul.mubr.bf16.vlgmr.msra.gmra.mxu1 %v8570_v30  ;;  %v1546_v48 = vadd.f32 %v1545_v46, %v354_v40  ;;  %4291 = vmatpush1.bf16.msra.mxu0 %v7611_v33  ;;  %v7668_v33 = vld [vmem:[#allocation5 + $0x11a0] ss:$24 sps:$4 sm:$0xff]   ;;  %v7671_v40 = vld [vmem:[#allocation5 + $0xe70] ss:$24 sps:$4 sm:$0xff]   ;;  %v7685_v46 = vld [vmem:[#allocation5 + $0xe14] ss:$24 sps:$4 sm:$0xff]  }
 0x1eb   :  { %4332 = vmatpush1.bf16.msra.mxu1 %v7614_v34  ;;  %v1547_v50 = vpop.f32.mrf.mxu0  ;;  %4292 = vmatprep.subr.bf16.mxu0 %v7619_v55  ;;  %v7673_v34 = vld [vmem:[#allocation5 + $0xe74] ss:$24 sps:$4 sm:$0xff]   ;;  %v7674_v55 = vld [vmem:[#allocation5 + $0x1170] ss:$24 sps:$4 sm:$0xff]  }
 0x1ec   :  { %v1588_v51 = vpop.f32.mrf.mxu1  ;;  %4333 = vmatprep.subr.bf16.mxu1 %v7622_v63  ;;  %v1587_v54 = vadd.f32 %v1586_v47, %v1546_v48  ;;  %v1548_v56 = vadd.f32 %v1547_v50, %v358_v41  ;;  %4322 = vmatprep.mubr.bf16.mxu0 %v8630_v44  ;;  %v7679_v63 = vld [vmem:[#allocation5 + $0xe44] ss:$24 sps:$4 sm:$0xff]   ;;  %v7688_v47 = vld [vmem:[#allocation5 + $0x1114] ss:$24 sps:$4 sm:$0xff]   ;;  %v7683_v48 = vld [vmem:[#allocation5 + $0xe10] ss:$24 sps:$4 sm:$0xff]  }
 0x1ed   :  { %4363 = vmatprep.mubr.bf16.mxu1 %v8634_v45  ;;  %v1549_v29 = vpop.f32.mrf.mxu0  ;;  %v7682_v41 = vld [vmem:[#allocation5 + $0x1144] ss:$24 sps:$4 sm:$0xff]   ;;  %v7686_v50 = vld [vmem:[#allocation5 + $0x1110] ss:$24 sps:$4 sm:$0xff]  }
 0x1ee   :  { %v1590_v59 = vpop.f32.mrf.mxu1  ;;  %v1589_v30 = vadd.f32 %v1588_v51, %v1548_v56  ;;  %4293 = vmatpush1.bf16.msra.mxu0 %v7617_v43  ;;  %v7677_v43 = vld [vmem:[#allocation5 + $0xe40] ss:$24 sps:$4 sm:$0xff]   ;;  %v7691_v51 = vld [vmem:[#allocation5 + $0xde4] ss:$24 sps:$4 sm:$0xff]   ;;  %v7697_v56 = vld [vmem:[#allocation5 + $0xdb4] ss:$24 sps:$4 sm:$0xff]  }
 0x1ef   :  { %4334 = vmatpush1.bf16.msra.mxu1 %v7620_v42  ;;  %v1550_v60 = vpop.f32.mrf.mxu0  ;;  %4294 = vmatprep.subr.bf16.mxu0 %v7625_v52  ;;  %v7680_v42 = vld [vmem:[#allocation5 + $0x1140] ss:$24 sps:$4 sm:$0xff]   ;;  %v7694_v52 = vld [vmem:[#allocation5 + $0x10e4] ss:$24 sps:$4 sm:$0xff]   ;;  %v7698_v29 = vld [vmem:[#allocation5 + $0x10b0] ss:$24 sps:$4 sm:$0xff]  }
 0x1f0   :  { %v1591_v61 = vpop.f32.mrf.mxu1  ;;  %4335 = vmatprep.subr.bf16.mxu1 %v7628_v53  ;;  %v1601_v4 = vcombine.low %v1587_v54, %v1589_v30  ;;  %v7689_v53 = vld [vmem:[#allocation5 + $0xde0] ss:$24 sps:$4 sm:$0xff]   ;;  %v7703_v59 = vld [vmem:[#allocation5 + $0xd84] ss:$24 sps:$4 sm:$0xff]  }
 0x1f1   :  { %v7692_v54 = vld [vmem:[#allocation5 + $0x10e0] ss:$24 sps:$4 sm:$0xff]   ;;  %v7706_v30 = vld [vmem:[#allocation5 + $0x1084] ss:$24 sps:$4 sm:$0xff]  }
 0x1f2   :  { %1607 = vst [vmem:[#allocation16 + $0x10] sm:$0xff] %v1601_v4  ;;  %4295 = vmatpush1.bf16.msra.mxu0 %v7623_v57  ;;  %v7700_v57 = vld [vmem:[#allocation5 + $0x10b4] ss:$24 sps:$4 sm:$0xff]   ;;  %v7701_v60 = vld [vmem:[#allocation5 + $0xd80] ss:$24 sps:$4 sm:$0xff]  }
 0x1f3   :  { %4336 = vmatpush1.bf16.msra.mxu1 %v7626_v58  ;;  %4296 = vmatprep.subr.bf16.mxu0 %v7631_v0  ;;  %v7695_v58 = vld [vmem:[#allocation5 + $0xdb0] ss:$24 sps:$4 sm:$0xff]   ;;  %v7704_v61 = vld [vmem:[#allocation5 + $0x1080] ss:$24 sps:$4 sm:$0xff]   ;;  %v7713_v4 = vld [vmem:[#allocation5 + $0x105c] ss:$24 sps:$4 sm:$0xff]  }
 0x1f4   :  { %4337 = vmatprep.subr.bf16.mxu1 %v7634_v3  ;;  %v8640_v0 = vld [vmem:[#allocation7 + $0x6] sm:$0x3f]  ;;  %v7710_v3 = vld [vmem:[#allocation5 + $0xd5c] ss:$24 sps:$4 sm:$0xff]  }
 0x1f6   :  { %4297 = vmatpush1.bf16.msra.mxu0 %v7629_v5  ;;  %v7708_v5 = vld [vmem:[#allocation5 + $0xd58] ss:$24 sps:$4 sm:$0xff]  }
 0x1f7   :  { %4338 = vmatpush1.bf16.msra.mxu1 %v7632_v7  ;;  %4298 = vmatprep.subr.bf16.mxu0 %v7637_v8  ;;  %v7711_v7 = vld [vmem:[#allocation5 + $0x1058] ss:$24 sps:$4 sm:$0xff]   ;;  %v1809_v8 = vrot.slane %v8640_v0, %v8587_v38 }
 0x1f8   :  { %4339 = vmatprep.subr.bf16.mxu1 %v7640_v9  ;;  %v7716_v9 = vld [vmem:[#allocation5 + $0xd2c] ss:$24 sps:$4 sm:$0xff]  }
 0x1fa   :  { %4299 = vmatpush1.bf16.msra.mxu0 %v7635_v10  ;;  %v7719_v10 = vld [vmem:[#allocation5 + $0x102c] ss:$24 sps:$4 sm:$0xff]  }
 0x1fb   :  { %4340 = vmatpush1.bf16.msra.mxu1 %v7638_v11  ;;  %4300 = vmatprep.subr.bf16.mxu0 %v7643_v12  ;;  %v1813_v11 = vrot.slane %v8640_v0, %v8590_v2 }
 0x1fc   :  { %4341 = vmatprep.subr.bf16.mxu1 %v7646_v13 }
 0x1fe   :  { %4301 = vmatpush1.bf16.msra.mxu0 %v7641_v14 }
 0x1ff   :  { %4342 = vmatpush1.bf16.msra.mxu1 %v7644_v15  ;;  %4302 = vmatprep.subr.bf16.mxu0 %v7649_v16  ;;  %v7714_v15 = vld [vmem:[#allocation5 + $0xd28] ss:$24 sps:$4 sm:$0xff]  }
 0x200   :  { %4343 = vmatprep.subr.bf16.mxu1 %v7652_v17  ;;  %v7717_v16 = vld [vmem:[#allocation5 + $0x1028] ss:$24 sps:$4 sm:$0xff]  }
 0x202   :  { %4303 = vmatpush1.bf16.msra.mxu0 %v7647_v18 }
 0x203   :  { %4344 = vmatpush1.bf16.msra.mxu1 %v7650_v19  ;;  %4304 = vmatprep.subr.bf16.mxu0 %v7655_v20  ;;  %v7722_v19 = vld [vmem:[#allocation5 + $0xcfc] ss:$24 sps:$4 sm:$0xff]  }
 0x204   :  { %4345 = vmatprep.subr.bf16.mxu1 %v7658_v21  ;;  %v7725_v20 = vld [vmem:[#allocation5 + $0xffc] ss:$24 sps:$4 sm:$0xff]  }
 0x206   :  { %4305 = vmatpush1.bf16.msra.mxu0 %v7653_v22 }
 0x207   :  { %4346 = vmatpush1.bf16.msra.mxu1 %v7656_v37  ;;  %4306 = vmatprep.subr.bf16.mxu0 %v7661_v23 }
 0x208   :  { %4347 = vmatprep.subr.bf16.mxu1 %v7664_v24 }
 0x20a   :  { %4307 = vmatpush2.bf16.msra.mxu0 %v7659_v25  ;;  %v7720_v25 = vld [vmem:[#allocation5 + $0xcf8] ss:$24 sps:$4 sm:$0xff]  }
 0x20b   :  { %4348 = vmatpush2.bf16.msra.mxu1 %v7662_v26  ;;  %4308 = vmatprep.subr.bf16.mxu0 %v7667_v27  ;;  %v7723_v26 = vld [vmem:[#allocation5 + $0xff8] ss:$24 sps:$4 sm:$0xff]  }
 0x20c   :  { %4349 = vmatprep.subr.bf16.mxu1 %v7670_v31 }
 0x20e   :  { %4309 = vmatpush2.bf16.msra.mxu0 %v7665_v32  ;;  %v7728_v32 = vld [vmem:[#allocation5 + $0xccc] ss:$24 sps:$4 sm:$0xff]  }
 0x20f   :  { %4350 = vmatpush2.bf16.msra.mxu1 %v7668_v33  ;;  %4310 = vmatprep.subr.bf16.mxu0 %v7673_v34  ;;  %v7731_v33 = vld [vmem:[#allocation5 + $0xfcc] ss:$24 sps:$4 sm:$0xff]  }
 0x210   :  { %4351 = vmatprep.subr.bf16.mxu1 %v7676_v62  ;;  %v7726_v62 = vld [vmem:[#allocation5 + $0xcc8] ss:$24 sps:$4 sm:$0xff]  }
 0x212   :  { %4311 = vmatpush2.bf16.msra.mxu0 %v7671_v40  ;;  %v7729_v40 = vld [vmem:[#allocation5 + $0xfc8] ss:$24 sps:$4 sm:$0xff]  }
 0x213   :  { %4352 = vmatpush2.bf16.msra.mxu1 %v7674_v55  ;;  %4312 = vmatprep.subr.bf16.mxu0 %v7679_v63  ;;  %v7734_v55 = vld [vmem:[#allocation5 + $0xc9c] ss:$24 sps:$4 sm:$0xff]  }
 0x214   :  { %4353 = vmatprep.subr.bf16.mxu1 %v7682_v41  ;;  %v7737_v63 = vld [vmem:[#allocation5 + $0xf9c] ss:$24 sps:$4 sm:$0xff]   ;;  %v7732_v41 = vld [vmem:[#allocation5 + $0xc98] ss:$24 sps:$4 sm:$0xff]  }
 0x216   :  { %4313 = vmatpush2.bf16.msra.mxu0 %v7677_v43  ;;  %v7735_v43 = vld [vmem:[#allocation5 + $0xf98] ss:$24 sps:$4 sm:$0xff]  }
 0x217   :  { %4354 = vmatpush2.bf16.msra.mxu1 %v7680_v42  ;;  %4314 = vmatprep.subr.bf16.mxu0 %v7685_v46  ;;  %v7740_v42 = vld [vmem:[#allocation5 + $0xc6c] ss:$24 sps:$4 sm:$0xff]  }
 0x218   :  { %4355 = vmatprep.subr.bf16.mxu1 %v7688_v47  ;;  %v7743_v46 = vld [vmem:[#allocation5 + $0xf6c] ss:$24 sps:$4 sm:$0xff]   ;;  %v7738_v47 = vld [vmem:[#allocation5 + $0xc68] ss:$24 sps:$4 sm:$0xff]  }
 0x21a   :  { %4315 = vmatpush2.bf16.msra.mxu0 %v7683_v48  ;;  %v7741_v48 = vld [vmem:[#allocation5 + $0xf68] ss:$24 sps:$4 sm:$0xff]  }
 0x21b   :  { %4356 = vmatpush2.bf16.msra.mxu1 %v7686_v50  ;;  %4316 = vmatprep.subr.bf16.mxu0 %v7691_v51  ;;  %v7746_v50 = vld [vmem:[#allocation5 + $0xc3c] ss:$24 sps:$4 sm:$0xff]  }
 0x21c   :  { %4357 = vmatprep.subr.bf16.mxu1 %v7694_v52  ;;  %v7749_v51 = vld [vmem:[#allocation5 + $0xf3c] ss:$24 sps:$4 sm:$0xff]   ;;  %v7744_v52 = vld [vmem:[#allocation5 + $0xc38] ss:$24 sps:$4 sm:$0xff]  }
 0x21e   :  { %4317 = vmatpush2.bf16.msra.mxu0 %v7689_v53  ;;  %v7747_v53 = vld [vmem:[#allocation5 + $0xf38] ss:$24 sps:$4 sm:$0xff]  }
 0x21f   :  { %4358 = vmatpush2.bf16.msra.mxu1 %v7692_v54  ;;  %4318 = vmatprep.subr.bf16.mxu0 %v7697_v56  ;;  %v7752_v54 = vld [vmem:[#allocation5 + $0xc0c] ss:$24 sps:$4 sm:$0xff]  }
 0x220   :  { %4359 = vmatprep.subr.bf16.mxu1 %v7700_v57  ;;  %v7755_v56 = vld [vmem:[#allocation5 + $0xf0c] ss:$24 sps:$4 sm:$0xff]   ;;  %v7750_v57 = vld [vmem:[#allocation5 + $0xc08] ss:$24 sps:$4 sm:$0xff]  }
 0x222   :  { %4319 = vmatpush2.bf16.msra.mxu0 %v7695_v58  ;;  %v7753_v58 = vld [vmem:[#allocation5 + $0xf08] ss:$24 sps:$4 sm:$0xff]  }
 0x223   :  { %4360 = vmatpush2.bf16.msra.mxu1 %v7698_v29  ;;  %4320 = vmatprep.subr.bf16.mxu0 %v7703_v59  ;;  %v7758_v29 = vld [vmem:[#allocation5 + $0xedc] ss:$24 sps:$4 sm:$0xff]  }
 0x224   :  { %4361 = vmatprep.subr.bf16.mxu1 %v7706_v30  ;;  %v7761_v59 = vld [vmem:[#allocation5 + $0x11dc] ss:$24 sps:$4 sm:$0xff]   ;;  %v7756_v30 = vld [vmem:[#allocation5 + $0xed8] ss:$24 sps:$4 sm:$0xff]  }
 0x226   :  { %4321 = vmatpush2.bf16.msra.mxu0 %v7701_v60  ;;  %v7759_v60 = vld [vmem:[#allocation5 + $0x11d8] ss:$24 sps:$4 sm:$0xff]  }
 0x227   :  { %4362 = vmatpush2.bf16.msra.mxu1 %v7704_v61  ;;  %4372 = vmatprep.subr.bf16.mxu0 %v7710_v3  ;;  %v7764_v61 = vld [vmem:[#allocation5 + $0xeac] ss:$24 sps:$4 sm:$0xff]  }
 0x228   :  { %4413 = vmatprep.subr.bf16.mxu1 %v7713_v4  ;;  %v7767_v3 = vld [vmem:[#allocation5 + $0x11ac] ss:$24 sps:$4 sm:$0xff]   ;;  %v7762_v4 = vld [vmem:[#allocation5 + $0xea8] ss:$24 sps:$4 sm:$0xff]  }
 0x229   :  { %v2852_v12 = vpop.f32.mrf.mxu0  ;;  %4323 = vmatmul.mubr.bf16.vlgmr.msra.gmra.mxu0 %v8621_v35 }
 0x22a   :  { %v2893_v13 = vpop.f32.mrf.mxu1  ;;  %4364 = vmatmul.mubr.bf16.vlgmr.msra.gmra.mxu1 %v8624_v36  ;;  %v2853_v14 = vadd.f32 %v2852_v12, %v1809_v8  ;;  %4373 = vmatpush1.bf16.msra.mxu0 %v7708_v5  ;;  %v7765_v5 = vld [vmem:[#allocation5 + $0x11a8] ss:$24 sps:$4 sm:$0xff]   ;;  %v7773_v8 = vld [vmem:[#allocation5 + $0x117c] ss:$24 sps:$4 sm:$0xff]   ;;  %v7779_v12 = vld [vmem:[#allocation5 + $0x114c] ss:$24 sps:$4 sm:$0xff]  }
 0x22b   :  { %4414 = vmatpush1.bf16.msra.mxu1 %v7711_v7  ;;  %v2854_v17 = vpop.f32.mrf.mxu0  ;;  %4374 = vmatprep.subr.bf16.mxu0 %v7716_v9  ;;  %v7770_v7 = vld [vmem:[#allocation5 + $0xe7c] ss:$24 sps:$4 sm:$0xff]   ;;  %v7768_v9 = vld [vmem:[#allocation5 + $0xe78] ss:$24 sps:$4 sm:$0xff]  }
 0x22c   :  { %v2895_v18 = vpop.f32.mrf.mxu1  ;;  %4415 = vmatprep.subr.bf16.mxu1 %v7719_v10  ;;  %v2894_v21 = vadd.f32 %v2893_v13, %v2853_v14  ;;  %v2855_v22 = vadd.f32 %v2854_v17, %v1813_v11  ;;  %4404 = vmatprep.mubr.bf16.mxu0 %v8630_v44  ;;  %v7771_v10 = vld [vmem:[#allocation5 + $0x1178] ss:$24 sps:$4 sm:$0xff]   ;;  %v7776_v11 = vld [vmem:[#allocation5 + $0xe4c] ss:$24 sps:$4 sm:$0xff]   ;;  %v7774_v13 = vld [vmem:[#allocation5 + $0xe48] ss:$24 sps:$4 sm:$0xff]  }
 0x22d   :  { %4445 = vmatprep.mubr.bf16.mxu1 %v8634_v45  ;;  %v2856_v37 = vpop.f32.mrf.mxu0  ;;  %v7777_v14 = vld [vmem:[#allocation5 + $0x1148] ss:$24 sps:$4 sm:$0xff]   ;;  %v7780_v17 = vld [vmem:[#allocation5 + $0xe18] ss:$24 sps:$4 sm:$0xff]  }
 0x22e   :  { %v2897_v23 = vpop.f32.mrf.mxu1  ;;  %v2896_v24 = vadd.f32 %v2895_v18, %v2855_v22  ;;  %4375 = vmatpush1.bf16.msra.mxu0 %v7714_v15  ;;  %v7782_v15 = vld [vmem:[#allocation5 + $0xe1c] ss:$24 sps:$4 sm:$0xff]   ;;  %v7783_v18 = vld [vmem:[#allocation5 + $0x1118] ss:$24 sps:$4 sm:$0xff]   ;;  %v7789_v22 = vld [vmem:[#allocation5 + $0x10e8] ss:$24 sps:$4 sm:$0xff]  }
 0x22f   :  { %4416 = vmatpush1.bf16.msra.mxu1 %v7717_v16  ;;  %v2857_v27 = vpop.f32.mrf.mxu0  ;;  %4376 = vmatprep.subr.bf16.mxu0 %v7722_v19  ;;  %v7785_v16 = vld [vmem:[#allocation5 + $0x111c] ss:$24 sps:$4 sm:$0xff]   ;;  %v7788_v19 = vld [vmem:[#allocation5 + $0xdec] ss:$24 sps:$4 sm:$0xff]  }
 0x230   :  { %v2898_v31 = vpop.f32.mrf.mxu1  ;;  %4417 = vmatprep.subr.bf16.mxu1 %v7725_v20  ;;  %v3070_v34 = vcombine.low %v2894_v21, %v2896_v24  ;;  %v7791_v20 = vld [vmem:[#allocation5 + $0x10ec] ss:$24 sps:$4 sm:$0xff]   ;;  %v7786_v21 = vld [vmem:[#allocation5 + $0xde8] ss:$24 sps:$4 sm:$0xff]   ;;  %v7794_v37 = vld [vmem:[#allocation5 + $0xdbc] ss:$24 sps:$4 sm:$0xff]  }
 0x231   :  { %v7797_v23 = vld [vmem:[#allocation5 + $0x10bc] ss:$24 sps:$4 sm:$0xff]   ;;  %v7792_v24 = vld [vmem:[#allocation5 + $0xdb8] ss:$24 sps:$4 sm:$0xff]   ;;  %v7803_v27 = vld [vmem:[#allocation5 + $0x108c] ss:$24 sps:$4 sm:$0xff]  }
 0x232   :  { %3077 = vst [vmem:[#allocation16 + $0x18] sm:$0xff] %v3070_v34  ;;  %4377 = vmatpush1.bf16.msra.mxu0 %v7720_v25  ;;  %v7795_v25 = vld [vmem:[#allocation5 + $0x10b8] ss:$24 sps:$4 sm:$0xff]   ;;  %v7798_v31 = vld [vmem:[#allocation5 + $0xd88] ss:$24 sps:$4 sm:$0xff]  }
 0x233   :  { %4418 = vmatpush1.bf16.msra.mxu1 %v7723_v26  ;;  %4378 = vmatprep.subr.bf16.mxu0 %v7728_v32  ;;  %v7800_v26 = vld [vmem:[#allocation5 + $0xd8c] ss:$24 sps:$4 sm:$0xff]   ;;  %v7801_v32 = vld [vmem:[#allocation5 + $0x1088] ss:$24 sps:$4 sm:$0xff]  }
 0x234   :  { %4419 = vmatprep.subr.bf16.mxu1 %v7731_v33  ;;  %v7806_v33 = vld [vmem:[#allocation5 + $0xd64] ss:$24 sps:$4 sm:$0xff]  }
 0x235   :  { %v7809_v34 = vld [vmem:[#allocation5 + $0x1064] ss:$24 sps:$4 sm:$0xff]  }
 0x236   :  { %4379 = vmatpush1.bf16.msra.mxu0 %v7726_v62  ;;  %v1817_v62 = vrot.slane %v8640_v0, %v8601_v1 }
 0x237   :  { %4420 = vmatpush1.bf16.msra.mxu1 %v7729_v40  ;;  %4380 = vmatprep.subr.bf16.mxu0 %v7734_v55  ;;  %v7804_v40 = vld [vmem:[#allocation5 + $0xd60] ss:$24 sps:$4 sm:$0xff]  }
 0x238   :  { %4421 = vmatprep.subr.bf16.mxu1 %v7737_v63  ;;  %v7807_v55 = vld [vmem:[#allocation5 + $0x1060] ss:$24 sps:$4 sm:$0xff]   ;;  %v7812_v63 = vld [vmem:[#allocation5 + $0xd34] ss:$24 sps:$4 sm:$0xff]  }
 0x23a   :  { %4381 = vmatpush1.bf16.msra.mxu0 %v7732_v41  ;;  %v7815_v41 = vld [vmem:[#allocation5 + $0x1034] ss:$24 sps:$4 sm:$0xff]  }
 0x23b   :  { %4422 = vmatpush1.bf16.msra.mxu1 %v7735_v43  ;;  %4382 = vmatprep.subr.bf16.mxu0 %v7740_v42  ;;  %v1821_v43 = vrot.slane %v8640_v0, %v8604_v6 }
 0x23c   :  { %4423 = vmatprep.subr.bf16.mxu1 %v7743_v46 }
 0x23e   :  { %4383 = vmatpush1.bf16.msra.mxu0 %v7738_v47 }
 0x23f   :  { %4424 = vmatpush1.bf16.msra.mxu1 %v7741_v48  ;;  %4384 = vmatprep.subr.bf16.mxu0 %v7746_v50  ;;  %v7810_v48 = vld [vmem:[#allocation5 + $0xd30] ss:$24 sps:$4 sm:$0xff]  }
 0x240   :  { %4425 = vmatprep.subr.bf16.mxu1 %v7749_v51  ;;  %v7813_v50 = vld [vmem:[#allocation5 + $0x1030] ss:$24 sps:$4 sm:$0xff]  }
 0x242   :  { %4385 = vmatpush1.bf16.msra.mxu0 %v7744_v52 }
 0x243   :  { %4426 = vmatpush1.bf16.msra.mxu1 %v7747_v53  ;;  %4386 = vmatprep.subr.bf16.mxu0 %v7752_v54  ;;  %v7818_v53 = vld [vmem:[#allocation5 + $0xd04] ss:$24 sps:$4 sm:$0xff]  }
 0x244   :  { %4427 = vmatprep.subr.bf16.mxu1 %v7755_v56  ;;  %v7821_v54 = vld [vmem:[#allocation5 + $0x1004] ss:$24 sps:$4 sm:$0xff]  }
 0x246   :  { %4387 = vmatpush1.bf16.msra.mxu0 %v7750_v57 }
 0x247   :  { %4428 = vmatpush1.bf16.msra.mxu1 %v7753_v58  ;;  %4388 = vmatprep.subr.bf16.mxu0 %v7758_v29 }
 0x248   :  { %4429 = vmatprep.subr.bf16.mxu1 %v7761_v59 }
 0x24a   :  { %4389 = vmatpush2.bf16.msra.mxu0 %v7756_v30  ;;  %v7816_v30 = vld [vmem:[#allocation5 + $0xd00] ss:$24 sps:$4 sm:$0xff]  }
 0x24b   :  { %4430 = vmatpush2.bf16.msra.mxu1 %v7759_v60  ;;  %4390 = vmatprep.subr.bf16.mxu0 %v7764_v61  ;;  %v7819_v60 = vld [vmem:[#allocation5 + $0x1000] ss:$24 sps:$4 sm:$0xff]  }
 0x24c   :  { %4431 = vmatprep.subr.bf16.mxu1 %v7767_v3 }
 0x24e   :  { %4391 = vmatpush2.bf16.msra.mxu0 %v7762_v4  ;;  %v7824_v4 = vld [vmem:[#allocation5 + $0xcd4] ss:$24 sps:$4 sm:$0xff]  }
 0x24f   :  { %4432 = vmatpush2.bf16.msra.mxu1 %v7765_v5  ;;  %4392 = vmatprep.subr.bf16.mxu0 %v7770_v7  ;;  %v7827_v5 = vld [vmem:[#allocation5 + $0xfd4] ss:$24 sps:$4 sm:$0xff]  }
 0x250   :  { %4433 = vmatprep.subr.bf16.mxu1 %v7773_v8  ;;  %v7825_v8 = vld [vmem:[#allocation5 + $0xfd0] ss:$24 sps:$4 sm:$0xff]  }
 0x252   :  { %4393 = vmatpush2.bf16.msra.mxu0 %v7768_v9  ;;  %v7833_v9 = vld [vmem:[#allocation5 + $0xfa4] ss:$24 sps:$4 sm:$0xff]  }
 0x253   :  { %4434 = vmatpush2.bf16.msra.mxu1 %v7771_v10  ;;  %4394 = vmatprep.subr.bf16.mxu0 %v7776_v11  ;;  %v7828_v10 = vld [vmem:[#allocation5 + $0xca0] ss:$24 sps:$4 sm:$0xff]  }
 0x254   :  { %4435 = vmatprep.subr.bf16.mxu1 %v7779_v12  ;;  %v7831_v11 = vld [vmem:[#allocation5 + $0xfa0] ss:$24 sps:$4 sm:$0xff]   ;;  %v7836_v12 = vld [vmem:[#allocation5 + $0xc74] ss:$24 sps:$4 sm:$0xff]  }
 0x256   :  { %4395 = vmatpush2.bf16.msra.mxu0 %v7774_v13  ;;  %v7839_v13 = vld [vmem:[#allocation5 + $0xf74] ss:$24 sps:$4 sm:$0xff]  }
 0x257   :  { %4436 = vmatpush2.bf16.msra.mxu1 %v7777_v14  ;;  %4396 = vmatprep.subr.bf16.mxu0 %v7782_v15  ;;  %v7834_v14 = vld [vmem:[#allocation5 + $0xc70] ss:$24 sps:$4 sm:$0xff]  }
 0x258   :  { %4437 = vmatprep.subr.bf16.mxu1 %v7785_v16  ;;  %v7837_v15 = vld [vmem:[#allocation5 + $0xf70] ss:$24 sps:$4 sm:$0xff]   ;;  %v7842_v16 = vld [vmem:[#allocation5 + $0xc44] ss:$24 sps:$4 sm:$0xff]  }
 0x25a   :  { %4397 = vmatpush2.bf16.msra.mxu0 %v7780_v17  ;;  %v7845_v17 = vld [vmem:[#allocation5 + $0xf44] ss:$24 sps:$4 sm:$0xff]  }
 0x25b   :  { %4438 = vmatpush2.bf16.msra.mxu1 %v7783_v18  ;;  %4398 = vmatprep.subr.bf16.mxu0 %v7788_v19  ;;  %v7840_v18 = vld [vmem:[#allocation5 + $0xc40] ss:$24 sps:$4 sm:$0xff]  }
 0x25c   :  { %4439 = vmatprep.subr.bf16.mxu1 %v7791_v20  ;;  %v7843_v19 = vld [vmem:[#allocation5 + $0xf40] ss:$24 sps:$4 sm:$0xff]   ;;  %v7848_v20 = vld [vmem:[#allocation5 + $0xc14] ss:$24 sps:$4 sm:$0xff]  }
 0x25e   :  { %4399 = vmatpush2.bf16.msra.mxu0 %v7786_v21  ;;  %v7851_v21 = vld [vmem:[#allocation5 + $0xf14] ss:$24 sps:$4 sm:$0xff]  }
 0x25f   :  { %4440 = vmatpush2.bf16.msra.mxu1 %v7789_v22  ;;  %4400 = vmatprep.subr.bf16.mxu0 %v7794_v37  ;;  %v7846_v22 = vld [vmem:[#allocation5 + $0xc10] ss:$24 sps:$4 sm:$0xff]  }
 0x260   :  { %4441 = vmatprep.subr.bf16.mxu1 %v7797_v23  ;;  %v7849_v37 = vld [vmem:[#allocation5 + $0xf10] ss:$24 sps:$4 sm:$0xff]   ;;  %v7854_v23 = vld [vmem:[#allocation5 + $0xee4] ss:$24 sps:$4 sm:$0xff]  }
 0x262   :  { %4401 = vmatpush2.bf16.msra.mxu0 %v7792_v24  ;;  %v7857_v24 = vld [vmem:[#allocation5 + $0x11e4] ss:$24 sps:$4 sm:$0xff]  }
 0x263   :  { %4442 = vmatpush2.bf16.msra.mxu1 %v7795_v25  ;;  %4402 = vmatprep.subr.bf16.mxu0 %v7800_v26  ;;  %v7852_v25 = vld [vmem:[#allocation5 + $0xee0] ss:$24 sps:$4 sm:$0xff]  }
 0x264   :  { %4443 = vmatprep.subr.bf16.mxu1 %v7803_v27  ;;  %v7855_v26 = vld [vmem:[#allocation5 + $0x11e0] ss:$24 sps:$4 sm:$0xff]   ;;  %v7860_v27 = vld [vmem:[#allocation5 + $0xeb4] ss:$24 sps:$4 sm:$0xff]  }
 0x266   :  { %4403 = vmatpush2.bf16.msra.mxu0 %v7798_v31  ;;  %v7863_v31 = vld [vmem:[#allocation5 + $0x11b4] ss:$24 sps:$4 sm:$0xff]  }
 0x267   :  { %4444 = vmatpush2.bf16.msra.mxu1 %v7801_v32  ;;  %4454 = vmatprep.subr.bf16.mxu0 %v7806_v33  ;;  %v7858_v32 = vld [vmem:[#allocation5 + $0xeb0] ss:$24 sps:$4 sm:$0xff]  }
 0x268   :  { %4495 = vmatprep.subr.bf16.mxu1 %v7809_v34  ;;  %v7861_v33 = vld [vmem:[#allocation5 + $0x11b0] ss:$24 sps:$4 sm:$0xff]   ;;  %v7866_v34 = vld [vmem:[#allocation5 + $0xe84] ss:$24 sps:$4 sm:$0xff]  }
 0x269   :  { %v2934_v42 = vpop.f32.mrf.mxu0  ;;  %4405 = vmatmul.mubr.bf16.vlgmr.msra.gmra.mxu0 %v8621_v35 }
 0x26a   :  { %v2975_v46 = vpop.f32.mrf.mxu1  ;;  %4446 = vmatmul.mubr.bf16.vlgmr.msra.gmra.mxu1 %v8624_v36  ;;  %v2935_v47 = vadd.f32 %v2934_v42, %v1817_v62  ;;  %4455 = vmatpush1.bf16.msra.mxu0 %v7804_v40  ;;  %v7869_v62 = vld [vmem:[#allocation5 + $0x1184] ss:$24 sps:$4 sm:$0xff]   ;;  %v7864_v40 = vld [vmem:[#allocation5 + $0xe80] ss:$24 sps:$4 sm:$0xff]   ;;  %v7873_v42 = vld [vmem:[#allocation5 + $0x1150] ss:$24 sps:$4 sm:$0xff]  }
 0x26b   :  { %4496 = vmatpush1.bf16.msra.mxu1 %v7807_v55  ;;  %v2936_v51 = vpop.f32.mrf.mxu0  ;;  %4456 = vmatprep.subr.bf16.mxu0 %v7812_v63  ;;  %v7867_v55 = vld [vmem:[#allocation5 + $0x1180] ss:$24 sps:$4 sm:$0xff]   ;;  %v7872_v63 = vld [vmem:[#allocation5 + $0xe54] ss:$24 sps:$4 sm:$0xff]  }
 0x26c   :  { %v2977_v52 = vpop.f32.mrf.mxu1  ;;  %4497 = vmatprep.subr.bf16.mxu1 %v7815_v41  ;;  %v2976_v56 = vadd.f32 %v2975_v46, %v2935_v47  ;;  %v2937_v57 = vadd.f32 %v2936_v51, %v1821_v43  ;;  %4486 = vmatprep.mubr.bf16.mxu0 %v8630_v44  ;;  %v7822_v44 = vld [vmem:[#allocation5 + $0xcd0] ss:$24 sps:$4 sm:$0xff]   ;;  %v7875_v41 = vld [vmem:[#allocation5 + $0x1154] ss:$24 sps:$4 sm:$0xff]   ;;  %v7878_v46 = vld [vmem:[#allocation5 + $0xe24] ss:$24 sps:$4 sm:$0xff]  }
 0x26d   :  { %4527 = vmatprep.mubr.bf16.mxu1 %v8634_v45  ;;  %v2938_v58 = vpop.f32.mrf.mxu0  ;;  %v7830_v45 = vld [vmem:[#allocation5 + $0xca4] ss:$24 sps:$4 sm:$0xff]   ;;  %v7870_v43 = vld [vmem:[#allocation5 + $0xe50] ss:$24 sps:$4 sm:$0xff]   ;;  %v7884_v51 = vld [vmem:[#allocation5 + $0xdf4] ss:$24 sps:$4 sm:$0xff]  }
 0x26e   :  { %v2979_v29 = vpop.f32.mrf.mxu1  ;;  %v2978_v59 = vadd.f32 %v2977_v52, %v2937_v57  ;;  %4457 = vmatpush1.bf16.msra.mxu0 %v7810_v48  ;;  %v7881_v47 = vld [vmem:[#allocation5 + $0x1124] ss:$24 sps:$4 sm:$0xff]   ;;  %v7876_v48 = vld [vmem:[#allocation5 + $0xe20] ss:$24 sps:$4 sm:$0xff]   ;;  %v7887_v52 = vld [vmem:[#allocation5 + $0x10f4] ss:$24 sps:$4 sm:$0xff]  }
 0x26f   :  { %4498 = vmatpush1.bf16.msra.mxu1 %v7813_v50  ;;  %v2939_v61 = vpop.f32.mrf.mxu0  ;;  %4458 = vmatprep.subr.bf16.mxu0 %v7818_v53  ;;  %v7879_v50 = vld [vmem:[#allocation5 + $0x1120] ss:$24 sps:$4 sm:$0xff]   ;;  %v7882_v53 = vld [vmem:[#allocation5 + $0xdf0] ss:$24 sps:$4 sm:$0xff]   ;;  %v7893_v57 = vld [vmem:[#allocation5 + $0x10c4] ss:$24 sps:$4 sm:$0xff]  }
 0x270   :  { %v2980_v3 = vpop.f32.mrf.mxu1  ;;  %4499 = vmatprep.subr.bf16.mxu1 %v7821_v54  ;;  %v3071_v7 = vcombine.low %v2976_v56, %v2978_v59  ;;  %v7885_v54 = vld [vmem:[#allocation5 + $0x10f0] ss:$24 sps:$4 sm:$0xff]   ;;  %v7890_v56 = vld [vmem:[#allocation5 + $0xdc4] ss:$24 sps:$4 sm:$0xff]   ;;  %v7888_v29 = vld [vmem:[#allocation5 + $0xdc0] ss:$24 sps:$4 sm:$0xff]  }
 0x271   :  { %v4552_v58 = vld [vmem:[#allocation8] sm:$0xff] }
 0x272   :  { %3078 = vst [vmem:[#allocation16 + $0x20] sm:$0xff] %v3071_v7  ;;  %4459 = vmatpush1.bf16.msra.mxu0 %v7816_v30  ;;  %v7891_v59 = vld [vmem:[#allocation5 + $0x10c0] ss:$24 sps:$4 sm:$0xff]   ;;  %v7896_v30 = vld [vmem:[#allocation5 + $0xd94] ss:$24 sps:$4 sm:$0xff]   ;;  %v4770_v61 = vcombine.high %v4552_v58, %v4552_v58 }
 0x273   :  { %4500 = vmatpush1.bf16.msra.mxu1 %v7819_v60  ;;  %4460 = vmatprep.subr.bf16.mxu0 %v7824_v4  ;;  %v7899_v60 = vld [vmem:[#allocation5 + $0x1094] ss:$24 sps:$4 sm:$0xff]   ;;  %v7894_v3 = vld [vmem:[#allocation5 + $0xd90] ss:$24 sps:$4 sm:$0xff]  }
 0x274   :  { %4501 = vmatprep.subr.bf16.mxu1 %v7827_v5  ;;  %v7897_v4 = vld [vmem:[#allocation5 + $0x1090] ss:$24 sps:$4 sm:$0xff]  }
 0x275   :  { %v7902_v5 = vld [vmem:[#allocation10 + $0xe4] ss:$16 sps:$4 sm:$0xff]  }
 0x276   :  { %4461 = vmatpush1.bf16.msra.mxu0 %v7822_v44  ;;  %v7905_v7 = vld [vmem:[#allocation10 + $0x2e4] ss:$16 sps:$4 sm:$0xff]   ;;  %v8659_v44 = vrot.slane %v4552_v58, %v8540_v49  ;;  %v7945_v58 = vld [vmem:[#allocation10 + $0x200] ss:$16 sps:$4 sm:$0xff]  }
 0x277   :  { %4502 = vmatpush1.bf16.msra.mxu1 %v7825_v8  ;;  %4462 = vmatprep.subr.bf16.mxu0 %v7830_v45  ;;  %v8662_v8 = vrot.slane %v4770_v61, %v8540_v49  ;;  %v1825_v45 = vrot.slane %v8640_v0, %v8615_v28  ;;  %v7956_v61 = vld [vmem:[#allocation10 + $0x1c4] ss:$16 sps:$4 sm:$0xff]  }
 0x278   :  { %4503 = vmatprep.subr.bf16.mxu1 %v7833_v9  ;;  %v7900_v9 = vld [vmem:[#allocation10 + $0xe0] ss:$16 sps:$4 sm:$0xff]  }
 0x279   :  { %v8674_v49 = vcombine.high %v8662_v8, %v8662_v8 }
 0x27a   :  { %4463 = vmatpush1.bf16.msra.mxu0 %v7828_v10  ;;  %v7903_v10 = vld [vmem:[#allocation10 + $0x2e0] ss:$16 sps:$4 sm:$0xff]  }
 0x27b   :  { %4504 = vmatpush1.bf16.msra.mxu1 %v7831_v11  ;;  %4464 = vmatprep.subr.bf16.mxu0 %v7836_v12  ;;  %v7908_v11 = vld [vmem:[#allocation10 + $0xc4] ss:$16 sps:$4 sm:$0xff]  }
 0x27c   :  { %4505 = vmatprep.subr.bf16.mxu1 %v7839_v13  ;;  %v7911_v12 = vld [vmem:[#allocation10 + $0x2c4] ss:$16 sps:$4 sm:$0xff]   ;;  %v1829_v13 = vrot.slane %v8640_v0, %v8618_v39 }
 0x27e   :  { %4465 = vmatpush1.bf16.msra.mxu0 %v7834_v14  ;;  %v8670_v14 = vcombine.high %v8659_v44, %v8659_v44 }
 0x27f   :  { %4506 = vmatpush1.bf16.msra.mxu1 %v7837_v15  ;;  %4466 = vmatprep.subr.bf16.mxu0 %v7842_v16 }
 0x280   :  { %4507 = vmatprep.subr.bf16.mxu1 %v7845_v17 }
 0x282   :  { %4467 = vmatpush1.bf16.msra.mxu0 %v7840_v18  ;;  %v7906_v18 = vld [vmem:[#allocation10 + $0xc0] ss:$16 sps:$4 sm:$0xff]  }
 0x283   :  { %4508 = vmatpush1.bf16.msra.mxu1 %v7843_v19  ;;  %4468 = vmatprep.subr.bf16.mxu0 %v7848_v20  ;;  %v7909_v19 = vld [vmem:[#allocation10 + $0x2c0] ss:$16 sps:$4 sm:$0xff]  }
 0x284   :  { %4509 = vmatprep.subr.bf16.mxu1 %v7851_v21  ;;  %v7914_v21 = vld [vmem:[#allocation10 + $0xa4] ss:$16 sps:$4 sm:$0xff]  }
 0x286   :  { %4469 = vmatpush1.bf16.msra.mxu0 %v7846_v22  ;;  %v7917_v22 = vld [vmem:[#allocation10 + $0x2a4] ss:$16 sps:$4 sm:$0xff]  }
 0x287   :  { %4510 = vmatpush1.bf16.msra.mxu1 %v7849_v37  ;;  %4470 = vmatprep.subr.bf16.mxu0 %v7854_v23 }
 0x288   :  { %4511 = vmatprep.subr.bf16.mxu1 %v7857_v24 }
 0x28a   :  { %4471 = vmatpush2.bf16.msra.mxu0 %v7852_v25  ;;  %v7912_v25 = vld [vmem:[#allocation10 + $0xa0] ss:$16 sps:$4 sm:$0xff]  }
 0x28b   :  { %4512 = vmatpush2.bf16.msra.mxu1 %v7855_v26  ;;  %4472 = vmatprep.subr.bf16.mxu0 %v7860_v27  ;;  %v7915_v26 = vld [vmem:[#allocation10 + $0x2a0] ss:$16 sps:$4 sm:$0xff]  }
 0x28c   :  { %4513 = vmatprep.subr.bf16.mxu1 %v7863_v31 }
 0x28e   :  { %4473 = vmatpush2.bf16.msra.mxu0 %v7858_v32  ;;  %v7920_v32 = vld [vmem:[#allocation10 + $0x84] ss:$16 sps:$4 sm:$0xff]  }
 0x28f   :  { %4514 = vmatpush2.bf16.msra.mxu1 %v7861_v33  ;;  %4474 = vmatprep.subr.bf16.mxu0 %v7866_v34  ;;  %v7923_v33 = vld [vmem:[#allocation10 + $0x284] ss:$16 sps:$4 sm:$0xff]  }
 0x290   :  { %4515 = vmatprep.subr.bf16.mxu1 %v7869_v62  ;;  %v7918_v62 = vld [vmem:[#allocation10 + $0x80] ss:$16 sps:$4 sm:$0xff]  }
 0x292   :  { %4475 = vmatpush2.bf16.msra.mxu0 %v7864_v40  ;;  %v7921_v40 = vld [vmem:[#allocation10 + $0x280] ss:$16 sps:$4 sm:$0xff]  }
 0x293   :  { %4516 = vmatpush2.bf16.msra.mxu1 %v7867_v55  ;;  %4476 = vmatprep.subr.bf16.mxu0 %v7872_v63  ;;  %v7926_v55 = vld [vmem:[#allocation10 + $0x64] ss:$16 sps:$4 sm:$0xff]  }
 0x294   :  { %4517 = vmatprep.subr.bf16.mxu1 %v7875_v41  ;;  %v7929_v63 = vld [vmem:[#allocation10 + $0x264] ss:$16 sps:$4 sm:$0xff]   ;;  %v7924_v41 = vld [vmem:[#allocation10 + $0x60] ss:$16 sps:$4 sm:$0xff]  }
 0x296   :  { %4477 = vmatpush2.bf16.msra.mxu0 %v7870_v43  ;;  %v7927_v43 = vld [vmem:[#allocation10 + $0x260] ss:$16 sps:$4 sm:$0xff]  }
 0x297   :  { %4518 = vmatpush2.bf16.msra.mxu1 %v7873_v42  ;;  %4478 = vmatprep.subr.bf16.mxu0 %v7878_v46  ;;  %v7932_v42 = vld [vmem:[#allocation10 + $0x44] ss:$16 sps:$4 sm:$0xff]  }
 0x298   :  { %4519 = vmatprep.subr.bf16.mxu1 %v7881_v47  ;;  %v7935_v46 = vld [vmem:[#allocation10 + $0x244] ss:$16 sps:$4 sm:$0xff]   ;;  %v7930_v47 = vld [vmem:[#allocation10 + $0x40] ss:$16 sps:$4 sm:$0xff]  }
 0x29a   :  { %4479 = vmatpush2.bf16.msra.mxu0 %v7876_v48  ;;  %v7933_v48 = vld [vmem:[#allocation10 + $0x240] ss:$16 sps:$4 sm:$0xff]  }
 0x29b   :  { %4520 = vmatpush2.bf16.msra.mxu1 %v7879_v50  ;;  %4480 = vmatprep.subr.bf16.mxu0 %v7884_v51  ;;  %v7938_v50 = vld [vmem:[#allocation10 + $0x24] ss:$16 sps:$4 sm:$0xff]  }
 0x29c   :  { %4521 = vmatprep.subr.bf16.mxu1 %v7887_v52  ;;  %v7941_v51 = vld [vmem:[#allocation10 + $0x224] ss:$16 sps:$4 sm:$0xff]   ;;  %v7936_v52 = vld [vmem:[#allocation10 + $0x20] ss:$16 sps:$4 sm:$0xff]  }
 0x29e   :  { %4481 = vmatpush2.bf16.msra.mxu0 %v7882_v53  ;;  %v7939_v53 = vld [vmem:[#allocation10 + $0x220] ss:$16 sps:$4 sm:$0xff]  }
 0x29f   :  { %4522 = vmatpush2.bf16.msra.mxu1 %v7885_v54  ;;  %4482 = vmatprep.subr.bf16.mxu0 %v7890_v56  ;;  %v7944_v54 = vld [vmem:[#allocation10 + $0x4] ss:$16 sps:$4 sm:$0xff]  }
 0x2a0   :  { %4523 = vmatprep.subr.bf16.mxu1 %v7893_v57  ;;  %v7947_v56 = vld [vmem:[#allocation10 + $0x204] ss:$16 sps:$4 sm:$0xff]   ;;  %v7942_v57 = vld [vmem:[#allocation10] ss:$16 sps:$4 sm:$0xff]  }
 0x2a2   :  { %4483 = vmatpush2.bf16.msra.mxu0 %v7888_v29  ;;  %v7950_v29 = vld [vmem:[#allocation10 + $0x1e4] ss:$16 sps:$4 sm:$0xff]  }
 0x2a3   :  { %4524 = vmatpush2.bf16.msra.mxu1 %v7891_v59  ;;  %4484 = vmatprep.subr.bf16.mxu0 %v7896_v30  ;;  %v7953_v59 = vld [vmem:[#allocation10 + $0x3e4] ss:$16 sps:$4 sm:$0xff]   ;;  %v7948_v30 = vld [vmem:[#allocation10 + $0x1e0] ss:$16 sps:$4 sm:$0xff]  }
 0x2a4   :  { %4525 = vmatprep.subr.bf16.mxu1 %v7899_v60  ;;  %v7951_v60 = vld [vmem:[#allocation10 + $0x3e0] ss:$16 sps:$4 sm:$0xff]  }
 0x2a6   :  { %4485 = vmatpush2.bf16.msra.mxu0 %v7894_v3  ;;  %v7959_v3 = vld [vmem:[#allocation10 + $0x3c4] ss:$16 sps:$4 sm:$0xff]  }
 0x2a7   :  { %4526 = vmatpush2.bf16.msra.mxu1 %v7897_v4  ;;  %5761 = vmatprep.subr.bf16.mxu0 %v7902_v5  ;;  %v7954_v4 = vld [vmem:[#allocation10 + $0x1c0] ss:$16 sps:$4 sm:$0xff]  }
 0x2a8   :  { %5802 = vmatprep.subr.bf16.mxu1 %v7905_v7  ;;  %v7957_v5 = vld [vmem:[#allocation10 + $0x3c0] ss:$16 sps:$4 sm:$0xff]   ;;  %v7962_v7 = vld [vmem:[#allocation10 + $0x1a4] ss:$16 sps:$4 sm:$0xff]  }
 0x2a9   :  { %v3016_v15 = vpop.f32.mrf.mxu0  ;;  %4487 = vmatmul.mubr.bf16.vlgmr.msra.gmra.mxu0 %v8621_v35 }
 0x2aa   :  { %v3057_v16 = vpop.f32.mrf.mxu1  ;;  %4528 = vmatmul.mubr.bf16.vlgmr.msra.gmra.mxu1 %v8624_v36  ;;  %v3017_v17 = vadd.f32 %v3016_v15, %v1825_v45  ;;  %5762 = vmatpush1.bf16.msra.mxu0 %v7900_v9  ;;  %v7965_v45 = vld [vmem:[#allocation10 + $0x3a4] ss:$16 sps:$4 sm:$0xff]   ;;  %v7960_v9 = vld [vmem:[#allocation10 + $0x1a0] ss:$16 sps:$4 sm:$0xff]  }
 0x2ab   :  { %5803 = vmatpush1.bf16.msra.mxu1 %v7903_v10  ;;  %v3018_v0 = vpop.f32.mrf.mxu0  ;;  %5763 = vmatprep.subr.bf16.mxu0 %v7908_v11  ;;  %v7963_v10 = vld [vmem:[#allocation10 + $0x3a0] ss:$16 sps:$4 sm:$0xff]   ;;  %v7968_v11 = vld [vmem:[#allocation10 + $0x184] ss:$16 sps:$4 sm:$0xff]  }
 0x2ac   :  { %v3059_v20 = vpop.f32.mrf.mxu1  ;;  %5804 = vmatprep.subr.bf16.mxu1 %v7911_v12  ;;  %v3058_v37 = vadd.f32 %v3057_v16, %v3017_v17  ;;  %v3019_v23 = vadd.f32 %v3018_v0, %v1829_v13  ;;  %5793 = vmatprep.mubr.bf16.mxu0 %v8670_v14  ;;  %v7971_v12 = vld [vmem:[#allocation10 + $0x384] ss:$16 sps:$4 sm:$0xff]   ;;  %v7966_v13 = vld [vmem:[#allocation10 + $0x180] ss:$16 sps:$4 sm:$0xff]  }
 0x2ad   :  { %5834 = vmatprep.mubr.bf16.mxu1 %v8674_v49  ;;  %v3020_v35 = vpop.f32.mrf.mxu0  ;;  %v7969_v15 = vld [vmem:[#allocation10 + $0x380] ss:$16 sps:$4 sm:$0xff]   ;;  %v7974_v16 = vld [vmem:[#allocation10 + $0x164] ss:$16 sps:$4 sm:$0xff]  }
 0x2ae   :  { %v3061_v24 = vpop.f32.mrf.mxu1  ;;  %v3060_v36 = vadd.f32 %v3059_v20, %v3019_v23  ;;  %5764 = vmatpush1.bf16.msra.mxu0 %v7906_v18  ;;  %v7977_v17 = vld [vmem:[#allocation10 + $0x364] ss:$16 sps:$4 sm:$0xff]   ;;  %v7972_v18 = vld [vmem:[#allocation10 + $0x160] ss:$16 sps:$4 sm:$0xff]  }
 0x2af   :  { %5805 = vmatpush1.bf16.msra.mxu1 %v7909_v19  ;;  %v3021_v27 = vpop.f32.mrf.mxu0  ;;  %5765 = vmatprep.subr.bf16.mxu0 %v7914_v21  ;;  %v7975_v19 = vld [vmem:[#allocation10 + $0x360] ss:$16 sps:$4 sm:$0xff]   ;;  %v7980_v0 = vld [vmem:[#allocation10 + $0x144] ss:$16 sps:$4 sm:$0xff]  }
 0x2b0   :  { %v3062_v31 = vpop.f32.mrf.mxu1  ;;  %5806 = vmatprep.subr.bf16.mxu1 %v7917_v22  ;;  %v3072_v34 = vcombine.low %v3058_v37, %v3060_v36  ;;  %v7983_v20 = vld [vmem:[#allocation10 + $0x344] ss:$16 sps:$4 sm:$0xff]   ;;  %v7978_v21 = vld [vmem:[#allocation10 + $0x140] ss:$16 sps:$4 sm:$0xff]  }
 0x2b1   :  { %v7981_v22 = vld [vmem:[#allocation10 + $0x340] ss:$16 sps:$4 sm:$0xff]   ;;  %v7986_v37 = vld [vmem:[#allocation10 + $0x124] ss:$16 sps:$4 sm:$0xff]  }
 0x2b2   :  { %3079 = vst [vmem:[#allocation16 + $0x28] sm:$0xff] %v3072_v34  ;;  %5766 = vmatpush1.bf16.msra.mxu0 %v7912_v25  ;;  %v7989_v23 = vld [vmem:[#allocation10 + $0x324] ss:$16 sps:$4 sm:$0xff]   ;;  %v7984_v35 = vld [vmem:[#allocation10 + $0x120] ss:$16 sps:$4 sm:$0xff]  }
 0x2b3   :  { %5807 = vmatpush1.bf16.msra.mxu1 %v7915_v26  ;;  %5767 = vmatprep.subr.bf16.mxu0 %v7920_v32  ;;  %v7987_v24 = vld [vmem:[#allocation10 + $0x320] ss:$16 sps:$4 sm:$0xff]   ;;  %v7992_v36 = vld [vmem:[#allocation10 + $0x104] ss:$16 sps:$4 sm:$0xff]  }
 0x2b4   :  { %5808 = vmatprep.subr.bf16.mxu1 %v7923_v33  ;;  %v7995_v25 = vld [vmem:[#allocation10 + $0x304] ss:$16 sps:$4 sm:$0xff]   ;;  %v7990_v26 = vld [vmem:[#allocation10 + $0x100] ss:$16 sps:$4 sm:$0xff]   ;;  %v8002_v33 = vld [vmem:[#allocation10 + $0xec] ss:$16 sps:$4 sm:$0xff]  }
 0x2b5   :  { %v7993_v27 = vld [vmem:[#allocation10 + $0x300] ss:$16 sps:$4 sm:$0xff]   ;;  %v7999_v32 = vld [vmem:[#allocation10 + $0x4e4] ss:$16 sps:$4 sm:$0xff]  }
 0x2b6   :  { %5768 = vmatpush1.bf16.msra.mxu0 %v7918_v62  ;;  %v8680_v31 = vld [vmem:[#allocation7 + $0xc] sm:$0x3f]  ;;  %v8682_v34 = vld.sshfl [vmem:[#allocation8 + $0x8] sm:$0x33 pattern:$0x76325410] }
 0x2b7   :  { %5809 = vmatpush1.bf16.msra.mxu1 %v7921_v40  ;;  %5769 = vmatprep.subr.bf16.mxu0 %v7926_v55  ;;  %v3281_v62 = vrot.slane %v8680_v31, %v8587_v38  ;;  %v7997_v40 = vld [vmem:[#allocation10 + $0x4e0] ss:$16 sps:$4 sm:$0xff]   ;;  %v8000_v55 = vld [vmem:[#allocation10 + $0xe8] ss:$16 sps:$4 sm:$0xff]  }
 0x2b8   :  { %5810 = vmatprep.subr.bf16.mxu1 %v7929_v63  ;;  %v8005_v63 = vld [vmem:[#allocation10 + $0x4c4] ss:$16 sps:$4 sm:$0xff]  }
 0x2ba   :  { %5770 = vmatpush1.bf16.msra.mxu0 %v7924_v41  ;;  %v8008_v41 = vld [vmem:[#allocation10 + $0xcc] ss:$16 sps:$4 sm:$0xff]  }
 0x2bb   :  { %5811 = vmatpush1.bf16.msra.mxu1 %v7927_v43  ;;  %5771 = vmatprep.subr.bf16.mxu0 %v7932_v42  ;;  %v3285_v43 = vrot.slane %v8680_v31, %v8590_v2  ;;  %v8690_v42 = vcombine.high %v8682_v34, %v8682_v34 }
 0x2bc   :  { %5812 = vmatprep.subr.bf16.mxu1 %v7935_v46 }
 0x2be   :  { %5772 = vmatpush1.bf16.msra.mxu0 %v7930_v47 }
 0x2bf   :  { %5813 = vmatpush1.bf16.msra.mxu1 %v7933_v48  ;;  %5773 = vmatprep.subr.bf16.mxu0 %v7938_v50  ;;  %v8003_v50 = vld [vmem:[#allocation10 + $0x4c0] ss:$16 sps:$4 sm:$0xff]  }
 0x2c0   :  { %5814 = vmatprep.subr.bf16.mxu1 %v7941_v51  ;;  %v8006_v51 = vld [vmem:[#allocation10 + $0xc8] ss:$16 sps:$4 sm:$0xff]  }
 0x2c2   :  { %5774 = vmatpush1.bf16.msra.mxu0 %v7936_v52 }
 0x2c3   :  { %5815 = vmatpush1.bf16.msra.mxu1 %v7939_v53  ;;  %5775 = vmatprep.subr.bf16.mxu0 %v7944_v54  ;;  %v8011_v54 = vld [vmem:[#allocation10 + $0x4a4] ss:$16 sps:$4 sm:$0xff]  }
 0x2c4   :  { %5816 = vmatprep.subr.bf16.mxu1 %v7947_v56  ;;  %v8014_v56 = vld [vmem:[#allocation10 + $0xac] ss:$16 sps:$4 sm:$0xff]  }
 0x2c6   :  { %5776 = vmatpush1.bf16.msra.mxu0 %v7942_v57 }
 0x2c7   :  { %5817 = vmatpush1.bf16.msra.mxu1 %v7945_v58  ;;  %5777 = vmatprep.subr.bf16.mxu0 %v7950_v29 }
 0x2c8   :  { %5818 = vmatprep.subr.bf16.mxu1 %v7953_v59 }
 0x2ca   :  { %5778 = vmatpush2.bf16.msra.mxu0 %v7948_v30 }
 0x2cb   :  { %5819 = vmatpush2.bf16.msra.mxu1 %v7951_v60  ;;  %5779 = vmatprep.subr.bf16.mxu0 %v7956_v61  ;;  %v8009_v60 = vld [vmem:[#allocation10 + $0x4a0] ss:$16 sps:$4 sm:$0xff]   ;;  %v8012_v61 = vld [vmem:[#allocation10 + $0xa8] ss:$16 sps:$4 sm:$0xff]  }
 0x2cc   :  { %5820 = vmatprep.subr.bf16.mxu1 %v7959_v3 }
 0x2ce   :  { %5780 = vmatpush2.bf16.msra.mxu0 %v7954_v4 }
 0x2cf   :  { %5821 = vmatpush2.bf16.msra.mxu1 %v7957_v5  ;;  %5781 = vmatprep.subr.bf16.mxu0 %v7962_v7  ;;  %v8017_v5 = vld [vmem:[#allocation10 + $0x484] ss:$16 sps:$4 sm:$0xff]   ;;  %v8020_v7 = vld [vmem:[#allocation10 + $0x8c] ss:$16 sps:$4 sm:$0xff]  }
 0x2d0   :  { %5822 = vmatprep.subr.bf16.mxu1 %v7965_v45 }
 0x2d2   :  { %5782 = vmatpush2.bf16.msra.mxu0 %v7960_v9  ;;  %v8015_v9 = vld [vmem:[#allocation10 + $0x480] ss:$16 sps:$4 sm:$0xff]  }
 0x2d3   :  { %5823 = vmatpush2.bf16.msra.mxu1 %v7963_v10  ;;  %5783 = vmatprep.subr.bf16.mxu0 %v7968_v11  ;;  %v8018_v10 = vld [vmem:[#allocation10 + $0x88] ss:$16 sps:$4 sm:$0xff]   ;;  %v8026_v11 = vld [vmem:[#allocation10 + $0x6c] ss:$16 sps:$4 sm:$0xff]  }
 0x2d4   :  { %5824 = vmatprep.subr.bf16.mxu1 %v7971_v12  ;;  %v8021_v12 = vld [vmem:[#allocation10 + $0x460] ss:$16 sps:$4 sm:$0xff]  }
 0x2d6   :  { %5784 = vmatpush2.bf16.msra.mxu0 %v7966_v13  ;;  %v8024_v13 = vld [vmem:[#allocation10 + $0x68] ss:$16 sps:$4 sm:$0xff]  }
 0x2d7   :  { %5825 = vmatpush2.bf16.msra.mxu1 %v7969_v15  ;;  %5785 = vmatprep.subr.bf16.mxu0 %v7974_v16  ;;  %v8029_v15 = vld [vmem:[#allocation10 + $0x444] ss:$16 sps:$4 sm:$0xff]   ;;  %v8032_v16 = vld [vmem:[#allocation10 + $0x4c] ss:$16 sps:$4 sm:$0xff]  }
 0x2d8   :  { %5826 = vmatprep.subr.bf16.mxu1 %v7977_v17  ;;  %v8027_v17 = vld [vmem:[#allocation10 + $0x440] ss:$16 sps:$4 sm:$0xff]  }
 0x2da   :  { %5786 = vmatpush2.bf16.msra.mxu0 %v7972_v18  ;;  %v8030_v18 = vld [vmem:[#allocation10 + $0x48] ss:$16 sps:$4 sm:$0xff]  }
 0x2db   :  { %5827 = vmatpush2.bf16.msra.mxu1 %v7975_v19  ;;  %5787 = vmatprep.subr.bf16.mxu0 %v7980_v0  ;;  %v8035_v19 = vld [vmem:[#allocation10 + $0x424] ss:$16 sps:$4 sm:$0xff]   ;;  %v8038_v0 = vld [vmem:[#allocation10 + $0x2c] ss:$16 sps:$4 sm:$0xff]  }
 0x2dc   :  { %5828 = vmatprep.subr.bf16.mxu1 %v7983_v20  ;;  %v8033_v20 = vld [vmem:[#allocation10 + $0x420] ss:$16 sps:$4 sm:$0xff]  }
 0x2de   :  { %5788 = vmatpush2.bf16.msra.mxu0 %v7978_v21  ;;  %v8036_v21 = vld [vmem:[#allocation10 + $0x28] ss:$16 sps:$4 sm:$0xff]  }
 0x2df   :  { %5829 = vmatpush2.bf16.msra.mxu1 %v7981_v22  ;;  %5789 = vmatprep.subr.bf16.mxu0 %v7986_v37  ;;  %v8041_v22 = vld [vmem:[#allocation10 + $0x404] ss:$16 sps:$4 sm:$0xff]   ;;  %v8044_v37 = vld [vmem:[#allocation10 + $0xc] ss:$16 sps:$4 sm:$0xff]  }
 0x2e0   :  { %5830 = vmatprep.subr.bf16.mxu1 %v7989_v23  ;;  %v8039_v23 = vld [vmem:[#allocation10 + $0x400] ss:$16 sps:$4 sm:$0xff]  }
 0x2e2   :  { %5790 = vmatpush2.bf16.msra.mxu0 %v7984_v35  ;;  %v8042_v35 = vld [vmem:[#allocation10 + $0x8] ss:$16 sps:$4 sm:$0xff]  }
 0x2e3   :  { %5831 = vmatpush2.bf16.msra.mxu1 %v7987_v24  ;;  %5791 = vmatprep.subr.bf16.mxu0 %v7992_v36  ;;  %v8047_v24 = vld [vmem:[#allocation10 + $0x5e4] ss:$16 sps:$4 sm:$0xff]   ;;  %v8050_v36 = vld [vmem:[#allocation10 + $0x1ec] ss:$16 sps:$4 sm:$0xff]  }
 0x2e4   :  { %5832 = vmatprep.subr.bf16.mxu1 %v7995_v25  ;;  %v8045_v25 = vld [vmem:[#allocation10 + $0x5e0] ss:$16 sps:$4 sm:$0xff]  }
 0x2e6   :  { %5792 = vmatpush2.bf16.msra.mxu0 %v7990_v26  ;;  %v8048_v26 = vld [vmem:[#allocation10 + $0x1e8] ss:$16 sps:$4 sm:$0xff]  }
 0x2e7   :  { %5833 = vmatpush2.bf16.msra.mxu1 %v7993_v27  ;;  %5843 = vmatprep.subr.bf16.mxu0 %v7999_v32  ;;  %v8053_v27 = vld [vmem:[#allocation10 + $0x5c4] ss:$16 sps:$4 sm:$0xff]   ;;  %v8056_v32 = vld [vmem:[#allocation10 + $0x1cc] ss:$16 sps:$4 sm:$0xff]  }
 0x2e8   :  { %5884 = vmatprep.subr.bf16.mxu1 %v8002_v33  ;;  %v8051_v33 = vld [vmem:[#allocation10 + $0x5c0] ss:$16 sps:$4 sm:$0xff]  }
 0x2e9   :  { %v4324_v46 = vpop.f32.mrf.mxu0  ;;  %5794 = vmatmul.mubr.bf16.vlgmr.msra.gmra.mxu0 %v8659_v44 }
 0x2ea   :  { %v4365_v47 = vpop.f32.mrf.mxu1  ;;  %5835 = vmatmul.mubr.bf16.vlgmr.msra.gmra.mxu1 %v8662_v8  ;;  %v4325_v48 = vadd.f32 %v4324_v46, %v3281_v62  ;;  %5844 = vmatpush1.bf16.msra.mxu0 %v7997_v40  ;;  %v8054_v62 = vld [vmem:[#allocation10 + $0x1c8] ss:$16 sps:$4 sm:$0xff]   ;;  %v8059_v40 = vld [vmem:[#allocation10 + $0x5a4] ss:$16 sps:$4 sm:$0xff]   ;;  %v8068_v46 = vld [vmem:[#allocation10 + $0x18c] ss:$16 sps:$4 sm:$0xff]  }
 0x2eb   :  { %5885 = vmatpush1.bf16.msra.mxu1 %v8000_v55  ;;  %v4326_v52 = vpop.f32.mrf.mxu0  ;;  %5845 = vmatprep.subr.bf16.mxu0 %v8005_v63  ;;  %v8062_v55 = vld [vmem:[#allocation10 + $0x1ac] ss:$16 sps:$4 sm:$0xff]   ;;  %v8057_v63 = vld [vmem:[#allocation10 + $0x5a0] ss:$16 sps:$4 sm:$0xff]  }
 0x2ec   :  { %v4367_v53 = vpop.f32.mrf.mxu1  ;;  %5886 = vmatprep.subr.bf16.mxu1 %v8008_v41  ;;  %v4366_v57 = vadd.f32 %v4365_v47, %v4325_v48  ;;  %v4327_v58 = vadd.f32 %v4326_v52, %v3285_v43  ;;  %5875 = vmatprep.mubr.bf16.mxu0 %v8690_v42  ;;  %v8060_v41 = vld [vmem:[#allocation10 + $0x1a8] ss:$16 sps:$4 sm:$0xff]   ;;  %v8065_v43 = vld [vmem:[#allocation10 + $0x584] ss:$16 sps:$4 sm:$0xff]   ;;  %v8063_v47 = vld [vmem:[#allocation10 + $0x580] ss:$16 sps:$4 sm:$0xff]  }
 0x2ed   :  { %5916 = vmatprep.mubr.bf16.mxu1 %v8670_v14  ;;  %v4328_v29 = vpop.f32.mrf.mxu0  ;;  %v8023_v14 = vld [vmem:[#allocation10 + $0x464] ss:$16 sps:$4 sm:$0xff]   ;;  %v8066_v48 = vld [vmem:[#allocation10 + $0x188] ss:$16 sps:$4 sm:$0xff]   ;;  %v8069_v52 = vld [vmem:[#allocation10 + $0x560] ss:$16 sps:$4 sm:$0xff]  }
 0x2ee   :  { %v4369_v59 = vpop.f32.mrf.mxu1  ;;  %v4368_v30 = vadd.f32 %v4367_v53, %v4327_v58  ;;  %5846 = vmatpush1.bf16.msra.mxu0 %v8003_v50  ;;  %v8071_v50 = vld [vmem:[#allocation10 + $0x564] ss:$16 sps:$4 sm:$0xff]   ;;  %v8072_v53 = vld [vmem:[#allocation10 + $0x168] ss:$16 sps:$4 sm:$0xff]  }
 0x2ef   :  { %5887 = vmatpush1.bf16.msra.mxu1 %v8006_v51  ;;  %v4329_v3 = vpop.f32.mrf.mxu0  ;;  %5847 = vmatprep.subr.bf16.mxu0 %v8011_v54  ;;  %v8074_v51 = vld [vmem:[#allocation10 + $0x16c] ss:$16 sps:$4 sm:$0xff]   ;;  %v8077_v54 = vld [vmem:[#allocation10 + $0x544] ss:$16 sps:$4 sm:$0xff]   ;;  %v8078_v58 = vld [vmem:[#allocation10 + $0x148] ss:$16 sps:$4 sm:$0xff]  }
 0x2f0   :  { %v4370_v4 = vpop.f32.mrf.mxu1  ;;  %5888 = vmatprep.subr.bf16.mxu1 %v8014_v56  ;;  %v4542_v45 = vcombine.low %v4366_v57, %v4368_v30  ;;  %v8080_v56 = vld [vmem:[#allocation10 + $0x14c] ss:$16 sps:$4 sm:$0xff]   ;;  %v8075_v57 = vld [vmem:[#allocation10 + $0x540] ss:$16 sps:$4 sm:$0xff]   ;;  %v8083_v29 = vld [vmem:[#allocation10 + $0x524] ss:$16 sps:$4 sm:$0xff]  }
 0x2f1   :  { %v8086_v59 = vld [vmem:[#allocation10 + $0x12c] ss:$16 sps:$4 sm:$0xff]   ;;  %v8081_v30 = vld [vmem:[#allocation10 + $0x520] ss:$16 sps:$4 sm:$0xff]  }
 0x2f2   :  { %4549 = vst [vmem:[#allocation16 + $0x30] sm:$0xff] %v4542_v45  ;;  %5848 = vmatpush1.bf16.msra.mxu0 %v8009_v60  ;;  %v8084_v60 = vld [vmem:[#allocation10 + $0x128] ss:$16 sps:$4 sm:$0xff]   ;;  %v8092_v3 = vld [vmem:[#allocation10 + $0x10c] ss:$16 sps:$4 sm:$0xff]  }
 0x2f3   :  { %5889 = vmatpush1.bf16.msra.mxu1 %v8012_v61  ;;  %5849 = vmatprep.subr.bf16.mxu0 %v8017_v5  ;;  %v8089_v61 = vld [vmem:[#allocation10 + $0x504] ss:$16 sps:$4 sm:$0xff]   ;;  %v8087_v4 = vld [vmem:[#allocation10 + $0x500] ss:$16 sps:$4 sm:$0xff]   ;;  %v8090_v5 = vld [vmem:[#allocation10 + $0x108] ss:$16 sps:$4 sm:$0xff]  }
 0x2f4   :  { %5890 = vmatprep.subr.bf16.mxu1 %v8020_v7  ;;  %v8095_v7 = vld [vmem:[#allocation10 + $0x2ec] ss:$16 sps:$4 sm:$0xff]  }
 0x2f5   :  { %v8098_v45 = vld [vmem:[#allocation10 + $0x4ec] ss:$16 sps:$4 sm:$0xff]  }
 0x2f6   :  { %5850 = vmatpush1.bf16.msra.mxu0 %v8015_v9  ;;  %v3289_v9 = vrot.slane %v8680_v31, %v8601_v1 }
 0x2f7   :  { %5891 = vmatpush1.bf16.msra.mxu1 %v8018_v10  ;;  %5851 = vmatprep.subr.bf16.mxu0 %v8023_v14  ;;  %v8093_v10 = vld [vmem:[#allocation10 + $0x2e8] ss:$16 sps:$4 sm:$0xff]  }
 0x2f8   :  { %5892 = vmatprep.subr.bf16.mxu1 %v8026_v11  ;;  %v8096_v14 = vld [vmem:[#allocation10 + $0x4e8] ss:$16 sps:$4 sm:$0xff]   ;;  %v8101_v11 = vld [vmem:[#allocation10 + $0x2cc] ss:$16 sps:$4 sm:$0xff]  }
 0x2fa   :  { %5852 = vmatpush1.bf16.msra.mxu0 %v8021_v12  ;;  %v8104_v12 = vld [vmem:[#allocation10 + $0x4cc] ss:$16 sps:$4 sm:$0xff]  }
 0x2fb   :  { %5893 = vmatpush1.bf16.msra.mxu1 %v8024_v13  ;;  %5853 = vmatprep.subr.bf16.mxu0 %v8029_v15  ;;  %v3293_v13 = vrot.slane %v8680_v31, %v8604_v6 }
 0x2fc   :  { %5894 = vmatprep.subr.bf16.mxu1 %v8032_v16 }
 0x2fe   :  { %5854 = vmatpush1.bf16.msra.mxu0 %v8027_v17 }
 0x2ff   :  { %5895 = vmatpush1.bf16.msra.mxu1 %v8030_v18  ;;  %5855 = vmatprep.subr.bf16.mxu0 %v8035_v19  ;;  %v8099_v18 = vld [vmem:[#allocation10 + $0x2c8] ss:$16 sps:$4 sm:$0xff]  }
 0x300   :  { %5896 = vmatprep.subr.bf16.mxu1 %v8038_v0  ;;  %v8102_v19 = vld [vmem:[#allocation10 + $0x4c8] ss:$16 sps:$4 sm:$0xff]  }
 0x302   :  { %5856 = vmatpush1.bf16.msra.mxu0 %v8033_v20 }
 0x303   :  { %5897 = vmatpush1.bf16.msra.mxu1 %v8036_v21  ;;  %5857 = vmatprep.subr.bf16.mxu0 %v8041_v22  ;;  %v8107_v21 = vld [vmem:[#allocation10 + $0x2ac] ss:$16 sps:$4 sm:$0xff]  }
 0x304   :  { %5898 = vmatprep.subr.bf16.mxu1 %v8044_v37  ;;  %v8110_v22 = vld [vmem:[#allocation10 + $0x4ac] ss:$16 sps:$4 sm:$0xff]  }
 0x306   :  { %5858 = vmatpush1.bf16.msra.mxu0 %v8039_v23 }
 0x307   :  { %5899 = vmatpush1.bf16.msra.mxu1 %v8042_v35  ;;  %5859 = vmatprep.subr.bf16.mxu0 %v8047_v24 }
 0x308   :  { %5900 = vmatprep.subr.bf16.mxu1 %v8050_v36  ;;  %v8105_v36 = vld [vmem:[#allocation10 + $0x2a8] ss:$16 sps:$4 sm:$0xff]  }
 0x30a   :  { %5860 = vmatpush2.bf16.msra.mxu0 %v8045_v25  ;;  %v8108_v25 = vld [vmem:[#allocation10 + $0x4a8] ss:$16 sps:$4 sm:$0xff]  }
 0x30b   :  { %5901 = vmatpush2.bf16.msra.mxu1 %v8048_v26  ;;  %5861 = vmatprep.subr.bf16.mxu0 %v8053_v27 }
 0x30c   :  { %5902 = vmatprep.subr.bf16.mxu1 %v8056_v32  ;;  %v8113_v32 = vld [vmem:[#allocation10 + $0x28c] ss:$16 sps:$4 sm:$0xff]  }
 0x30e   :  { %5862 = vmatpush2.bf16.msra.mxu0 %v8051_v33  ;;  %v8116_v33 = vld [vmem:[#allocation10 + $0x48c] ss:$16 sps:$4 sm:$0xff]  }
 0x30f   :  { %5903 = vmatpush2.bf16.msra.mxu1 %v8054_v62  ;;  %5863 = vmatprep.subr.bf16.mxu0 %v8059_v40  ;;  %v8114_v40 = vld [vmem:[#allocation10 + $0x488] ss:$16 sps:$4 sm:$0xff]  }
 0x310   :  { %5904 = vmatprep.subr.bf16.mxu1 %v8062_v55  ;;  %v8122_v55 = vld [vmem:[#allocation10 + $0x46c] ss:$16 sps:$4 sm:$0xff]  }
 0x312   :  { %5864 = vmatpush2.bf16.msra.mxu0 %v8057_v63  ;;  %v8117_v63 = vld [vmem:[#allocation10 + $0x268] ss:$16 sps:$4 sm:$0xff]  }
 0x313   :  { %5905 = vmatpush2.bf16.msra.mxu1 %v8060_v41  ;;  %5865 = vmatprep.subr.bf16.mxu0 %v8065_v43  ;;  %v8120_v41 = vld [vmem:[#allocation10 + $0x468] ss:$16 sps:$4 sm:$0xff]   ;;  %v8125_v43 = vld [vmem:[#allocation10 + $0x24c] ss:$16 sps:$4 sm:$0xff]  }
 0x314   :  { %5906 = vmatprep.subr.bf16.mxu1 %v8068_v46  ;;  %v8128_v46 = vld [vmem:[#allocation10 + $0x44c] ss:$16 sps:$4 sm:$0xff]  }
 0x316   :  { %5866 = vmatpush2.bf16.msra.mxu0 %v8063_v47  ;;  %v8123_v47 = vld [vmem:[#allocation10 + $0x248] ss:$16 sps:$4 sm:$0xff]  }
 0x317   :  { %5907 = vmatpush2.bf16.msra.mxu1 %v8066_v48  ;;  %5867 = vmatprep.subr.bf16.mxu0 %v8071_v50  ;;  %v8126_v48 = vld [vmem:[#allocation10 + $0x448] ss:$16 sps:$4 sm:$0xff]   ;;  %v8131_v50 = vld [vmem:[#allocation10 + $0x22c] ss:$16 sps:$4 sm:$0xff]  }
 0x318   :  { %5908 = vmatprep.subr.bf16.mxu1 %v8074_v51  ;;  %v8134_v51 = vld [vmem:[#allocation10 + $0x42c] ss:$16 sps:$4 sm:$0xff]  }
 0x31a   :  { %5868 = vmatpush2.bf16.msra.mxu0 %v8069_v52  ;;  %v8129_v52 = vld [vmem:[#allocation10 + $0x228] ss:$16 sps:$4 sm:$0xff]  }
 0x31b   :  { %5909 = vmatpush2.bf16.msra.mxu1 %v8072_v53  ;;  %5869 = vmatprep.subr.bf16.mxu0 %v8077_v54  ;;  %v8132_v53 = vld [vmem:[#allocation10 + $0x428] ss:$16 sps:$4 sm:$0xff]   ;;  %v8137_v54 = vld [vmem:[#allocation10 + $0x20c] ss:$16 sps:$4 sm:$0xff]  }
 0x31c   :  { %5910 = vmatprep.subr.bf16.mxu1 %v8080_v56  ;;  %v8140_v56 = vld [vmem:[#allocation10 + $0x40c] ss:$16 sps:$4 sm:$0xff]  }
 0x31e   :  { %5870 = vmatpush2.bf16.msra.mxu0 %v8075_v57  ;;  %v8135_v57 = vld [vmem:[#allocation10 + $0x208] ss:$16 sps:$4 sm:$0xff]  }
 0x31f   :  { %5911 = vmatpush2.bf16.msra.mxu1 %v8078_v58  ;;  %5871 = vmatprep.subr.bf16.mxu0 %v8083_v29  ;;  %v8138_v58 = vld [vmem:[#allocation10 + $0x408] ss:$16 sps:$4 sm:$0xff]   ;;  %v8143_v29 = vld [vmem:[#allocation10 + $0x3ec] ss:$16 sps:$4 sm:$0xff]  }
 0x320   :  { %5912 = vmatprep.subr.bf16.mxu1 %v8086_v59  ;;  %v8146_v59 = vld [vmem:[#allocation10 + $0x5ec] ss:$16 sps:$4 sm:$0xff]  }
 0x322   :  { %5872 = vmatpush2.bf16.msra.mxu0 %v8081_v30  ;;  %v8141_v30 = vld [vmem:[#allocation10 + $0x3e8] ss:$16 sps:$4 sm:$0xff]  }
 0x323   :  { %5913 = vmatpush2.bf16.msra.mxu1 %v8084_v60  ;;  %5873 = vmatprep.subr.bf16.mxu0 %v8089_v61  ;;  %v8144_v60 = vld [vmem:[#allocation10 + $0x5e8] ss:$16 sps:$4 sm:$0xff]   ;;  %v8149_v61 = vld [vmem:[#allocation10 + $0x3cc] ss:$16 sps:$4 sm:$0xff]  }
 0x324   :  { %5914 = vmatprep.subr.bf16.mxu1 %v8092_v3  ;;  %v8152_v3 = vld [vmem:[#allocation10 + $0x5cc] ss:$16 sps:$4 sm:$0xff]  }
 0x326   :  { %5874 = vmatpush2.bf16.msra.mxu0 %v8087_v4  ;;  %v8147_v4 = vld [vmem:[#allocation10 + $0x3c8] ss:$16 sps:$4 sm:$0xff]  }
 0x327   :  { %5915 = vmatpush2.bf16.msra.mxu1 %v8090_v5  ;;  %5925 = vmatprep.subr.bf16.mxu0 %v8095_v7  ;;  %v8150_v5 = vld [vmem:[#allocation10 + $0x5c8] ss:$16 sps:$4 sm:$0xff]   ;;  %v8155_v7 = vld [vmem:[#allocation10 + $0x3ac] ss:$16 sps:$4 sm:$0xff]  }
 0x328   :  { %5966 = vmatprep.subr.bf16.mxu1 %v8098_v45  ;;  %v8158_v45 = vld [vmem:[#allocation10 + $0x5ac] ss:$16 sps:$4 sm:$0xff]  }
 0x329   :  { %v4406_v15 = vpop.f32.mrf.mxu0  ;;  %5876 = vmatmul.mubr.bf16.vlgmr.msra.gmra.mxu0 %v8682_v34 }
 0x32a   :  { %v4447_v16 = vpop.f32.mrf.mxu1  ;;  %5917 = vmatmul.mubr.bf16.vlgmr.msra.gmra.mxu1 %v8659_v44  ;;  %v4407_v17 = vadd.f32 %v4406_v15, %v3289_v9  ;;  %5926 = vmatpush1.bf16.msra.mxu0 %v8093_v10  ;;  %v8153_v9 = vld [vmem:[#allocation10 + $0x3a8] ss:$16 sps:$4 sm:$0xff]   ;;  %v8167_v15 = vld [vmem:[#allocation10 + $0x36c] ss:$16 sps:$4 sm:$0xff]  }
 0x32b   :  { %5967 = vmatpush1.bf16.msra.mxu1 %v8096_v14  ;;  %v4408_v0 = vpop.f32.mrf.mxu0  ;;  %5927 = vmatprep.subr.bf16.mxu0 %v8101_v11  ;;  %v8156_v10 = vld [vmem:[#allocation10 + $0x5a8] ss:$16 sps:$4 sm:$0xff]   ;;  %v8161_v14 = vld [vmem:[#allocation10 + $0x38c] ss:$16 sps:$4 sm:$0xff]  }
 0x32c   :  { %v4449_v20 = vpop.f32.mrf.mxu1  ;;  %5968 = vmatprep.subr.bf16.mxu1 %v8104_v12  ;;  %v4448_v37 = vadd.f32 %v4447_v16, %v4407_v17  ;;  %v4409_v23 = vadd.f32 %v4408_v0, %v3293_v13  ;;  %5957 = vmatprep.mubr.bf16.mxu0 %v8674_v49  ;;  %v8111_v49 = vld [vmem:[#allocation10 + $0x288] ss:$16 sps:$4 sm:$0xff]   ;;  %v8164_v11 = vld [vmem:[#allocation10 + $0x58c] ss:$16 sps:$4 sm:$0xff]  }
 0x32d   :  { %5998 = vmatprep.mubr.bf16.mxu1 %v8690_v42  ;;  %v4410_v35 = vpop.f32.mrf.mxu0  ;;  %v8119_v42 = vld [vmem:[#allocation10 + $0x26c] ss:$16 sps:$4 sm:$0xff]   ;;  %v8159_v12 = vld [vmem:[#allocation10 + $0x388] ss:$16 sps:$4 sm:$0xff]  }
 0x32e   :  { %v4451_v24 = vpop.f32.mrf.mxu1  ;;  %v4450_v44 = vadd.f32 %v4449_v20, %v4409_v23  ;;  %5928 = vmatpush1.bf16.msra.mxu0 %v8099_v18  ;;  %v8162_v13 = vld [vmem:[#allocation10 + $0x588] ss:$16 sps:$4 sm:$0xff]   ;;  %v8170_v16 = vld [vmem:[#allocation10 + $0x56c] ss:$16 sps:$4 sm:$0xff]  }
 0x32f   :  { %5969 = vmatpush1.bf16.msra.mxu1 %v8102_v19  ;;  %v4411_v26 = vpop.f32.mrf.mxu0  ;;  %5929 = vmatprep.subr.bf16.mxu0 %v8107_v21  ;;  %v8165_v17 = vld [vmem:[#allocation10 + $0x368] ss:$16 sps:$4 sm:$0xff]   ;;  %v8173_v19 = vld [vmem:[#allocation10 + $0x34c] ss:$16 sps:$4 sm:$0xff]  }
 0x330   :  { %v4452_v27 = vpop.f32.mrf.mxu1  ;;  %5970 = vmatprep.subr.bf16.mxu1 %v8110_v22  ;;  %v4543_v62 = vcombine.low %v4448_v37, %v4450_v44  ;;  %v8168_v18 = vld [vmem:[#allocation10 + $0x568] ss:$16 sps:$4 sm:$0xff]   ;;  %v8176_v0 = vld [vmem:[#allocation10 + $0x54c] ss:$16 sps:$4 sm:$0xff]   ;;  %v3297_v26 = vrot.slane %v8680_v31, %v8615_v28 }
 0x331   :  { %v8171_v20 = vld [vmem:[#allocation10 + $0x348] ss:$16 sps:$4 sm:$0xff]   ;;  %v8179_v22 = vld [vmem:[#allocation10 + $0x32c] ss:$16 sps:$4 sm:$0xff]   ;;  %v3301_v27 = vrot.slane %v8680_v31, %v8618_v39 }
 0x332   :  { %4550 = vst [vmem:[#allocation16 + $0x38] sm:$0xff] %v4543_v62  ;;  %5930 = vmatpush1.bf16.msra.mxu0 %v8105_v36  ;;  %v8174_v21 = vld [vmem:[#allocation10 + $0x548] ss:$16 sps:$4 sm:$0xff]   ;;  %v8182_v37 = vld [vmem:[#allocation10 + $0x52c] ss:$16 sps:$4 sm:$0xff]  }
 0x333   :  { %5971 = vmatpush1.bf16.msra.mxu1 %v8108_v25  ;;  %5931 = vmatprep.subr.bf16.mxu0 %v8113_v32  ;;  %v8177_v23 = vld [vmem:[#allocation10 + $0x328] ss:$16 sps:$4 sm:$0xff]   ;;  %v8185_v24 = vld [vmem:[#allocation10 + $0x30c] ss:$16 sps:$4 sm:$0xff]  }
 0x334   :  { %5972 = vmatprep.subr.bf16.mxu1 %v8116_v33  ;;  %v8180_v35 = vld [vmem:[#allocation10 + $0x528] ss:$16 sps:$4 sm:$0xff]   ;;  %v8188_v44 = vld [vmem:[#allocation10 + $0x50c] ss:$16 sps:$4 sm:$0xff]  }
 0x335   :  { %v8183_v36 = vld [vmem:[#allocation10 + $0x308] ss:$16 sps:$4 sm:$0xff]  }
 0x336   :  { %5932 = vmatpush1.bf16.msra.mxu0 %v8111_v49  ;;  %v8186_v25 = vld [vmem:[#allocation10 + $0x508] ss:$16 sps:$4 sm:$0xff]  }
 0x337   :  { %5973 = vmatpush1.bf16.msra.mxu1 %v8114_v40  ;;  %5933 = vmatprep.subr.bf16.mxu0 %v8119_v42 }
 0x338   :  { %5974 = vmatprep.subr.bf16.mxu1 %v8122_v55 }
 0x33a   :  { %5934 = vmatpush1.bf16.msra.mxu0 %v8117_v63 }
 0x33b   :  { %5975 = vmatpush1.bf16.msra.mxu1 %v8120_v41  ;;  %5935 = vmatprep.subr.bf16.mxu0 %v8125_v43 }
 0x33c   :  { %5976 = vmatprep.subr.bf16.mxu1 %v8128_v46 }
 0x33e   :  { %5936 = vmatpush1.bf16.msra.mxu0 %v8123_v47 }
 0x33f   :  { %5977 = vmatpush1.bf16.msra.mxu1 %v8126_v48  ;;  %5937 = vmatprep.subr.bf16.mxu0 %v8131_v50 }
 0x340   :  { %5978 = vmatprep.subr.bf16.mxu1 %v8134_v51  ;;  %v6032_v51 = vld [vmem:[#allocation13] sm:$0xff] }
 0x342   :  { %5938 = vmatpush1.bf16.msra.mxu0 %v8129_v52  ;;  %v6033_v52 = vld [vmem:[#allocation13 + $0x8] sm:$0xff] }
 0x343   :  { %5979 = vmatpush1.bf16.msra.mxu1 %v8132_v53  ;;  %5939 = vmatprep.subr.bf16.mxu0 %v8137_v54 }
 0x344   :  { %5980 = vmatprep.subr.bf16.mxu1 %v8140_v56  ;;  %v6036_v56 = vcombine.high %v6032_v51, %v6032_v51 }
 0x346   :  { %5940 = vmatpush1.bf16.msra.mxu0 %v8135_v57  ;;  %v6037_v57 = vcombine.high %v6033_v52, %v6033_v52 }
 0x347   :  { %5981 = vmatpush1.bf16.msra.mxu1 %v8138_v58  ;;  %5941 = vmatprep.subr.bf16.mxu0 %v8143_v29  ;;  %v6058_v58 = vld [vmem:[%s8833_s8] sm:$0xff]  ;;  %v6059_v29 = vld [vmem:[%s8833_s8 + $0x8] sm:$0xff] }
 0x348   :  { %5982 = vmatprep.subr.bf16.mxu1 %v8146_v59  ;;  %v8727_v59 = vld [vmem:[%s8833_s8 + $0x10] sm:$0xff] }
 0x34a   :  { %5942 = vmatpush2.bf16.msra.mxu0 %v8141_v30  ;;  %v6062_v30 = vld [vmem:[%s8833_s8 + $0x20] sm:$0x7] }
 0x34b   :  { %5983 = vmatpush2.bf16.msra.mxu1 %v8144_v60  ;;  %5943 = vmatprep.subr.bf16.mxu0 %v8149_v61  ;;  %v6063_v60 = vld [vmem:[%s8833_s8 + $0x28] sm:$0x7]  ;;  %v6038_v61 = vrot.slane %v6032_v51, 7 }
 0x34c   :  { %5984 = vmatprep.subr.bf16.mxu1 %v8152_v3  ;;  %v6039_v3 = vrot.slane %v6036_v56, 7 }
 0x34d   :  { %6046 = vst [vmem:[#allocation19] sm:$0x1e] %v6038_v61  ;;  %6050 = vst [vmem:[#allocation19 + $0x40] sm:$0x1e] %v6038_v61 }
 0x34e   :  { %5944 = vmatpush2.bf16.msra.mxu0 %v8147_v4  ;;  %v6040_v4 = vrot.slane %v6033_v52, 7  ;;  %6047 = vst [vmem:[#allocation19 + $0x8] sm:$0x1e] %v6039_v3  ;;  %6051 = vst [vmem:[#allocation19 + $0x48] sm:$0x1e] %v6039_v3 }
 0x34f   :  { %5985 = vmatpush2.bf16.msra.mxu1 %v8150_v5  ;;  %5945 = vmatprep.subr.bf16.mxu0 %v8155_v7  ;;  %v6041_v5 = vrot.slane %v6037_v57, 7  ;;  %v6061_v7 = vld [vmem:[%s8833_s8 + $0x18] sm:$0xff]  ;;  %6054 = vst [vmem:[#allocation19 + $0x80] sm:$0x1e] %v6038_v61  ;;  %6055 = vst [vmem:[#allocation19 + $0x88] sm:$0x1e] %v6039_v3 }
 0x350   :  { %5986 = vmatprep.subr.bf16.mxu1 %v8158_v45  ;;  %v6064_v45 = vld [vmem:[%s8833_s8 + $0x30] sm:$0x7]  ;;  %6048 = vst [vmem:[#allocation19 + $0x10] sm:$0x1e] %v6040_v4  ;;  %6052 = vst [vmem:[#allocation19 + $0x50] sm:$0x1e] %v6040_v4 }
 0x351   :  { %6049 = vst [vmem:[#allocation19 + $0x18] sm:$0x1e] %v6041_v5  ;;  %6053 = vst [vmem:[#allocation19 + $0x58] sm:$0x1e] %v6041_v5 }
 0x352   :  { %5946 = vmatpush2.bf16.msra.mxu0 %v8153_v9  ;;  %v6065_v9 = vld [vmem:[%s8833_s8 + $0x38] sm:$0x7]  ;;  %6056 = vst [vmem:[#allocation19 + $0x90] sm:$0x1e] %v6040_v4  ;;  %6057 = vst [vmem:[#allocation19 + $0x98] sm:$0x1e] %v6041_v5 }
 0x353   :  { %5987 = vmatpush2.bf16.msra.mxu1 %v8156_v10  ;;  %5947 = vmatprep.subr.bf16.mxu0 %v8161_v14  ;;  %v6066_v10 = vld [vmem:[%s8833_s8 + $0x40] sm:$0xff]  ;;  %v6067_v14 = vld [vmem:[%s8833_s8 + $0x48] sm:$0xff] }
 0x354   :  { %5988 = vmatprep.subr.bf16.mxu1 %v8164_v11  ;;  %v6107_v11 = vrot.slane %v6058_v58, 3 }
 0x356   :  { %5948 = vmatpush2.bf16.msra.mxu0 %v8159_v12  ;;  %v6108_v12 = vrot.slane %v6059_v29, 3 }
 0x357   :  { %5989 = vmatpush2.bf16.msra.mxu1 %v8162_v13  ;;  %5949 = vmatprep.subr.bf16.mxu0 %v8167_v15 }
 0x358   :  { %5990 = vmatprep.subr.bf16.mxu1 %v8170_v16 }
 0x35a   :  { %5950 = vmatpush2.bf16.msra.mxu0 %v8165_v17 }
 0x35b   :  { %5991 = vmatpush2.bf16.msra.mxu1 %v8168_v18  ;;  %5951 = vmatprep.subr.bf16.mxu0 %v8173_v19 }
 0x35c   :  { %5992 = vmatprep.subr.bf16.mxu1 %v8176_v0 }
 0x35e   :  { %5952 = vmatpush2.bf16.msra.mxu0 %v8171_v20 }
 0x35f   :  { %5993 = vmatpush2.bf16.msra.mxu1 %v8174_v21  ;;  %5953 = vmatprep.subr.bf16.mxu0 %v8179_v22 }
 0x360   :  { %5994 = vmatprep.subr.bf16.mxu1 %v8182_v37 }
 0x362   :  { %5954 = vmatpush2.bf16.msra.mxu0 %v8177_v23 }
 0x363   :  { %5995 = vmatpush2.bf16.msra.mxu1 %v8180_v35  ;;  %5955 = vmatprep.subr.bf16.mxu0 %v8185_v24 }
 0x364   :  { %5996 = vmatprep.subr.bf16.mxu1 %v8188_v44 }
 0x366   :  { %5956 = vmatpush2.bf16.msra.mxu0 %v8183_v36 }
 0x367   :  { %5997 = vmatpush2.bf16.msra.mxu1 %v8186_v25 }
 0x369   :  { %v4488_v32 = vpop.f32.mrf.mxu0  ;;  %5958 = vmatmul.mubr.bf16.vlgmr.msra.gmra.mxu0 %v8662_v8 }
 0x36a   :  { %v4529_v33 = vpop.f32.mrf.mxu1  ;;  %5999 = vmatmul.mubr.bf16.vlgmr.msra.gmra.mxu1 %v8682_v34  ;;  %v4489_v62 = vadd.f32 %v4488_v32, %v3297_v26 }
 0x36b   :  { %v4490_v49 = vpop.f32.mrf.mxu0 }
 0x36c   :  { %v4531_v40 = vpop.f32.mrf.mxu1  ;;  %v4530_v42 = vadd.f32 %v4529_v33, %v4489_v62  ;;  %v4491_v55 = vadd.f32 %v4490_v49, %v3301_v27 }
 0x36d   :  { %v4492_v63 = vpop.f32.mrf.mxu0 }
 0x36e   :  { %v4533_v41 = vpop.f32.mrf.mxu1  ;;  %v4532_v43 = vadd.f32 %v4531_v40, %v4491_v55 }
 0x36f   :  { %v4493_v46 = vpop.f32.mrf.mxu0 }
 0x370   :  { %v4534_v47 = vpop.f32.mrf.mxu1  ;;  %v4544_v28 = vcombine.low %v4530_v42, %v4532_v43 }
 0x372   :  { %4551 = vst [vmem:[#allocation16 + $0x40] sm:$0xff] %v4544_v28 }
 0x3a9   :  { %v8710_v48 = vpop.f32.mrf.mxu0 }
 0x3aa   :  { %v8712_v39 = vpop.f32.mrf.mxu1 }
 0x3ab   :  { %v8714_v31 = vpop.f32.mrf.mxu0 }
 0x3ac   :  { %v8716_v8 = vpop.f32.mrf.mxu1 }
 0x3ad   :  { %v5799_v34 = vpop.f32.mrf.mxu0 }
 0x3ae   :  { %v5840_v50 = vpop.f32.mrf.mxu1 }
 0x3af   :  { %v5800_v53 = vpop.f32.mrf.mxu0 }
 0x3b0   :  { %v5841_v54 = vpop.f32.mrf.mxu1 }
 0x3b1   :  { %8363 = shalt.err (!%p8360_p2)
}
 0x3b2   :  { %6202 = dma.vmem_to_hbm [thread:$0]  %s6197_s14, 1152, %s8834_s9, [#allocation4], %s8427_s20, %s8427_s20, %s8428_s21   ;;  %v6109_v15 = vrot.slane %v8727_v59, 3  ;;  %v6110_v16 = vrot.slane %v6061_v7, 3  ;;  %v6111_v17 = vrot.slane %v6062_v30, 3  ;;  %v6113_v18 = vrot.slane %v6063_v60, 3 }
 0x3b3   :  { %v6068_v13 = vld [vmem:[%s8833_s8 + $0x50] sm:$0xff]  ;;  %v6069_v19 = vld [vmem:[%s8833_s8 + $0x58] sm:$0xff]  ;;  %v6070_v0 = vld [vmem:[%s8833_s8 + $0x60] sm:$0x7]  ;;  %6167 = vst [vmem:[#allocation19] sm:$0xe0] %v6107_v11 }
 0x3b4   :  { %v6071_v20 = vld [vmem:[%s8833_s8 + $0x68] sm:$0x7]  ;;  %6168 = vst [vmem:[#allocation19 + $0x8] sm:$0xe0] %v6108_v12  ;;  %v6072_v21 = vld [vmem:[%s8833_s8 + $0x70] sm:$0x7]  ;;  %v6112_v37 = vsel %vm6106_vm1, %v6107_v11, %v6111_v17  ;;  %v6114_v23 = vsel %vm6106_vm1, %v6108_v12, %v6113_v18 }
 0x3b5   :  { %v6073_v22 = vld [vmem:[%s8833_s8 + $0x78] sm:$0x7]  ;;  %v6115_v35 = vrot.slane %v6064_v45, 3  ;;  %v6117_v24 = vrot.slane %v6065_v9, 3  ;;  %6169 = vst [vmem:[#allocation19 + $0x10] sm:$0xe0] %v6109_v15 }
 0x3b6   :  { %6170 = vst [vmem:[#allocation19 + $0x18] sm:$0xe0] %v6110_v16  ;;  %v6074_v44 = vld [vmem:[%s8833_s8 + $0x80] sm:$0xff]  ;;  %v6075_v36 = vld [vmem:[%s8833_s8 + $0x88] sm:$0xff]  ;;  %v6076_v25 = vld [vmem:[%s8833_s8 + $0x90] sm:$0xff]  ;;  %v6119_v26 = vrot.slane %v6066_v10, 3 }
 0x3b7   :  { %v6120_v27 = vrot.slane %v6067_v14, 3  ;;  %6171 = vst [vmem:[#allocation19 + $0x20] sm:$0xff] %v6112_v37  ;;  %6172 = vst [vmem:[#allocation19 + $0x28] sm:$0xff] %v6114_v23  ;;  %v6077_v32 = vld [vmem:[%s8833_s8 + $0x98] sm:$0xff]  ;;  %v6078_v33 = vld [vmem:[%s8833_s8 + $0xa0] sm:$0x7]  ;;  %v6116_v49 = vsel %vm6106_vm1, %v6109_v15, %v6115_v35  ;;  %v6118_v40 = vsel %vm6106_vm1, %v6110_v16, %v6117_v24 }
 0x3b8   :  { %v6079_v62 = vld [vmem:[%s8833_s8 + $0xa8] sm:$0x7]  ;;  %v6080_v42 = vld [vmem:[%s8833_s8 + $0xb0] sm:$0x7]  ;;  %v6121_v55 = vrot.slane %v6068_v13, 3  ;;  %v6122_v63 = vrot.slane %v6069_v19, 3 }
 0x3b9   :  { %v6123_v41 = vrot.slane %v6070_v0, 3  ;;  %v6125_v43 = vrot.slane %v6071_v20, 3  ;;  %6173 = vst [vmem:[#allocation19 + $0x30] sm:$0xff] %v6116_v49  ;;  %6174 = vst [vmem:[#allocation19 + $0x38] sm:$0xff] %v6118_v40  ;;  %v6081_v46 = vld [vmem:[%s8833_s8 + $0xb8] sm:$0x7] }
 0x3ba   :  { %6175 = vst [vmem:[#allocation19 + $0x40] sm:$0xe0] %v6119_v26  ;;  %6176 = vst [vmem:[#allocation19 + $0x48] sm:$0xe0] %v6120_v27  ;;  %v6127_v47 = vrot.slane %v6072_v21, 3  ;;  %v6129_v28 = vrot.slane %v6073_v22, 3 }
 0x3bb   :  { %v6131_v34 = vrot.slane %v6074_v44, 3  ;;  %v6132_v50 = vrot.slane %v6075_v36, 3  ;;  %v6124_v51 = vsel %vm6106_vm1, %v6119_v26, %v6123_v41  ;;  %v6126_v52 = vsel %vm6106_vm1, %v6120_v27, %v6125_v43  ;;  %6177 = vst [vmem:[#allocation19 + $0x50] sm:$0xe0] %v6121_v55  ;;  %6178 = vst [vmem:[#allocation19 + $0x58] sm:$0xe0] %v6122_v63 }
 0x3bc   :  { %v6133_v53 = vrot.slane %v6076_v25, 3  ;;  %v6134_v54 = vrot.slane %v6077_v32, 3  ;;  %v6128_v56 = vsel %vm6106_vm1, %v6121_v55, %v6127_v47  ;;  %v6130_v57 = vsel %vm6106_vm1, %v6122_v63, %v6129_v28  ;;  %6179 = vst [vmem:[#allocation19 + $0x60] sm:$0xff] %v6124_v51  ;;  %6180 = vst [vmem:[#allocation19 + $0x68] sm:$0xff] %v6126_v52  ;;  %v4746_v5 = vld [vmem:[#allocation11] sm:$0xf] }
 0x3bd   :  { %v6135_v58 = vrot.slane %v6078_v33, 3  ;;  %v6137_v29 = vrot.slane %v6079_v62, 3  ;;  %6183 = vst [vmem:[#allocation19 + $0x80] sm:$0xe0] %v6131_v34  ;;  %6184 = vst [vmem:[#allocation19 + $0x88] sm:$0xe0] %v6132_v50  ;;  %v4751_v7 = vrot.slane %v4746_v5, %v8587_v38  ;;  %v4755_v45 = vrot.slane %v4746_v5, %v8590_v2 }
 0x3be   :  { %v6139_v59 = vrot.slane %v6080_v42, 3  ;;  %v6141_v30 = vrot.slane %v6081_v46, 3  ;;  %6181 = vst [vmem:[#allocation19 + $0x70] sm:$0xff] %v6128_v56  ;;  %6182 = vst [vmem:[#allocation19 + $0x78] sm:$0xff] %v6130_v57  ;;  %v4759_v2 = vrot.slane %v4746_v5, %v8601_v1  ;;  %s8446_s8 = smov [#allocation17]   ;;  %s8447_s7 = smov [#allocation19]  }
 0x3bf   :  { %6185 = vst [vmem:[#allocation19 + $0x90] sm:$0xe0] %v6133_v53  ;;  %6186 = vst [vmem:[#allocation19 + $0x98] sm:$0xe0] %v6134_v54  ;;  %v6136_v60 = vsel %vm6106_vm1, %v6131_v34, %v6135_v58  ;;  %v6138_v61 = vsel %vm6106_vm1, %v6132_v50, %v6137_v29  ;;  %v5796_v9 = vadd.f32 %v8710_v48, %v4751_v7  ;;  %s6209_s6 = sshll.u32 %s8446_s8, 4  ;;  %s6218_s24 = sshll.u32 %s8447_s7, 4  ;;  %s6210_s6 = int_to_ptr.vmem [resolvable:$true] %s6209_s6  ;;  %s6219_s24 = int_to_ptr.vmem [resolvable:$true] %s6218_s24 }
 0x3c0   :  { %v6140_v3 = vsel %vm6106_vm1, %v6133_v53, %v6139_v59  ;;  %v6142_v4 = vsel %vm6106_vm1, %v6134_v54, %v6141_v30  ;;  %6187 = vst [vmem:[#allocation19 + $0xa0] sm:$0xff] %v6136_v60  ;;  %6188 = vst [vmem:[#allocation19 + $0xa8] sm:$0xff] %v6138_v61  ;;  %v5798_v10 = vadd.f32 %v8714_v31, %v4755_v45  ;;  %s8372_s25 = scalar_lea.vmem %s6210_s6, 256  ;;  %p8377_p4 = scmp.lt.s32.totalorder %s6210_s6, %s6210_s6 }
 0x3c1   :  { %6189 = vst [vmem:[#allocation19 + $0xb0] sm:$0xff] %v6140_v3  ;;  %6190 = vst [vmem:[#allocation19 + $0xb8] sm:$0xff] %v6142_v4  ;;  %v5837_v12 = vadd.f32 %v8712_v39, %v5796_v9  ;;  %v4763_v48 = vrot.slane %v4746_v5, %v8604_v6  ;;  %p8373_p3 = scmp.ne.s32.totalorder %s6210_s6, %s8372_s25  ;;  %p8378_p5 = scmp.lt.s32.totalorder %s8372_s25, %s8372_s25 }
 0x3c2   :  { %v5839_v13 = vadd.f32 %v8716_v8, %v5798_v10 }
 0x3c3   :  { %p8379_p6 = por %p8378_p5, %p8377_p4 }
 0x3c5   :  { %p8380_p7 = pnand %p8379_p6, %p8373_p3 }
 0x3e9   :  { %v5877_v14 = vpop.f32.mrf.mxu0 }
 0x3ea   :  { %v5918_v11 = vpop.f32.mrf.mxu1  ;;  %v5878_v17 = vadd.f32 %v5877_v14, %v5837_v12 }
 0x3eb   :  { %v5879_v15 = vpop.f32.mrf.mxu0  ;;  %v5919_v31 = vadd.f32 %v5918_v11, %v4759_v2 }
 0x3ec   :  { %v5920_v16 = vpop.f32.mrf.mxu1  ;;  %v5880_v18 = vadd.f32 %v5879_v15, %v5839_v13 }
 0x3ed   :  { %v5881_v19 = vpop.f32.mrf.mxu0  ;;  %v5921_v39 = vadd.f32 %v5920_v16, %v4763_v48 }
 0x3ee   :  { %v5922_v0 = vpop.f32.mrf.mxu1  ;;  %v6011_v20 = vcombine.low %v5878_v17, %v5880_v18 }
 0x3ef   :  { %v5882_v38 = vpop.f32.mrf.mxu0 }
 0x3f0   :  { %v5923_v21 = vpop.f32.mrf.mxu1  ;;  %6015 = vst [vmem:[#allocation17] sm:$0xff] %v6011_v20 }
 0x429   :  { %v5959_v22 = vpop.f32.mrf.mxu0 }
 0x42a   :  { %v6000_v37 = vpop.f32.mrf.mxu1  ;;  %v5960_v23 = vadd.f32 %v5959_v22, %v5919_v31 }
 0x42b   :  { %v5961_v8 = vpop.f32.mrf.mxu0 }
 0x42c   :  { %v6002_v35 = vpop.f32.mrf.mxu1  ;;  %v5962_v24 = vadd.f32 %v5961_v8, %v5921_v39  ;;  %v6001_v25 = vadd.f32 %v6000_v37, %v5960_v23 }
 0x42d   :  { %v5963_v44 = vpop.f32.mrf.mxu0 }
 0x42e   :  { %v6004_v36 = vpop.f32.mrf.mxu1  ;;  %v6003_v26 = vadd.f32 %v6002_v35, %v5962_v24 }
 0x42f   :  { %v5964_v27 = vpop.f32.mrf.mxu0 }
 0x430   :  { %v6005_v1 = vpop.f32.mrf.mxu1  ;;  %v6012_v32 = vcombine.low %v6001_v25, %v6003_v26 }
 0x432   :  { %6016 = vst [vmem:[#allocation17 + $0x8] sm:$0xff] %v6012_v32 }
 0x433   :  { %8383 = shalt.err (!%p8380_p7)
}
 0x434   :  { %6212 = dma.vmem_to_hbm [thread:$0]  %s6210_s6, 256, %s8835_s10, [#allocation18]  }
 0x435   :  { %s8392_s28 = scalar_lea.vmem %s6219_s24, 3072  ;;  %p8397_p9 = scmp.lt.s32.totalorder %s6219_s24, %s6219_s24 }
 0x436   :  { %p8393_p8 = scmp.ne.s32.totalorder %s6219_s24, %s8392_s28  ;;  %p8398_p10 = scmp.lt.s32.totalorder %s8392_s28, %s8392_s28 }
 0x438   :  { %p8399_p11 = por %p8398_p10, %p8397_p9 }
 0x43a   :  { %p8400_p12 = pnand %p8399_p11, %p8393_p8 }
 0x43c   :  { %8403 = shalt.err (!%p8400_p12)
}
 0x43d   :  { %s8448_s29 = smov 512   ;;  %s8449_s9 = smov 32  }
 0x43e   :  { %6224 = dma.vmem_to_hbm [thread:$0]  %s6219_s24, 3072, %s8836_s11, [#allocation18], %s8448_s29, %s8448_s29, %s8449_s9  }
 0x43f   :  { %8422 = dma.done.wait [#allocation4], 1152  }
 0x440   :  { %8423 = vsyncadd [#allocation4], 4294966144 }
 0x441   :  { %8424 = dma.done.wait [#allocation18], 3328  }
 0x442   :  { %8425 = vsyncadd [#allocation18], 4294963968 }
 0x443   :  { %6234 = vsyncpa [#allocation3], 1 }
 0x444   :  { %6235 = vsyncpa [#allocation6], 1 }
 0x445   :  { %6236 = vsyncpa [#allocation9], 1 }
 0x446   :  { %6237 = vsyncpa [#allocation12], 1 }
 0x447   :  { %6238 = vsyncpa [#allocation15], 1 }
 0x448   :  { %6239 = vsyncpa [#allocation4], 1 }
 0x449   :  { %6240 = vsyncpa [#allocation18], 1 }

</bundles_post_ra>
